<compile_context>
chip_gen: v5e
topology: v5e:2x2
jax: 0.10.0
libtpu: 0.0.40
codegen_flags: <defaults>
</compile_context>

<pallas_src>
import math
import functools

import jax
import jax.numpy as jnp
from jax.experimental import pallas as pl
from jax.experimental.pallas import tpu as pltpu


# --------------------------------------------------------------------------
# Fused forward kernel
# --------------------------------------------------------------------------
def _fused_forward_kernel(*refs, n_obs, nhead, num_layers,
                          n_mlp_obs, n_mlp_unobs, sqrt_d):
    f32 = jnp.float32
    out_ref = refs[-1]
    it = iter(refs[:-1])

    x_obs = next(it)[...]       # (n_obs,  idx_embed_dim + 2)
    x_unobs = next(it)[...]     # (n_unobs, idx_embed_dim + 1)

    def run_mlp(x, n_lin):
        for i in range(n_lin):                       # static unroll
            w = next(it)[...]
            b = next(it)[...]
            x = jnp.dot(x, w, preferred_element_type=f32) + b
            if i < n_lin - 1:
                x = jnp.maximum(x, 0.0)
        return x

    h_obs = run_mlp(x_obs, n_mlp_obs) * sqrt_d
    h_unobs = run_mlp(x_unobs, n_mlp_unobs) * sqrt_d
    h = jnp.concatenate([h_obs, h_unobs], axis=0)    # (N, d_model)

    # Stacked encoder parameters.
    wqkv_ref = next(it)   # (L, d, 3d)   (scale folded into Q columns)
    bqkv_ref = next(it)   # (L, 1, 3d)
    wo_ref = next(it)     # (L, d, d)
    w1_ref = next(it)     # (L, d, dff)
    b1_ref = next(it)     # (L, 1, dff)
    w2_ref = next(it)     # (L, dff, d)
    vec_ref = next(it)    # (L, 6, d) rows: bo, b2, ln1_g, ln1_b, ln2_g, ln2_b
    fw_ref = next(it)     # (d, 128) lane-dense padded final weight
    fb_ref = next(it)     # (1, 128)

    n, d = h.shape
    dh = d // nhead

    def layer_norm(y, g, b):
        mu = jnp.mean(y, axis=-1, keepdims=True)
        c = y - mu
        var = jnp.mean(c * c, axis=-1, keepdims=True)
        return c * jax.lax.rsqrt(var + 1e-5) * g + b

    for l in range(num_layers):                      # static unroll
        wqkv = wqkv_ref[l]
        bqkv = bqkv_ref[l]
        wo = wo_ref[l]
        w1 = w1_ref[l]
        b1 = b1_ref[l]
        w2 = w2_ref[l]
        vecs = vec_ref[l]
        bo, b2 = vecs[0:1, :], vecs[1:2, :]
        ln1_g, ln1_b = vecs[2:3, :], vecs[3:4, :]
        ln2_g, ln2_b = vecs[4:5, :], vecs[5:6, :]

        # Fused QKV projection (one MXU push, 3d output lanes).
        qkv = jnp.dot(h, wqkv, preferred_element_type=f32) + bqkv   # (n, 3d)
        q = qkv[:, 0:d]
        k = qkv[:, d:2 * d]
        v = qkv[:, 2 * d:3 * d]

        # Heads on the leading axis; batched einsums (no kh.T, no concat).
        qh = jnp.swapaxes(q.reshape(n, nhead, dh), 0, 1)   # (nhead, n, dh)
        kh = jnp.swapaxes(k.reshape(n, nhead, dh), 0, 1)
        vh = jnp.swapaxes(v.reshape(n, nhead, dh), 0, 1)

        s = jnp.einsum('hqd,hkd->hqk', qh, kh,
                       preferred_element_type=f32)          # (nhead, n, n)
        s = s - jnp.max(s, axis=-1, keepdims=True)
        p = jnp.exp(s)
        p = p * pl.reciprocal(jnp.sum(p, axis=-1, keepdims=True), approx=True)
        ctx = jnp.einsum('hqk,hkd->hqd', p, vh,
                         preferred_element_type=f32)        # (nhead, n, dh)
        attn = jnp.swapaxes(ctx, 0, 1).reshape(n, d)
        attn = jnp.dot(attn, wo, preferred_element_type=f32) + bo

        # Post-norm encoder layer (PyTorch default norm_first=False).
        y = layer_norm(h + attn, ln1_g, ln1_b)
        ff = jnp.maximum(jnp.dot(y, w1, preferred_element_type=f32) + b1, 0.0)
        ff = jnp.dot(ff, w2, preferred_element_type=f32) + b2
        h = layer_norm(y + ff, ln2_g, ln2_b)

    # Final projection for the unobserved rows, written lane-dense (128 cols).
    preds = jnp.dot(h[n_obs:, :], fw_ref[...],
                    preferred_element_type=f32) + fb_ref[...]
    out_ref[...] = preds


def pallas_forward(packed, x_obs, x_unobs, *, nhead, num_layers, d_model):
    n_obs = x_obs.shape[0]
    n_unobs = x_unobs.shape[0]
    mlp_obs_flat = [a for wb in packed['mlp_obs'] for a in wb]
    mlp_unobs_flat = [a for wb in packed['mlp_unobs'] for a in wb]
    args = [x_obs, x_unobs, *mlp_obs_flat, *mlp_unobs_flat,
            packed['wqkv'], packed['bqkv'], packed['wo'],
            packed['w1'], packed['b1'], packed['w2'], packed['vecs'],
            packed['final_w'], packed['final_b']]

    kernel = functools.partial(
        _fused_forward_kernel,
        n_obs=n_obs, nhead=nhead, num_layers=num_layers,
        n_mlp_obs=len(packed['mlp_obs']),
        n_mlp_unobs=len(packed['mlp_unobs']),
        sqrt_d=math.sqrt(d_model))

    vmem = pl.BlockSpec(memory_space=pltpu.MemorySpace.VMEM)
    out = pl.pallas_call(
        kernel,
        out_shape=jax.ShapeDtypeStruct((n_unobs, 128), jnp.float32),
        in_specs=[vmem] * len(args),
        out_specs=vmem,
    )(*args)
    return out[:, 0:1]   # column 0 of the lane-dense slab


# --------------------------------------------------------------------------
# Parameter init (deterministic, synthetic) and kernel-side packing
# --------------------------------------------------------------------------
def init_params(key, n_feats, idx_embed_dim, mlp_layers, nhead,
                dim_feedforward, num_layers):
    keys = iter(jax.random.split(key, 256))

    def lin(din, dout):
        w = jax.random.normal(next(keys), (din, dout), jnp.float32) / math.sqrt(din)
        b = jax.random.normal(next(keys), (dout,), jnp.float32) * 0.01
        return w, b

    d_model = mlp_layers[-1]
    params = {
        'idx_embedding':
            jax.random.normal(next(keys), (n_feats, idx_embed_dim), jnp.float32) * 0.1
    }
    for which, extra in (('obs', 2), ('unobs', 1)):
        layers, din = [], idx_embed_dim + extra
        for dout in mlp_layers:
            layers.append(lin(din, dout))
            din = dout
        params[f'mlp_{which}'] = layers

    enc = []
    for _ in range(num_layers):
        wq, bq = lin(d_model, d_model)
        wk, bk = lin(d_model, d_model)
        wv, bv = lin(d_model, d_model)
        wo, bo = lin(d_model, d_model)
        w1, b1 = lin(d_model, dim_feedforward)
        w2, b2 = lin(dim_feedforward, d_model)
        enc.append(dict(
            wq=wq, bq=bq, wk=wk, bk=bk, wv=wv, bv=bv, wo=wo, bo=bo,
            w1=w1, b1=b1, w2=w2, b2=b2,
            ln1_g=jnp.ones((d_model,), jnp.float32),
            ln1_b=jnp.zeros((d_model,), jnp.float32),
            ln2_g=jnp.ones((d_model,), jnp.float32),
            ln2_b=jnp.zeros((d_model,), jnp.float32)))
    params['layers'] = enc

    # final_layer: weight uniform(-0.1, 0.1), bias zero (matches module init).
    params['final_w'] = jax.random.uniform(
        next(keys), (d_model, 1), jnp.float32, -0.1, 0.1)
    params['final_b'] = jnp.zeros((1,), jnp.float32)
    return params


def pack_params(params, nhead, d_model):
    """Pack canonical params into the fused-kernel layout."""
    dh = d_model // nhead
    scale = 1.0 / math.sqrt(dh)
    wqkv, bqkv, wo, w1, b1, w2, vecs = [], [], [], [], [], [], []
    for p in params['layers']:
        # Fold attention scale into Q projection (weights AND bias).
        wqkv.append(jnp.concatenate([p['wq'] * scale, p['wk'], p['wv']], axis=1))
        bqkv.append(jnp.concatenate([p['bq'] * scale, p['bk'], p['bv']],
                                    axis=0)[None, :])
        wo.append(p['wo'])
        w1.append(p['w1'])
        b1.append(p['b1'][None, :])
        w2.append(p['w2'])
        vecs.append(jnp.stack([p['bo'], p['b2'], p['ln1_g'], p['ln1_b'],
                               p['ln2_g'], p['ln2_b']], axis=0))
    return dict(
        wqkv=jnp.stack(wqkv), bqkv=jnp.stack(bqkv), wo=jnp.stack(wo),
        w1=jnp.stack(w1), b1=jnp.stack(b1), w2=jnp.stack(w2),
        vecs=jnp.stack(vecs),
        # Lane-dense (128-wide) padding of the final projection.
        final_w=jnp.pad(params['final_w'], ((0, 0), (0, 127))),
        final_b=jnp.pad(params['final_b'][None, :], ((0, 0), (0, 127))),
        mlp_obs=[(w, b[None, :]) for (w, b) in params['mlp_obs']],
        mlp_unobs=[(w, b[None, :]) for (w, b) in params['mlp_unobs']],
    )


# --------------------------------------------------------------------------
# Glue (embedding gather + concat) shared by kernel and reference paths
# --------------------------------------------------------------------------
def embed_inputs(params, tensors):
    obs_vals = tensors['obs_vals'][:, None]
    obs_times = tensors['obs_times'][:, None]
    obs_emb = params['idx_embedding'][tensors['obs_feat_idxs']]
    x_obs = jnp.concatenate([obs_vals, obs_times, obs_emb], axis=1)

    unobs_times = tensors['unobs_times'][:, None]
    unobs_emb = params['idx_embedding'][tensors['unobs_feat_idxs']]
    x_unobs = jnp.concatenate([unobs_times, unobs_emb], axis=1)
    return x_obs, x_unobs


# --------------------------------------------------------------------------
# Pure-JAX reference (correctness check only)
# --------------------------------------------------------------------------
def _ref_linear(x, w, b, relu=False):
    y = jnp.dot(x, w, precision=jax.lax.Precision.HIGHEST) + b
    return jnp.maximum(y, 0.0) if relu else y


def _ref_encoder_layer(x, p, nhead):
    n, d = x.shape
    dh = d // nhead
    q = _ref_linear(x, p['wq'], p['bq'])
    k = _ref_linear(x, p['wk'], p['bk'])
    v = _ref_linear(x, p['wv'], p['bv'])
    heads = []
    for h in range(nhead):
        qh, kh, vh = (t[:, h * dh:(h + 1) * dh] for t in (q, k, v))
        s = jnp.dot(qh, kh.T, precision=jax.lax.Precision.HIGHEST) / math.sqrt(dh)
        s = s - jnp.max(s, axis=-1, keepdims=True)
        ps = jnp.exp(s)
        ps = ps / jnp.sum(ps, axis=-1, keepdims=True)
        heads.append(jnp.dot(ps, vh, precision=jax.lax.Precision.HIGHEST))
    attn = _ref_linear(jnp.concatenate(heads, axis=-1), p['wo'], p['bo'])

    def ln(y, g, b):
        mu = jnp.mean(y, -1, keepdims=True)
        var = jnp.mean((y - mu) ** 2, -1, keepdims=True)
        return (y - mu) * jax.lax.rsqrt(var + 1e-5) * g + b

    y = ln(x + attn, p['ln1_g'], p['ln1_b'])
    ff = _ref_linear(_ref_linear(y, p['w1'], p['b1'], relu=True), p['w2'], p['b2'])
    return ln(y + ff, p['ln2_g'], p['ln2_b'])


def ref_forward(params, x_obs, x_unobs, nhead, d_model):
    x = x_obs
    nl = len(params['mlp_obs'])
    for i, (w, b) in enumerate(params['mlp_obs']):
        x = _ref_linear(x, w, b, relu=(i < nl - 1))
    obs_inputs = x * math.sqrt(d_model)

    x = x_unobs
    nl = len(params['mlp_unobs'])
    for i, (w, b) in enumerate(params['mlp_unobs']):
        x = _ref_linear(x, w, b, relu=(i < nl - 1))
    unobs_inputs = x * math.sqrt(d_model)

    h = jnp.concatenate([obs_inputs, unobs_inputs], axis=0)
    for lp in params['layers']:
        h = _ref_encoder_layer(h, lp, nhead)
    n_obs = obs_inputs.shape[0]
    return _ref_linear(h[n_obs:], params['final_w'], params['final_b'])


# --------------------------------------------------------------------------
if __name__ == "__main__":
    # Module hyperparameters (small, consistent with __init__).
    n_feats = 8
    idx_embed_dim = 6
    mlp_layers = (32, 32)
    nhead = 4
    dim_feedforward = 64
    num_layers = 2
    d_model = mlp_layers[-1]

    n_obs, n_unobs = 16, 16

    key = jax.random.PRNGKey(0)
    pkey, dkey = jax.random.split(key)
    params = init_params(pkey, n_feats, idx_embed_dim, mlp_layers, nhead,
                         dim_feedforward, num_layers)
    packed = pack_params(params, nhead, d_model)

    k1, k2, k3, k4, k5 = jax.random.split(dkey, 5)
    tensors = {
        'obs_vals': jax.random.normal(k1, (n_obs,), jnp.float32),
        'obs_times': jax.random.uniform(k2, (n_obs,), jnp.float32),
        'obs_feat_idxs': jax.random.randint(k3, (n_obs,), 0, n_feats),
        'unobs_times': jax.random.uniform(k4, (n_unobs,), jnp.float32),
        'unobs_feat_idxs': jax.random.randint(k5, (n_unobs,), 0, n_feats),
    }

    x_obs, x_unobs = embed_inputs(params, tensors)

    preds = pallas_forward(packed, x_obs, x_unobs,
                           nhead=nhead, num_layers=num_layers, d_model=d_model)
    preds = jax.block_until_ready(preds)

    ref = ref_forward(params, x_obs, x_unobs, nhead, d_model)
    ref = jax.block_until_ready(ref)

    assert preds.shape == (n_unobs, 1), preds.shape
    # Tolerance: TPU f32 MXU precision + approx EUP reciprocal in the softmax
    # vs. a Precision.HIGHEST exact-division reference.
    assert jnp.allclose(preds, ref, atol=5e-3, rtol=5e-3), (
        float(jnp.max(jnp.abs(preds - ref))))

    print("KERNEL_OK")
</pallas_src>

<mosaic_0001>
module attributes {stable_mosaic.version = 11 : i64} {
  func.func @_fused_forward_kernel(%arg0: memref<16x8xf32, #tpu.memory_space<vmem>>, %arg1: memref<16x7xf32, #tpu.memory_space<vmem>>, %arg2: memref<8x32xf32, #tpu.memory_space<vmem>>, %arg3: memref<1x32xf32, #tpu.memory_space<vmem>>, %arg4: memref<32x32xf32, #tpu.memory_space<vmem>>, %arg5: memref<1x32xf32, #tpu.memory_space<vmem>>, %arg6: memref<7x32xf32, #tpu.memory_space<vmem>>, %arg7: memref<1x32xf32, #tpu.memory_space<vmem>>, %arg8: memref<32x32xf32, #tpu.memory_space<vmem>>, %arg9: memref<1x32xf32, #tpu.memory_space<vmem>>, %arg10: memref<2x32x96xf32, #tpu.memory_space<vmem>>, %arg11: memref<2x1x96xf32, #tpu.memory_space<vmem>>, %arg12: memref<2x32x32xf32, #tpu.memory_space<vmem>>, %arg13: memref<2x32x64xf32, #tpu.memory_space<vmem>>, %arg14: memref<2x1x64xf32, #tpu.memory_space<vmem>>, %arg15: memref<2x64x32xf32, #tpu.memory_space<vmem>>, %arg16: memref<2x6x32xf32, #tpu.memory_space<vmem>>, %arg17: memref<32x128xf32, #tpu.memory_space<vmem>>, %arg18: memref<1x128xf32, #tpu.memory_space<vmem>>, %arg19: memref<16x128xf32, #tpu.memory_space<vmem>>) attributes {dimension_semantics = [], scalar_prefetch = 0 : i64, scratch_operands = 0 : i64, tpu.core_type = #tpu.core_type<tc>} {
    %c0 = arith.constant 0 : index
    %c0_0 = arith.constant 0 : index
    %0 = vector.load %arg0[%c0, %c0_0] : memref<16x8xf32, #tpu.memory_space<vmem>>, vector<16x8xf32>
    %c0_1 = arith.constant 0 : index
    %c0_2 = arith.constant 0 : index
    %1 = vector.load %arg1[%c0_1, %c0_2] : memref<16x7xf32, #tpu.memory_space<vmem>>, vector<16x7xf32>
    %c0_3 = arith.constant 0 : index
    %c0_4 = arith.constant 0 : index
    %2 = vector.load %arg2[%c0_3, %c0_4] : memref<8x32xf32, #tpu.memory_space<vmem>>, vector<8x32xf32>
    %c0_5 = arith.constant 0 : index
    %c0_6 = arith.constant 0 : index
    %3 = vector.load %arg3[%c0_5, %c0_6] : memref<1x32xf32, #tpu.memory_space<vmem>>, vector<1x32xf32>
    %cst = arith.constant dense<0.000000e+00> : vector<16x32xf32>
    %4 = tpu.matmul %0, %2, %cst {dimension_numbers = #tpu.dot_dimension_numbers<[1], [0], [0], [1], [0, 0, 1, 1], [], []>} : vector<16x8xf32>, vector<8x32xf32>, vector<16x32xf32> -> vector<16x32xf32>
    %5 = vector.broadcast %3 : vector<1x32xf32> to vector<16x32xf32>
    %6 = arith.addf %4, %5 : vector<16x32xf32>
    %cst_7 = arith.constant 0.000000e+00 : f32
    %7 = vector.broadcast %cst_7 : f32 to vector<16x32xf32>
    %8 = arith.maximumf %6, %7 : vector<16x32xf32>
    %c0_8 = arith.constant 0 : index
    %c0_9 = arith.constant 0 : index
    %9 = vector.load %arg4[%c0_8, %c0_9] : memref<32x32xf32, #tpu.memory_space<vmem>>, vector<32x32xf32>
    %c0_10 = arith.constant 0 : index
    %c0_11 = arith.constant 0 : index
    %10 = vector.load %arg5[%c0_10, %c0_11] : memref<1x32xf32, #tpu.memory_space<vmem>>, vector<1x32xf32>
    %cst_12 = arith.constant dense<0.000000e+00> : vector<16x32xf32>
    %11 = tpu.matmul %8, %9, %cst_12 {dimension_numbers = #tpu.dot_dimension_numbers<[1], [0], [0], [1], [0, 0, 1, 1], [], []>} : vector<16x32xf32>, vector<32x32xf32>, vector<16x32xf32> -> vector<16x32xf32>
    %12 = vector.broadcast %10 : vector<1x32xf32> to vector<16x32xf32>
    %13 = arith.addf %11, %12 : vector<16x32xf32>
    %cst_13 = arith.constant 5.65685415 : f32
    %14 = vector.broadcast %cst_13 : f32 to vector<16x32xf32>
    %15 = arith.mulf %13, %14 : vector<16x32xf32>
    %c0_14 = arith.constant 0 : index
    %c0_15 = arith.constant 0 : index
    %16 = vector.load %arg6[%c0_14, %c0_15] : memref<7x32xf32, #tpu.memory_space<vmem>>, vector<7x32xf32>
    %c0_16 = arith.constant 0 : index
    %c0_17 = arith.constant 0 : index
    %17 = vector.load %arg7[%c0_16, %c0_17] : memref<1x32xf32, #tpu.memory_space<vmem>>, vector<1x32xf32>
    %cst_18 = arith.constant dense<0.000000e+00> : vector<16x32xf32>
    %18 = tpu.matmul %1, %16, %cst_18 {dimension_numbers = #tpu.dot_dimension_numbers<[1], [0], [0], [1], [0, 0, 1, 1], [], []>} : vector<16x7xf32>, vector<7x32xf32>, vector<16x32xf32> -> vector<16x32xf32>
    %19 = vector.broadcast %17 : vector<1x32xf32> to vector<16x32xf32>
    %20 = arith.addf %18, %19 : vector<16x32xf32>
    %cst_19 = arith.constant 0.000000e+00 : f32
    %21 = vector.broadcast %cst_19 : f32 to vector<16x32xf32>
    %22 = arith.maximumf %20, %21 : vector<16x32xf32>
    %c0_20 = arith.constant 0 : index
    %c0_21 = arith.constant 0 : index
    %23 = vector.load %arg8[%c0_20, %c0_21] : memref<32x32xf32, #tpu.memory_space<vmem>>, vector<32x32xf32>
    %c0_22 = arith.constant 0 : index
    %c0_23 = arith.constant 0 : index
    %24 = vector.load %arg9[%c0_22, %c0_23] : memref<1x32xf32, #tpu.memory_space<vmem>>, vector<1x32xf32>
    %cst_24 = arith.constant dense<0.000000e+00> : vector<16x32xf32>
    %25 = tpu.matmul %22, %23, %cst_24 {dimension_numbers = #tpu.dot_dimension_numbers<[1], [0], [0], [1], [0, 0, 1, 1], [], []>} : vector<16x32xf32>, vector<32x32xf32>, vector<16x32xf32> -> vector<16x32xf32>
    %26 = vector.broadcast %24 : vector<1x32xf32> to vector<16x32xf32>
    %27 = arith.addf %25, %26 : vector<16x32xf32>
    %cst_25 = arith.constant 5.65685415 : f32
    %28 = vector.broadcast %cst_25 : f32 to vector<16x32xf32>
    %29 = arith.mulf %27, %28 : vector<16x32xf32>
    %30 = tpu.concatenate %15, %29 in 0 : vector<16x32xf32>, vector<16x32xf32> -> vector<32x32xf32>
    %c0_26 = arith.constant 0 : index
    %c0_27 = arith.constant 0 : index
    %c0_28 = arith.constant 0 : index
    %31 = vector.load %arg10[%c0_26, %c0_27, %c0_28] : memref<2x32x96xf32, #tpu.memory_space<vmem>>, vector<1x32x96xf32>
    %32 = vector.shape_cast %31 : vector<1x32x96xf32> to vector<32x96xf32>
    %c0_29 = arith.constant 0 : index
    %c0_30 = arith.constant 0 : index
    %c0_31 = arith.constant 0 : index
    %33 = vector.load %arg11[%c0_29, %c0_30, %c0_31] : memref<2x1x96xf32, #tpu.memory_space<vmem>>, vector<1x1x96xf32>
    %34 = vector.shape_cast %33 : vector<1x1x96xf32> to vector<1x96xf32>
    %c0_32 = arith.constant 0 : index
    %c0_33 = arith.constant 0 : index
    %c0_34 = arith.constant 0 : index
    %35 = vector.load %arg12[%c0_32, %c0_33, %c0_34] : memref<2x32x32xf32, #tpu.memory_space<vmem>>, vector<1x32x32xf32>
    %36 = vector.shape_cast %35 : vector<1x32x32xf32> to vector<32x32xf32>
    %c0_35 = arith.constant 0 : index
    %c0_36 = arith.constant 0 : index
    %c0_37 = arith.constant 0 : index
    %37 = vector.load %arg13[%c0_35, %c0_36, %c0_37] : memref<2x32x64xf32, #tpu.memory_space<vmem>>, vector<1x32x64xf32>
    %38 = vector.shape_cast %37 : vector<1x32x64xf32> to vector<32x64xf32>
    %c0_38 = arith.constant 0 : index
    %c0_39 = arith.constant 0 : index
    %c0_40 = arith.constant 0 : index
    %39 = vector.load %arg14[%c0_38, %c0_39, %c0_40] : memref<2x1x64xf32, #tpu.memory_space<vmem>>, vector<1x1x64xf32>
    %40 = vector.shape_cast %39 : vector<1x1x64xf32> to vector<1x64xf32>
    %c0_41 = arith.constant 0 : index
    %c0_42 = arith.constant 0 : index
    %c0_43 = arith.constant 0 : index
    %41 = vector.load %arg15[%c0_41, %c0_42, %c0_43] : memref<2x64x32xf32, #tpu.memory_space<vmem>>, vector<1x64x32xf32>
    %42 = vector.shape_cast %41 : vector<1x64x32xf32> to vector<64x32xf32>
    %c0_44 = arith.constant 0 : index
    %c0_45 = arith.constant 0 : index
    %c0_46 = arith.constant 0 : index
    %43 = vector.load %arg16[%c0_44, %c0_45, %c0_46] : memref<2x6x32xf32, #tpu.memory_space<vmem>>, vector<1x6x32xf32>
    %44 = vector.shape_cast %43 : vector<1x6x32xf32> to vector<6x32xf32>
    %45 = vector.extract_strided_slice %44 {offsets = [0, 0], sizes = [1, 32], strides = [1, 1]} : vector<6x32xf32> to vector<1x32xf32>
    %46 = vector.extract_strided_slice %44 {offsets = [1, 0], sizes = [1, 32], strides = [1, 1]} : vector<6x32xf32> to vector<1x32xf32>
    %47 = vector.extract_strided_slice %44 {offsets = [2, 0], sizes = [1, 32], strides = [1, 1]} : vector<6x32xf32> to vector<1x32xf32>
    %48 = vector.extract_strided_slice %44 {offsets = [3, 0], sizes = [1, 32], strides = [1, 1]} : vector<6x32xf32> to vector<1x32xf32>
    %49 = vector.extract_strided_slice %44 {offsets = [4, 0], sizes = [1, 32], strides = [1, 1]} : vector<6x32xf32> to vector<1x32xf32>
    %50 = vector.extract_strided_slice %44 {offsets = [5, 0], sizes = [1, 32], strides = [1, 1]} : vector<6x32xf32> to vector<1x32xf32>
    %cst_47 = arith.constant dense<0.000000e+00> : vector<32x96xf32>
    %51 = tpu.matmul %30, %32, %cst_47 {dimension_numbers = #tpu.dot_dimension_numbers<[1], [0], [0], [1], [0, 0, 1, 1], [], []>} : vector<32x32xf32>, vector<32x96xf32>, vector<32x96xf32> -> vector<32x96xf32>
    %52 = vector.broadcast %34 : vector<1x96xf32> to vector<32x96xf32>
    %53 = arith.addf %51, %52 : vector<32x96xf32>
    %54 = vector.extract_strided_slice %53 {offsets = [0, 0], sizes = [32, 32], strides = [1, 1]} : vector<32x96xf32> to vector<32x32xf32>
    %55 = vector.extract_strided_slice %53 {offsets = [0, 32], sizes = [32, 32], strides = [1, 1]} : vector<32x96xf32> to vector<32x32xf32>
    %56 = vector.extract_strided_slice %53 {offsets = [0, 64], sizes = [32, 32], strides = [1, 1]} : vector<32x96xf32> to vector<32x32xf32>
    %57 = vector.shape_cast %54 : vector<32x32xf32> to vector<32x4x8xf32>
    %58 = tpu.transpose %57, [1, 0, 2] : vector<32x4x8xf32> -> vector<4x32x8xf32>
    %59 = vector.shape_cast %55 : vector<32x32xf32> to vector<32x4x8xf32>
    %60 = tpu.transpose %59, [1, 0, 2] : vector<32x4x8xf32> -> vector<4x32x8xf32>
    %61 = vector.shape_cast %56 : vector<32x32xf32> to vector<32x4x8xf32>
    %62 = tpu.transpose %61, [1, 0, 2] : vector<32x4x8xf32> -> vector<4x32x8xf32>
    "tpu.trace_start"() <{level = 10 : i32, message = "hqd,hkd->hqk"}> : () -> ()
    %cst_48 = arith.constant dense<0.000000e+00> : vector<4x32x32xf32>
    %63 = tpu.matmul %58, %60, %cst_48 {dimension_numbers = #tpu.dot_dimension_numbers<[2], [2], [1], [1], [0, 0, 0, 1, 1, 1], [0], [0]>} : vector<4x32x8xf32>, vector<4x32x8xf32>, vector<4x32x32xf32> -> vector<4x32x32xf32>
    "tpu.trace_stop"() : () -> ()
    %cst_49 = arith.constant dense<0xFF800000> : vector<4x32xf32>
    %64 = vector.multi_reduction <maximumf>, %63, %cst_49 [2] : vector<4x32x32xf32> to vector<4x32xf32>
    %65 = vector.shape_cast %64 : vector<4x32xf32> to vector<4x32x1xf32>
    %66 = vector.broadcast %65 : vector<4x32x1xf32> to vector<4x32x32xf32>
    %67 = arith.subf %63, %66 : vector<4x32x32xf32>
    %68 = math.exp %67 : vector<4x32x32xf32>
    %cst_50 = arith.constant dense<0.000000e+00> : vector<4x32xf32>
    %69 = vector.multi_reduction <add>, %68, %cst_50 [2] : vector<4x32x32xf32> to vector<4x32xf32>
    %70 = vector.shape_cast %69 : vector<4x32xf32> to vector<4x32x1xf32>
    %71 = tpu.reciprocal %70 {approx = true} : vector<4x32x1xf32> -> vector<4x32x1xf32>
    %72 = vector.broadcast %71 : vector<4x32x1xf32> to vector<4x32x32xf32>
    %73 = arith.mulf %68, %72 : vector<4x32x32xf32>
    "tpu.trace_start"() <{level = 10 : i32, message = "hqk,hkd->hqd"}> : () -> ()
    %cst_51 = arith.constant dense<0.000000e+00> : vector<4x32x8xf32>
    %74 = tpu.matmul %73, %62, %cst_51 {dimension_numbers = #tpu.dot_dimension_numbers<[2], [1], [1], [2], [0, 0, 0, 1, 1, 2], [0], [0]>} : vector<4x32x32xf32>, vector<4x32x8xf32>, vector<4x32x8xf32> -> vector<4x32x8xf32>
    "tpu.trace_stop"() : () -> ()
    %75 = tpu.transpose %74, [1, 0, 2] : vector<4x32x8xf32> -> vector<32x4x8xf32>
    %76 = vector.shape_cast %75 : vector<32x4x8xf32> to vector<32x32xf32>
    %cst_52 = arith.constant dense<0.000000e+00> : vector<32x32xf32>
    %77 = tpu.matmul %76, %36, %cst_52 {dimension_numbers = #tpu.dot_dimension_numbers<[1], [0], [0], [1], [0, 0, 1, 1], [], []>} : vector<32x32xf32>, vector<32x32xf32>, vector<32x32xf32> -> vector<32x32xf32>
    %78 = vector.broadcast %45 : vector<1x32xf32> to vector<32x32xf32>
    %79 = arith.addf %77, %78 : vector<32x32xf32>
    %80 = arith.addf %30, %79 : vector<32x32xf32>
    %cst_53 = arith.constant dense<0.000000e+00> : vector<32xf32>
    %81 = vector.multi_reduction <add>, %80, %cst_53 [1] : vector<32x32xf32> to vector<32xf32>
    %82 = vector.shape_cast %81 : vector<32xf32> to vector<32x1xf32>
    %cst_54 = arith.constant 3.200000e+01 : f32
    %83 = vector.broadcast %cst_54 : f32 to vector<32x1xf32>
    %84 = arith.divf %82, %83 : vector<32x1xf32>
    %85 = vector.broadcast %84 : vector<32x1xf32> to vector<32x32xf32>
    %86 = arith.subf %80, %85 : vector<32x32xf32>
    %87 = arith.mulf %86, %86 : vector<32x32xf32>
    %cst_55 = arith.constant dense<0.000000e+00> : vector<32xf32>
    %88 = vector.multi_reduction <add>, %87, %cst_55 [1] : vector<32x32xf32> to vector<32xf32>
    %89 = vector.shape_cast %88 : vector<32xf32> to vector<32x1xf32>
    %cst_56 = arith.constant 3.200000e+01 : f32
    %90 = vector.broadcast %cst_56 : f32 to vector<32x1xf32>
    %91 = arith.divf %89, %90 : vector<32x1xf32>
    %cst_57 = arith.constant 9.99999974E-6 : f32
    %92 = vector.broadcast %cst_57 : f32 to vector<32x1xf32>
    %93 = arith.addf %91, %92 : vector<32x1xf32>
    %94 = math.rsqrt %93 : vector<32x1xf32>
    %95 = vector.broadcast %94 : vector<32x1xf32> to vector<32x32xf32>
    %96 = arith.mulf %86, %95 : vector<32x32xf32>
    %97 = vector.broadcast %47 : vector<1x32xf32> to vector<32x32xf32>
    %98 = arith.mulf %96, %97 : vector<32x32xf32>
    %99 = vector.broadcast %48 : vector<1x32xf32> to vector<32x32xf32>
    %100 = arith.addf %98, %99 : vector<32x32xf32>
    %cst_58 = arith.constant dense<0.000000e+00> : vector<32x64xf32>
    %101 = tpu.matmul %100, %38, %cst_58 {dimension_numbers = #tpu.dot_dimension_numbers<[1], [0], [0], [1], [0, 0, 1, 1], [], []>} : vector<32x32xf32>, vector<32x64xf32>, vector<32x64xf32> -> vector<32x64xf32>
    %102 = vector.broadcast %40 : vector<1x64xf32> to vector<32x64xf32>
    %103 = arith.addf %101, %102 : vector<32x64xf32>
    %cst_59 = arith.constant 0.000000e+00 : f32
    %104 = vector.broadcast %cst_59 : f32 to vector<32x64xf32>
    %105 = arith.maximumf %103, %104 : vector<32x64xf32>
    %cst_60 = arith.constant dense<0.000000e+00> : vector<32x32xf32>
    %106 = tpu.matmul %105, %42, %cst_60 {dimension_numbers = #tpu.dot_dimension_numbers<[1], [0], [0], [1], [0, 0, 1, 1], [], []>} : vector<32x64xf32>, vector<64x32xf32>, vector<32x32xf32> -> vector<32x32xf32>
    %107 = vector.broadcast %46 : vector<1x32xf32> to vector<32x32xf32>
    %108 = arith.addf %106, %107 : vector<32x32xf32>
    %109 = arith.addf %100, %108 : vector<32x32xf32>
    %cst_61 = arith.constant dense<0.000000e+00> : vector<32xf32>
    %110 = vector.multi_reduction <add>, %109, %cst_61 [1] : vector<32x32xf32> to vector<32xf32>
    %111 = vector.shape_cast %110 : vector<32xf32> to vector<32x1xf32>
    %cst_62 = arith.constant 3.200000e+01 : f32
    %112 = vector.broadcast %cst_62 : f32 to vector<32x1xf32>
    %113 = arith.divf %111, %112 : vector<32x1xf32>
    %114 = vector.broadcast %113 : vector<32x1xf32> to vector<32x32xf32>
    %115 = arith.subf %109, %114 : vector<32x32xf32>
    %116 = arith.mulf %115, %115 : vector<32x32xf32>
    %cst_63 = arith.constant dense<0.000000e+00> : vector<32xf32>
    %117 = vector.multi_reduction <add>, %116, %cst_63 [1] : vector<32x32xf32> to vector<32xf32>
    %118 = vector.shape_cast %117 : vector<32xf32> to vector<32x1xf32>
    %cst_64 = arith.constant 3.200000e+01 : f32
    %119 = vector.broadcast %cst_64 : f32 to vector<32x1xf32>
    %120 = arith.divf %118, %119 : vector<32x1xf32>
    %cst_65 = arith.constant 9.99999974E-6 : f32
    %121 = vector.broadcast %cst_65 : f32 to vector<32x1xf32>
    %122 = arith.addf %120, %121 : vector<32x1xf32>
    %123 = math.rsqrt %122 : vector<32x1xf32>
    %124 = vector.broadcast %123 : vector<32x1xf32> to vector<32x32xf32>
    %125 = arith.mulf %115, %124 : vector<32x32xf32>
    %126 = vector.broadcast %49 : vector<1x32xf32> to vector<32x32xf32>
    %127 = arith.mulf %125, %126 : vector<32x32xf32>
    %128 = vector.broadcast %50 : vector<1x32xf32> to vector<32x32xf32>
    %129 = arith.addf %127, %128 : vector<32x32xf32>
    %c1 = arith.constant 1 : index
    %c0_66 = arith.constant 0 : index
    %c0_67 = arith.constant 0 : index
    %130 = vector.load %arg10[%c1, %c0_66, %c0_67] : memref<2x32x96xf32, #tpu.memory_space<vmem>>, vector<1x32x96xf32>
    %131 = vector.shape_cast %130 : vector<1x32x96xf32> to vector<32x96xf32>
    %c1_68 = arith.constant 1 : index
    %c0_69 = arith.constant 0 : index
    %c0_70 = arith.constant 0 : index
    %132 = vector.load %arg11[%c1_68, %c0_69, %c0_70] : memref<2x1x96xf32, #tpu.memory_space<vmem>>, vector<1x1x96xf32>
    %133 = vector.shape_cast %132 : vector<1x1x96xf32> to vector<1x96xf32>
    %c1_71 = arith.constant 1 : index
    %c0_72 = arith.constant 0 : index
    %c0_73 = arith.constant 0 : index
    %134 = vector.load %arg12[%c1_71, %c0_72, %c0_73] : memref<2x32x32xf32, #tpu.memory_space<vmem>>, vector<1x32x32xf32>
    %135 = vector.shape_cast %134 : vector<1x32x32xf32> to vector<32x32xf32>
    %c1_74 = arith.constant 1 : index
    %c0_75 = arith.constant 0 : index
    %c0_76 = arith.constant 0 : index
    %136 = vector.load %arg13[%c1_74, %c0_75, %c0_76] : memref<2x32x64xf32, #tpu.memory_space<vmem>>, vector<1x32x64xf32>
    %137 = vector.shape_cast %136 : vector<1x32x64xf32> to vector<32x64xf32>
    %c1_77 = arith.constant 1 : index
    %c0_78 = arith.constant 0 : index
    %c0_79 = arith.constant 0 : index
    %138 = vector.load %arg14[%c1_77, %c0_78, %c0_79] : memref<2x1x64xf32, #tpu.memory_space<vmem>>, vector<1x1x64xf32>
    %139 = vector.shape_cast %138 : vector<1x1x64xf32> to vector<1x64xf32>
    %c1_80 = arith.constant 1 : index
    %c0_81 = arith.constant 0 : index
    %c0_82 = arith.constant 0 : index
    %140 = vector.load %arg15[%c1_80, %c0_81, %c0_82] : memref<2x64x32xf32, #tpu.memory_space<vmem>>, vector<1x64x32xf32>
    %141 = vector.shape_cast %140 : vector<1x64x32xf32> to vector<64x32xf32>
    %c1_83 = arith.constant 1 : index
    %c0_84 = arith.constant 0 : index
    %c0_85 = arith.constant 0 : index
    %142 = vector.load %arg16[%c1_83, %c0_84, %c0_85] : memref<2x6x32xf32, #tpu.memory_space<vmem>>, vector<1x6x32xf32>
    %143 = vector.shape_cast %142 : vector<1x6x32xf32> to vector<6x32xf32>
    %144 = vector.extract_strided_slice %143 {offsets = [0, 0], sizes = [1, 32], strides = [1, 1]} : vector<6x32xf32> to vector<1x32xf32>
    %145 = vector.extract_strided_slice %143 {offsets = [1, 0], sizes = [1, 32], strides = [1, 1]} : vector<6x32xf32> to vector<1x32xf32>
    %146 = vector.extract_strided_slice %143 {offsets = [2, 0], sizes = [1, 32], strides = [1, 1]} : vector<6x32xf32> to vector<1x32xf32>
    %147 = vector.extract_strided_slice %143 {offsets = [3, 0], sizes = [1, 32], strides = [1, 1]} : vector<6x32xf32> to vector<1x32xf32>
    %148 = vector.extract_strided_slice %143 {offsets = [4, 0], sizes = [1, 32], strides = [1, 1]} : vector<6x32xf32> to vector<1x32xf32>
    %149 = vector.extract_strided_slice %143 {offsets = [5, 0], sizes = [1, 32], strides = [1, 1]} : vector<6x32xf32> to vector<1x32xf32>
    %cst_86 = arith.constant dense<0.000000e+00> : vector<32x96xf32>
    %150 = tpu.matmul %129, %131, %cst_86 {dimension_numbers = #tpu.dot_dimension_numbers<[1], [0], [0], [1], [0, 0, 1, 1], [], []>} : vector<32x32xf32>, vector<32x96xf32>, vector<32x96xf32> -> vector<32x96xf32>
    %151 = vector.broadcast %133 : vector<1x96xf32> to vector<32x96xf32>
    %152 = arith.addf %150, %151 : vector<32x96xf32>
    %153 = vector.extract_strided_slice %152 {offsets = [0, 0], sizes = [32, 32], strides = [1, 1]} : vector<32x96xf32> to vector<32x32xf32>
    %154 = vector.extract_strided_slice %152 {offsets = [0, 32], sizes = [32, 32], strides = [1, 1]} : vector<32x96xf32> to vector<32x32xf32>
    %155 = vector.extract_strided_slice %152 {offsets = [0, 64], sizes = [32, 32], strides = [1, 1]} : vector<32x96xf32> to vector<32x32xf32>
    %156 = vector.shape_cast %153 : vector<32x32xf32> to vector<32x4x8xf32>
    %157 = tpu.transpose %156, [1, 0, 2] : vector<32x4x8xf32> -> vector<4x32x8xf32>
    %158 = vector.shape_cast %154 : vector<32x32xf32> to vector<32x4x8xf32>
    %159 = tpu.transpose %158, [1, 0, 2] : vector<32x4x8xf32> -> vector<4x32x8xf32>
    %160 = vector.shape_cast %155 : vector<32x32xf32> to vector<32x4x8xf32>
    %161 = tpu.transpose %160, [1, 0, 2] : vector<32x4x8xf32> -> vector<4x32x8xf32>
    "tpu.trace_start"() <{level = 10 : i32, message = "hqd,hkd->hqk"}> : () -> ()
    %cst_87 = arith.constant dense<0.000000e+00> : vector<4x32x32xf32>
    %162 = tpu.matmul %157, %159, %cst_87 {dimension_numbers = #tpu.dot_dimension_numbers<[2], [2], [1], [1], [0, 0, 0, 1, 1, 1], [0], [0]>} : vector<4x32x8xf32>, vector<4x32x8xf32>, vector<4x32x32xf32> -> vector<4x32x32xf32>
    "tpu.trace_stop"() : () -> ()
    %cst_88 = arith.constant dense<0xFF800000> : vector<4x32xf32>
    %163 = vector.multi_reduction <maximumf>, %162, %cst_88 [2] : vector<4x32x32xf32> to vector<4x32xf32>
    %164 = vector.shape_cast %163 : vector<4x32xf32> to vector<4x32x1xf32>
    %165 = vector.broadcast %164 : vector<4x32x1xf32> to vector<4x32x32xf32>
    %166 = arith.subf %162, %165 : vector<4x32x32xf32>
    %167 = math.exp %166 : vector<4x32x32xf32>
    %cst_89 = arith.constant dense<0.000000e+00> : vector<4x32xf32>
    %168 = vector.multi_reduction <add>, %167, %cst_89 [2] : vector<4x32x32xf32> to vector<4x32xf32>
    %169 = vector.shape_cast %168 : vector<4x32xf32> to vector<4x32x1xf32>
    %170 = tpu.reciprocal %169 {approx = true} : vector<4x32x1xf32> -> vector<4x32x1xf32>
    %171 = vector.broadcast %170 : vector<4x32x1xf32> to vector<4x32x32xf32>
    %172 = arith.mulf %167, %171 : vector<4x32x32xf32>
    "tpu.trace_start"() <{level = 10 : i32, message = "hqk,hkd->hqd"}> : () -> ()
    %cst_90 = arith.constant dense<0.000000e+00> : vector<4x32x8xf32>
    %173 = tpu.matmul %172, %161, %cst_90 {dimension_numbers = #tpu.dot_dimension_numbers<[2], [1], [1], [2], [0, 0, 0, 1, 1, 2], [0], [0]>} : vector<4x32x32xf32>, vector<4x32x8xf32>, vector<4x32x8xf32> -> vector<4x32x8xf32>
    "tpu.trace_stop"() : () -> ()
    %174 = tpu.transpose %173, [1, 0, 2] : vector<4x32x8xf32> -> vector<32x4x8xf32>
    %175 = vector.shape_cast %174 : vector<32x4x8xf32> to vector<32x32xf32>
    %cst_91 = arith.constant dense<0.000000e+00> : vector<32x32xf32>
    %176 = tpu.matmul %175, %135, %cst_91 {dimension_numbers = #tpu.dot_dimension_numbers<[1], [0], [0], [1], [0, 0, 1, 1], [], []>} : vector<32x32xf32>, vector<32x32xf32>, vector<32x32xf32> -> vector<32x32xf32>
    %177 = vector.broadcast %144 : vector<1x32xf32> to vector<32x32xf32>
    %178 = arith.addf %176, %177 : vector<32x32xf32>
    %179 = arith.addf %129, %178 : vector<32x32xf32>
    %cst_92 = arith.constant dense<0.000000e+00> : vector<32xf32>
    %180 = vector.multi_reduction <add>, %179, %cst_92 [1] : vector<32x32xf32> to vector<32xf32>
    %181 = vector.shape_cast %180 : vector<32xf32> to vector<32x1xf32>
    %cst_93 = arith.constant 3.200000e+01 : f32
    %182 = vector.broadcast %cst_93 : f32 to vector<32x1xf32>
    %183 = arith.divf %181, %182 : vector<32x1xf32>
    %184 = vector.broadcast %183 : vector<32x1xf32> to vector<32x32xf32>
    %185 = arith.subf %179, %184 : vector<32x32xf32>
    %186 = arith.mulf %185, %185 : vector<32x32xf32>
    %cst_94 = arith.constant dense<0.000000e+00> : vector<32xf32>
    %187 = vector.multi_reduction <add>, %186, %cst_94 [1] : vector<32x32xf32> to vector<32xf32>
    %188 = vector.shape_cast %187 : vector<32xf32> to vector<32x1xf32>
    %cst_95 = arith.constant 3.200000e+01 : f32
    %189 = vector.broadcast %cst_95 : f32 to vector<32x1xf32>
    %190 = arith.divf %188, %189 : vector<32x1xf32>
    %cst_96 = arith.constant 9.99999974E-6 : f32
    %191 = vector.broadcast %cst_96 : f32 to vector<32x1xf32>
    %192 = arith.addf %190, %191 : vector<32x1xf32>
    %193 = math.rsqrt %192 : vector<32x1xf32>
    %194 = vector.broadcast %193 : vector<32x1xf32> to vector<32x32xf32>
    %195 = arith.mulf %185, %194 : vector<32x32xf32>
    %196 = vector.broadcast %146 : vector<1x32xf32> to vector<32x32xf32>
    %197 = arith.mulf %195, %196 : vector<32x32xf32>
    %198 = vector.broadcast %147 : vector<1x32xf32> to vector<32x32xf32>
    %199 = arith.addf %197, %198 : vector<32x32xf32>
    %cst_97 = arith.constant dense<0.000000e+00> : vector<32x64xf32>
    %200 = tpu.matmul %199, %137, %cst_97 {dimension_numbers = #tpu.dot_dimension_numbers<[1], [0], [0], [1], [0, 0, 1, 1], [], []>} : vector<32x32xf32>, vector<32x64xf32>, vector<32x64xf32> -> vector<32x64xf32>
    %201 = vector.broadcast %139 : vector<1x64xf32> to vector<32x64xf32>
    %202 = arith.addf %200, %201 : vector<32x64xf32>
    %cst_98 = arith.constant 0.000000e+00 : f32
    %203 = vector.broadcast %cst_98 : f32 to vector<32x64xf32>
    %204 = arith.maximumf %202, %203 : vector<32x64xf32>
    %cst_99 = arith.constant dense<0.000000e+00> : vector<32x32xf32>
    %205 = tpu.matmul %204, %141, %cst_99 {dimension_numbers = #tpu.dot_dimension_numbers<[1], [0], [0], [1], [0, 0, 1, 1], [], []>} : vector<32x64xf32>, vector<64x32xf32>, vector<32x32xf32> -> vector<32x32xf32>
    %206 = vector.broadcast %145 : vector<1x32xf32> to vector<32x32xf32>
    %207 = arith.addf %205, %206 : vector<32x32xf32>
    %208 = arith.addf %199, %207 : vector<32x32xf32>
    %cst_100 = arith.constant dense<0.000000e+00> : vector<32xf32>
    %209 = vector.multi_reduction <add>, %208, %cst_100 [1] : vector<32x32xf32> to vector<32xf32>
    %210 = vector.shape_cast %209 : vector<32xf32> to vector<32x1xf32>
    %cst_101 = arith.constant 3.200000e+01 : f32
    %211 = vector.broadcast %cst_101 : f32 to vector<32x1xf32>
    %212 = arith.divf %210, %211 : vector<32x1xf32>
    %213 = vector.broadcast %212 : vector<32x1xf32> to vector<32x32xf32>
    %214 = arith.subf %208, %213 : vector<32x32xf32>
    %215 = arith.mulf %214, %214 : vector<32x32xf32>
    %cst_102 = arith.constant dense<0.000000e+00> : vector<32xf32>
    %216 = vector.multi_reduction <add>, %215, %cst_102 [1] : vector<32x32xf32> to vector<32xf32>
    %217 = vector.shape_cast %216 : vector<32xf32> to vector<32x1xf32>
    %cst_103 = arith.constant 3.200000e+01 : f32
    %218 = vector.broadcast %cst_103 : f32 to vector<32x1xf32>
    %219 = arith.divf %217, %218 : vector<32x1xf32>
    %cst_104 = arith.constant 9.99999974E-6 : f32
    %220 = vector.broadcast %cst_104 : f32 to vector<32x1xf32>
    %221 = arith.addf %219, %220 : vector<32x1xf32>
    %222 = math.rsqrt %221 : vector<32x1xf32>
    %223 = vector.broadcast %222 : vector<32x1xf32> to vector<32x32xf32>
    %224 = arith.mulf %214, %223 : vector<32x32xf32>
    %225 = vector.broadcast %148 : vector<1x32xf32> to vector<32x32xf32>
    %226 = arith.mulf %224, %225 : vector<32x32xf32>
    %227 = vector.broadcast %149 : vector<1x32xf32> to vector<32x32xf32>
    %228 = arith.addf %226, %227 : vector<32x32xf32>
    %229 = vector.extract_strided_slice %228 {offsets = [16, 0], sizes = [16, 32], strides = [1, 1]} : vector<32x32xf32> to vector<16x32xf32>
    %c0_105 = arith.constant 0 : index
    %c0_106 = arith.constant 0 : index
    %230 = vector.load %arg17[%c0_105, %c0_106] : memref<32x128xf32, #tpu.memory_space<vmem>>, vector<32x128xf32>
    %cst_107 = arith.constant dense<0.000000e+00> : vector<16x128xf32>
    %231 = tpu.matmul %229, %230, %cst_107 {dimension_numbers = #tpu.dot_dimension_numbers<[1], [0], [0], [1], [0, 0, 1, 1], [], []>} : vector<16x32xf32>, vector<32x128xf32>, vector<16x128xf32> -> vector<16x128xf32>
    %c0_108 = arith.constant 0 : index
    %c0_109 = arith.constant 0 : index
    %232 = vector.load %arg18[%c0_108, %c0_109] : memref<1x128xf32, #tpu.memory_space<vmem>>, vector<1x128xf32>
    %233 = vector.broadcast %232 : vector<1x128xf32> to vector<16x128xf32>
    %234 = arith.addf %231, %233 : vector<16x128xf32>
    %c0_110 = arith.constant 0 : index
    %c0_111 = arith.constant 0 : index
    %235 = vector.load %arg19[%c0_110, %c0_111] : memref<16x128xf32, #tpu.memory_space<vmem>>, vector<16x128xf32>
    tpu.vector_store %arg19[%c0_110, %c0_111], %234 {strides = array<i32>} : memref<16x128xf32, #tpu.memory_space<vmem>>, vector<16x128xf32>,
    return
  }
}

</mosaic_0001>

<bundles_post_ra>
// kernel: tpu_custom_call.1
= control target key start
LH: loop header
LB: loop body
LE: loop exit
PB: predicated region body
PF: predicated region fallthrough
CT: control target
= control target key end

     0   :  { %s9842_s0 = inlined_call_operand.vmem [shape: f32[16,8], index: 0, kind: input, shape index: {}]   ;;  %s9843_s1 = inlined_call_operand.vmem [shape: f32[16,7], index: 1, kind: input, shape index: {}]   ;;  %s9844_s2 = inlined_call_operand.vmem [shape: f32[8,32], index: 2, kind: input, shape index: {}]   ;;  %s9845_s3 = inlined_call_operand.vmem [shape: f32[1,32], index: 3, kind: input, shape index: {}]   ;;  %s9846_s4 = inlined_call_operand.hbm [shape: f32[32,32], index: 4, kind: input, shape index: {}]   ;;  %s9847_s5 = inlined_call_operand.vmem [shape: f32[1,32], index: 5, kind: input, shape index: {}]   ;;  %s9848_s6 = inlined_call_operand.hbm [shape: f32[7,32], index: 6, kind: input, shape index: {}]   ;;  %s9849_s7 = inlined_call_operand.vmem [shape: f32[1,32], index: 7, kind: input, shape index: {}]   ;;  %s9850_s8 = inlined_call_operand.hbm [shape: f32[32,32], index: 8, kind: input, shape index: {}]   ;;  %s9851_s9 = inlined_call_operand.hbm [shape: f32[1,32], index: 9, kind: input, shape index: {}]   ;;  %s9852_s10 = inlined_call_operand.vmem [shape: f32[2,32,96], index: 10, kind: input, shape index: {}]   ;;  %s9853_s11 = inlined_call_operand.vmem [shape: f32[2,1,96], index: 11, kind: input, shape index: {}]   ;;  %s9854_s12 = inlined_call_operand.vmem [shape: f32[2,32,32], index: 12, kind: input, shape index: {}]   ;;  %s9855_s13 = inlined_call_operand.vmem [shape: f32[2,32,64], index: 13, kind: input, shape index: {}]   ;;  %s9856_s14 = inlined_call_operand.vmem [shape: f32[2,1,64], index: 14, kind: input, shape index: {}]   ;;  %s9857_s15 = inlined_call_operand.vmem [shape: f32[2,64,32], index: 15, kind: input, shape index: {}]   ;;  %s9858_s16 = inlined_call_operand.vmem [shape: f32[2,6,32], index: 16, kind: input, shape index: {}]   ;;  %s9859_s17 = inlined_call_operand.hbm [shape: f32[32,128], index: 17, kind: input, shape index: {}]   ;;  %s9860_s18 = inlined_call_operand.vmem [shape: f32[1,128], index: 18, kind: input, shape index: {}]   ;;  %s9861_s19 = inlined_call_operand.hbm [shape: f32[16,128], index: 19, kind: output, shape index: {}]  }
   0x1   :  { %9885 = sst [smem:[#allocation25_spill]] %s9842_s0 }
   0x2   :  { %9886 = sst [smem:[#allocation26_spill]] %s9843_s1 }
   0x3   :  { %9887 = sst [smem:[#allocation27_spill]] %s9844_s2 }
   0x4   :  { %9888 = sst [smem:[#allocation28_spill]] %s9845_s3 }
   0x5   :  { %24 = vsyncpa [#allocation3], 0 }
   0x6   :  { %25 = vsyncpa [#allocation6], 0 }
   0x7   :  { %26 = vsyncpa [#allocation9], 0  ;;  %s56_s20 = sshll.u32 %s9848_s6, 4  ;;  %s57_s20 = int_to_ptr.hbm [resolvable:$true] %s56_s20 }
   0x8   :  { %27 = vsyncpa [#allocation4], 0  ;;  %s6726_s21 = smov [#allocation5]   ;;  %s82_s23 = sshll.u32 %s9851_s9, 4  ;;  %s83_s23 = int_to_ptr.hbm [resolvable:$true] %s82_s23 }
   0x9   :  { %s58_s1 = sshll.u32 %s6726_s21, 4  ;;  %s6727_s24 = smov [#allocation8]   ;;  %s59_s1 = int_to_ptr.vmem [resolvable:$true] %s58_s1 }
   0xa   :  { %61 = dma.hbm_to_vmem [thread:$0]  %s57_s20, 128, %s59_s1, [#allocation6]  }
   0xb   :  { %s84_s25 = sshll.u32 %s6727_s24, 4  ;;  %s40_s27 = sshll.u32 %s9846_s4, 4  ;;  %s85_s25 = int_to_ptr.vmem [resolvable:$true] %s84_s25  ;;  %s41_s27 = int_to_ptr.hbm [resolvable:$true] %s40_s27 }
   0xc   :  { %87 = dma.hbm_to_vmem [thread:$0]  %s83_s23, 16, %s85_s25, [#allocation9]  }
   0xd   :  { %s6728_s6 = smov [#allocation2]   ;;  %s68_s30 = sshll.u32 %s9850_s8, 4  ;;  %s69_s30 = int_to_ptr.hbm [resolvable:$true] %s68_s30 }
   0xe   :  { %s42_s28 = sshll.u32 %s6728_s6, 4  ;;  %s6729_s21 = smov 128   ;;  %s43_s28 = int_to_ptr.vmem [resolvable:$true] %s42_s28 }
   0xf   :  { %s6730_s9 = smov 8   ;;  %s6731_s20 = smov [#allocation7]  }
  0x10   :  { %48 = dma.hbm_to_vmem [thread:$0]  %s41_s27, 512, %s43_s28, [#allocation3], %s6729_s21, %s6729_s21, %s6730_s9  }
  0x11   :  { %s70_s1 = sshll.u32 %s6731_s20, 4  ;;  %s106_s2 = sshll.u32 %s9859_s17, 4  ;;  %s71_s1 = int_to_ptr.vmem [resolvable:$true] %s70_s1  ;;  %s107_s2 = int_to_ptr.hbm [resolvable:$true] %s106_s2 }
  0x12   :  { %76 = dma.hbm_to_vmem [thread:$0]  %s69_s30, 512, %s71_s1, [#allocation6], %s6729_s21, %s6729_s21, %s6730_s9  }
  0x13   :  { %s6732_s8 = smov [#allocation10]  }
  0x14   :  { %s108_s23 = sshll.u32 %s6732_s8, 4  ;;  %s109_s23 = int_to_ptr.vmem [resolvable:$true] %s108_s23 }
  0x15   :  { %114 = dma.hbm_to_vmem [thread:$0]  %s107_s2, 512, %s109_s23, [#allocation9], %s6729_s21, %s6729_s21, %s6730_s9  }
  0x16   :  { %6718 = dma.done.wait [#allocation3], 512  }
  0x17   :  { %6719 = vsyncadd [#allocation3], 4294966784 }
  0x18   :  { %6720 = dma.done.wait [#allocation6], 640  }
  0x19   :  { %6721 = vsyncadd [#allocation6], 4294966656 }
  0x1a   :  { %6722 = dma.done.wait [#allocation9], 528  }
  0x1b   :  { %6723 = vsyncadd [#allocation9], 4294966768  ;;  %vm146_vm0 = vcmask 64512   ;;  %s9889_s25 = sld [smem:[#allocation27_spill]]  ;;  %vm230_vm1 = vcmask 1046528   ;;  %v181_v4 = vld [vmem:[#allocation2 + $0x18] sm:$0xff] }
  0x1c   :  { %s9890_s27 = sld [smem:[#allocation25_spill]]  ;;  %v218_v3 = vld [vmem:[#allocation5] sm:$0x7f]  ;;  %205 = vmatpush.msra.mxu1 %v181_v4  ;;  %vm223_vm2 = vcmask 56320   ;;  %v180_v7 = vld [vmem:[#allocation2 + $0x10] sm:$0xff]  ;;  %v179_v8 = vld [vmem:[#allocation2 + $0x8] sm:$0xff] }
  0x1d   :  { %s9891_s30 = sld [smem:[#allocation26_spill]]  ;;  %v178_v9 = vld [vmem:[#allocation2] sm:$0xff]  ;;  %v261_v11 = vld [vmem:[#allocation7 + $0x10] sm:$0xff]  ;;  %v260_v12 = vld [vmem:[#allocation7 + $0x8] sm:$0xff]  ;;  %vm186_vm3 = vcmask 261120   ;;  %s6734_s20 = smov 112  }
  0x1e   :  { %206 = vmatpush.msra.mxu1 %v180_v7  ;;  %v262_v10 = vld [vmem:[#allocation7 + $0x18] sm:$0xff]  ;;  %v259_v13 = vld [vmem:[#allocation7] sm:$0xff]  ;;  %v301_v14 = vld [vmem:[%s9852_s10 + $0x18] sm:$0xff]  ;;  %s9892_s23 = sld [smem:[#allocation28_spill]]  ;;  %s6735_s1 = smov 104   ;;  %vm406_vm4 = vcmask 1047556  }
  0x1f   :  { %285 = vmatpush.msra.mxu3 %v262_v10  ;;  %v6408_v22 = vld [vmem:[%s9849_s7] ss:$0 sm:$0xff]  ;;  %v300_v29 = vld [vmem:[%s9852_s10 + $0x10] sm:$0xff]  ;;  %v299_v30 = vld [vmem:[%s9852_s10 + $0x8] sm:$0xff]  ;;  %s6736_s4 = smov 96   ;;  %s6737_s22 = smov 64  }
  0x20   :  { %207 = vmatpush.msra.mxu1 %v179_v8  ;;  %v298_v31 = vld [vmem:[%s9852_s10] sm:$0xff]  ;;  %v6410_v39 = vld [vmem:[#allocation8] ss:$0 sm:$0xff]  ;;  %s6740_s2 = smov 24   ;;  %s6741_s8 = smov 16   ;;  %vm2866_vm5 = vcmask 130048  }
  0x21   :  { %v141_v0 = vld [vmem:[%s9889_s25] sm:$0xff]  ;;  %286 = vmatpush.msra.mxu3 %v261_v11  ;;  %vm2871_vm6 = vcmask 195584   ;;  %s6743_s7 = smov [#allocation11]  }
  0x22   :  { %v137_v1 = vld [vmem:[%s9890_s27] sm:$0xff]  ;;  %v138_v2 = vld [vmem:[%s9890_s27 + $0x8] sm:$0xff]  ;;  %168 = vmatpush.msra.mxu0 %v141_v0  ;;  %6308 = vmatpush.msra.mxu2 %v141_v0  ;;  %s6129_s6 = sshll.u32 %s6743_s7, 4  ;;  %s6130_s6 = int_to_ptr.vmem [resolvable:$true] %s6129_s6 }
  0x23   :  { %6146 = vmatmul.msk.f32.vlgmr.msra.gmra.mxu0 %vm146_vm0, %v137_v1  ;;  %6147 = vmatmul.msk.f32.vlgmr.msra.gmra.mxu2 %vm146_vm0, %v138_v2  ;;  %v139_v5 = vld [vmem:[%s9891_s30] sm:$0xff]  ;;  %v140_v6 = vld [vmem:[%s9891_s30 + $0x8] sm:$0xff]  ;;  %s6733_s30 = smov 120  }
  0x24   :  { %6150 = vmatpush.msk.msrb.mxu2 %vm230_vm1, %v218_v3  ;;  %208 = vmatpush.msra.mxu1 %v178_v9  ;;  %v6407_v15 = vld [vmem:[%s9892_s23] ss:$0 sm:$0xff]  ;;  %v6738_v9 = vmov 1983009808  }
  0x25   :  { %287 = vmatpush.msra.mxu3 %v260_v12  ;;  %348 = vmatpush.msrb.mxu0 %v301_v14  ;;  %v6409_v32 = vld [vmem:[%s9847_s5] ss:$0 sm:$0xff]  ;;  %v411_v10 = vunpack.c.l.s4 %v6738_v9  ;;  %s6131_s5 = sshll.u32 %s9861_s19, 4  ;;  %s6132_s5 = int_to_ptr.hbm [resolvable:$true] %s6131_s5 }
  0x26   :  { %v6411_v47 = vld [vmem:[%s9853_s11] ss:$0 sm:$0xff] }
  0x27   :  { %288 = vmatpush.msra.mxu3 %v259_v13  ;;  %349 = vmatpush.msrb.mxu0 %v300_v29  ;;  %v7027_v13 = vunpack.c.0.s8 %v411_v10 }
  0x29   :  { %350 = vmatpush.msrb.mxu0 %v299_v30 }
  0x2b   :  { %6151 = vmatmul.msk.f32.vlgmr.msrb.gmra.mxu2 %vm223_vm2, %v139_v5  ;;  %351 = vmatpush.msrb.mxu0 %v298_v31 }
  0x33   :  { %6152 = vmatmul.msk.f32.gmra.mxu2 %vm223_vm2, %v140_v6 }
  0xa0   :  { %v170_v16 = vpop.f32.mrf.mxu0 }
  0xa1   :  { %v171_v17 = vadd.f32 %v6407_v15, %v170_v16 }
  0xa3   :  { %v176_v18 = vmax.f32 %v171_v17, 0.0  ;;  %v6739_v17 = vmov 1934713408  }
  0xa5   :  { %6148 = vmatmul.msk.f32.vlgmr.msra.gmra.mxu1 %vm186_vm3, %v176_v18  ;;  %v435_v18 = vunpack.c.l.s4 %v6739_v17 }
  0xa6   :  { %v173_v19 = vpop.f32.mrf.mxu2 }
  0xa7   :  { %v174_v20 = vadd.f32 %v6407_v15, %v173_v19 }
  0xa9   :  { %v177_v21 = vmax.f32 %v174_v20, 0.0 }
  0xad   :  { %6149 = vmatmul.msk.f32.gmra.mxu1 %vm186_vm3, %v177_v21 }
  0xae   :  { %v251_v23 = vpop.f32.mrf.mxu2 }
  0xaf   :  { %v252_v24 = vadd.f32 %v6408_v22, %v251_v23 }
  0xb1   :  { %v257_v25 = vmax.f32 %v252_v24, 0.0  ;;  %v7036_v24 = vunpack.c.0.s8 %v435_v18 }
  0xb3   :  { %6153 = vmatmul.msk.f32.vlgmr.msra.gmra.mxu3 %vm186_vm3, %v257_v25 }
  0xb6   :  { %v254_v26 = vpop.f32.mrf.mxu2 }
  0xb7   :  { %v255_v27 = vadd.f32 %v6408_v22, %v254_v26 }
  0xb9   :  { %v258_v28 = vmax.f32 %v255_v27, 0.0 }
  0xbb   :  { %6154 = vmatmul.msk.f32.gmra.mxu3 %vm186_vm3, %v258_v28 }
 0x122   :  { %v210_v33 = vpop.f32.mrf.mxu1 }
 0x123   :  { %v211_v34 = vadd.f32 %v6409_v32, %v210_v33 }
 0x125   :  { %v6910_v35 = vmul.f32 5.656854, %v211_v34 }
 0x127   :  { %9893 = vst [vmem:[#allocation16_spill] sm:$0xff] %v6910_v35  ;;  %6155 = vmatmul.msk.f32.vlgmr.msrb.gmra.mxu0 %vm186_vm3, %v6910_v35 }
 0x12a   :  { %v213_v36 = vpop.f32.mrf.mxu1 }
 0x12b   :  { %v214_v37 = vadd.f32 %v6409_v32, %v213_v36 }
 0x12d   :  { %v6914_v38 = vmul.f32 5.656854, %v214_v37 }
 0x12f   :  { %9894 = vst [vmem:[#allocation17_spill] sm:$0xff] %v6914_v38  ;;  %6156 = vmatmul.msk.f32.gmra.mxu0 %vm186_vm3, %v6914_v38 }
 0x136   :  { %v290_v40 = vpop.f32.mrf.mxu3 }
 0x137   :  { %v291_v41 = vadd.f32 %v6410_v39, %v290_v40 }
 0x139   :  { %v6918_v42 = vmul.f32 5.656854, %v291_v41 }
 0x13b   :  { %9895 = vst [vmem:[#allocation18_spill] sm:$0xff] %v6918_v42  ;;  %6157 = vmatmul.msk.f32.gmra.mxu0 %vm186_vm3, %v6918_v42 }
 0x13e   :  { %v293_v43 = vpop.f32.mrf.mxu3 }
 0x13f   :  { %v294_v44 = vadd.f32 %v6410_v39, %v293_v43 }
 0x141   :  { %v6922_v45 = vmul.f32 5.656854, %v294_v44 }
 0x143   :  { %9896 = vst [vmem:[#allocation19_spill] sm:$0xff] %v6922_v45  ;;  %6158 = vmatmul.msk.f32.gmra.mxu0 %vm186_vm3, %v6922_v45 }
 0x1a4   :  { %v353_v46 = vpop.f32.mrf.mxu0 }
 0x1a5   :  { %v6953_v54 = vadd.f32 %v6411_v47, %v353_v46 }
 0x1a7   :  { %v408_v30 = vrot.slane %v6953_v54, 4 }
 0x1ac   :  { %v356_v48 = vpop.f32.mrf.mxu0 }
 0x1ad   :  { %v6929_v49 = vadd.f32 %v6411_v47, %v356_v48 }
 0x1af   :  { %371 = vrot.lane.b32.xlu0 %v6929_v49, %s6733_s30 }
 0x1b8   :  { %v359_v50 = vpop.f32.mrf.mxu0 }
 0x1b9   :  { %v6933_v51 = vadd.f32 %v6411_v47, %v359_v50 }
 0x1bb   :  { %385 = vrot.lane.b32.xlu2 %v6933_v51, %s6734_s20  ;;  %373 = vrot.lane.b32.xlu1 %v6933_v51, %s6733_s30  ;;  %v520_v19 = vrot.slane %v6933_v51, 4 }
 0x1c0   :  { %v362_v52 = vpop.f32.mrf.mxu0 }
 0x1c1   :  { %v6939_v53 = vadd.f32 %v6411_v47, %v362_v52 }
 0x1c3   :  { %397 = vrot.lane.b32.xlu2 %v6933_v51, %s6735_s1  ;;  %399 = vrot.lane.b32.xlu1 %v6939_v53, %s6735_s1  ;;  %v6327_v4 = vpack.i.bf16 %v6933_v51, %v6939_v53 }
 0x1c4   :  { %375 = vrot.lane.b32.xlu0 %v6939_v53, %s6733_s30 }
 0x1cb   :  { %395 = vrot.lane.b32.xlu2 %v6929_v49, %s6735_s1  ;;  %383 = vrot.lane.b32.xlu1 %v6929_v49, %s6734_s20 }
 0x1cc   :  { %387 = vrot.lane.b32.xlu0 %v6939_v53, %s6734_s20 }
 0x1d3   :  { %393 = vrot.lane.b32.xlu2 %v6953_v54, %s6735_s1  ;;  %381 = vrot.lane.b32.xlu1 %v6953_v54, %s6734_s20 }
 0x1d4   :  { %369 = vrot.lane.b32.xlu0 %v6953_v54, %s6733_s30 }
 0x1db   :  { %848 = vrot.lane.b32.xlu1 %v6929_v49, %s6736_s4 }
 0x1dc   :  { %850 = vrot.lane.b32.xlu0 %v6933_v51, %s6736_s4 }
 0x1e4   :  { %852 = vrot.lane.b32.xlu0 %v6939_v53, %s6736_s4 }
 0x215   :  { %v386_v55 = vpop.permute.xlu2 %385 }
 0x216   :  { %v518_v8 = vrot.slane %v386_v55, 4  ;;  %v521_v21 = vsel %vm406_vm4, %v386_v55, %v520_v19 }
 0x217   :  { %v529_v27 = vperm.slane %v521_v21, %v7027_v13 }
 0x218   :  { %v519_v11 = vsel %vm406_vm4, %v518_v8, %v6933_v51 }
 0x219   :  { %v525_v15 = vperm.slane %v519_v11, %v7027_v13  ;;  %v556_v40 = vrot.slane %v529_v27, 4 }
 0x21b   :  { %v544_v22 = vrot.slane %v525_v15, 4 }
 0x21d   :  { %v6971_v57 = vpop.permute.xlu2 %397 }
 0x21e   :  { %v530_v12 = vrot.slane %v6971_v57, 4 }
 0x221   :  { %v6967_v56 = vpop.permute.xlu0 %371 }
 0x222   :  { %856 = vrot.lane.b32.xlu0 %v6967_v56, %s6736_s4  ;;  %v6337_v5 = vpack.i.bf16 %v6967_v56, %v6953_v54  ;;  %v476_v37 = vrot.slane %v6967_v56, 4 }
 0x225   :  { %v6975_v59 = vpop.permute.xlu2 %395 }
 0x226   :  { %9897 = vst [vmem:[#allocation20_spill] sm:$0xff] %v6975_v59  ;;  %v474_v39 = vrot.slane %v6975_v59, 4  ;;  %v477_v44 = vsel %vm406_vm4, %v6975_v59, %v476_v37 }
 0x228   :  { %v475_v52 = vsel %vm406_vm4, %v474_v39, %v6967_v56 }
 0x22a   :  { %866 = vrot.lane.b32.xlu0 %v386_v55, %s6736_s4 }
 0x22d   :  { %v374_v58 = vpop.permute.xlu1 %373  ;;  %v6985_v61 = vpop.permute.xlu2 %393 }
 0x22e   :  { %858 = vrot.lane.b32.xlu2 %v374_v58, %s6736_s4  ;;  %9898 = vst [vmem:[#allocation21_spill] sm:$0xff] %v6985_v61  ;;  %v6332_v0 = vpack.i.bf16 %v374_v58, %v6929_v49  ;;  %v531_v14 = vsel %vm406_vm4, %v530_v12, %v374_v58  ;;  %v532_v16 = vrot.slane %v374_v58, 4 }
 0x22f   :  { %v537_v20 = vperm.slane %v531_v14, %v7027_v13 }
 0x230   :  { %v533_v23 = vsel %vm406_vm4, %v6971_v57, %v532_v16 }
 0x231   :  { %v545_v26 = vsel %vm406_vm4, %v537_v20, %v544_v22  ;;  %v541_v28 = vperm.slane %v533_v23, %v7027_v13  ;;  %v542_v31 = vrot.slane %v537_v20, 4 }
 0x232   :  { %872 = vrot.lane.b32.xlu0 %v6975_v59, %s6736_s4  ;;  %v553_v32 = vperm.slane %v545_v26, %v7036_v24 }
 0x233   :  { %v554_v41 = vrot.slane %v541_v28, 4  ;;  %v543_v46 = vsel %vm406_vm4, %v542_v31, %v525_v15 }
 0x234   :  { %v568_v50 = vrot.slane %v553_v32, 4 }
 0x235   :  { %v6987_v62 = vpop.permute.xlu1 %399 }
 0x236   :  { %v6979_v60 = vpop.permute.xlu0 %375  ;;  %874 = vrot.lane.b32.xlu2 %v6971_v57, %s6736_s4  ;;  %v6347_v6 = vpack.i.bf16 %v6987_v62, %v386_v55  ;;  %v557_v55 = vsel %vm406_vm4, %v541_v28, %v556_v40  ;;  %v569_v11 = vsel %vm406_vm4, 0.0, %v568_v50  ;;  %v586_v14 = vrot.slane %v6987_v62, 4 }
 0x237   :  { %860 = vrot.lane.b32.xlu1 %v6979_v60, %s6736_s4  ;;  %v565_v10 = vperm.slane %v557_v55, %v7036_v24  ;;  %v588_v15 = vrot.slane %v6979_v60, 4  ;;  %v743_v26 = vrot.slane %v569_v11, 4 }
 0x239   :  { %v572_v28 = vrot.slane %v565_v10, 4 }
 0x23a   :  { %870 = vrot.lane.b32.xlu0 %v6985_v61, %s6736_s4 }
 0x23d   :  { %v6999_v1 = vpop.permute.xlu1 %383 }
 0x23e   :  { %v6991_v63 = vpop.permute.xlu0 %387  ;;  %v462_v25 = vrot.slane %v6999_v1, 4 }
 0x23f   :  { %868 = vrot.lane.b32.xlu2 %v6991_v63, %s6736_s4  ;;  %876 = vrot.lane.b32.xlu1 %v6987_v62, %s6736_s4  ;;  %v6342_v7 = vpack.i.bf16 %v6991_v63, %v6979_v60 }
 0x240   :  { %v463_v33 = vsel %vm406_vm4, %v462_v25, %v6929_v49 }
 0x241   :  { %v469_v47 = vperm.slane %v463_v33, %v7027_v13 }
 0x242   :  { %6333 = vrot.lane.b32.xlu0 %v6332_v0, %s6737_s22  ;;  %v7067_v0 = vperm.slane %v477_v44, %v7027_v13 }
 0x243   :  { %v488_v8 = vrot.slane %v469_v47, 4 }
 0x244   :  { %v498_v25 = vrot.slane %v7067_v0, 4 }
 0x245   :  { %v7005_v2 = vpop.permute.xlu1 %381 }
 0x246   :  { %9899 = vst [vmem:[#allocation22_spill] sm:$0xff] %v7005_v2  ;;  %v7007_v3 = vpop.permute.xlu0 %369  ;;  %v405_v29 = vrot.slane %v7005_v2, 4  ;;  %v409_v34 = vsel %vm406_vm4, %v7005_v2, %v408_v30  ;;  %v589_v30 = vsel %vm406_vm4, %v6987_v62, %v588_v15 }
 0x247   :  { %846 = vrot.lane.b32.xlu2 %v6953_v54, %s6736_s4  ;;  %864 = vrot.lane.b32.xlu1 %v6999_v1, %s6736_s4  ;;  %9900 = vst [vmem:[#allocation23_spill] sm:$0xff] %v7007_v3  ;;  %v420_v36 = vrot.slane %v7007_v3, 4  ;;  %v417_v48 = vperm.slane %v409_v34, %v7027_v13  ;;  %v7105_v44 = vperm.slane %v589_v30, %v7027_v13 }
 0x248   :  { %v407_v43 = vsel %vm406_vm4, %v405_v29, %v6953_v54  ;;  %v464_v54 = vrot.slane %v6929_v49, 4  ;;  %v481_v49 = vperm.slane %v475_v52, %v7027_v13  ;;  %v587_v29 = vsel %vm406_vm4, %v586_v14, %v6979_v60 }
 0x249   :  { %v421_v51 = vsel %vm406_vm4, %v6985_v61, %v420_v36  ;;  %v413_v58 = vperm.slane %v407_v43, %v7027_v13  ;;  %v444_v56 = vrot.slane %v417_v48, 4  ;;  %v7102_v62 = vperm.slane %v587_v29, %v7027_v13 }
 0x24a   :  { %v429_v9 = vperm.slane %v421_v51, %v7027_v13  ;;  %v489_v20 = vsel %vm406_vm4, %v481_v49, %v488_v8  ;;  %v486_v40 = vrot.slane %v481_v49, 4  ;;  %v573_v51 = vsel %vm406_vm4, 0.0, %v572_v28 }
 0x24b   :  { %v432_v16 = vrot.slane %v413_v58, 4  ;;  %v497_v33 = vperm.slane %v489_v20, %v7036_v24  ;;  %v610_v14 = vrot.slane %v7105_v44, 4 }
 0x24c   :  { %v442_v22 = vrot.slane %v429_v9, 4  ;;  %v445_v23 = vsel %vm406_vm4, %v429_v9, %v444_v56  ;;  %v487_v52 = vsel %vm406_vm4, %v486_v40, %v469_v47  ;;  %v754_v56 = vrot.slane %v573_v51, 4 }
 0x24d   :  { %v453_v36 = vperm.slane %v445_v23, %v7036_v24  ;;  %v493_v9 = vperm.slane %v487_v52, %v7036_v24 }
 0x24e   :  { %v7096_v37 = vpop.permute.xlu0 %850  ;;  %v443_v43 = vsel %vm406_vm4, %v442_v22, %v417_v48 }
 0x24f   :  { %862 = vrot.lane.b32.xlu2 %v7005_v2, %s6736_s4  ;;  %854 = vrot.lane.b32.xlu1 %v7007_v3, %s6736_s4  ;;  %v510_v30 = vrot.slane %v493_v9, 4 }
 0x251   :  { %v511_v51 = vsel %vm406_vm4, 0.0, %v510_v30 }
 0x256   :  { %v7145_v29 = vpop.permute.xlu0 %852 }
 0x257   :  { %6328 = vrot.lane.b32.xlu2 %v6327_v4, %s6737_s22  ;;  %6338 = vrot.lane.b32.xlu1 %v6337_v5, %s6737_s22  ;;  %v549_v4 = vperm.slane %v543_v46, %v7036_v24  ;;  %v418_v5 = vrot.slane %v6985_v61, 4 }
 0x259   :  { %v419_v12 = vsel %vm406_vm4, %v418_v5, %v7007_v3  ;;  %v566_v19 = vrot.slane %v549_v4, 4  ;;  %v738_v60 = vsel %vm406_vm4, %v568_v50, %v549_v4  ;;  %v449_v4 = vperm.slane %v443_v43, %v7036_v24 }
 0x25a   :  { %v425_v21 = vperm.slane %v419_v12, %v7027_v13  ;;  %v460_v5 = vrot.slane %v453_v36, 4  ;;  %v7120_v47 = vperm.slane %v738_v60, %v7027_v13  ;;  %v598_v12 = vrot.slane %v7102_v62, 4 }
 0x25b   :  { %v567_v39 = vsel %vm406_vm4, 0.0, %v566_v19 }
 0x25c   :  { %v433_v31 = vsel %vm406_vm4, %v425_v21, %v432_v16  ;;  %v744_v48 = vsel %vm406_vm4, %v743_v26, %v567_v39  ;;  %v458_v16 = vrot.slane %v449_v4, 4  ;;  %v461_v19 = vsel %vm406_vm4, 0.0, %v460_v5 }
 0x25d   :  { %v441_v46 = vperm.slane %v433_v31, %v7036_v24  ;;  %v762_v23 = vrot.slane %v7120_v47, 4  ;;  %v641_v43 = vsel %vm406_vm4, %v460_v5, %v449_v4 }
 0x25e   :  { %v459_v39 = vsel %vm406_vm4, 0.0, %v458_v16 }
 0x25f   :  { %6348 = vrot.lane.b32.xlu2 %v6347_v6, %s6737_s22  ;;  %6343 = vrot.lane.b32.xlu1 %v6342_v7, %s6737_s22  ;;  %v555_v6 = vsel %vm406_vm4, %v554_v41, %v529_v27  ;;  %v465_v7 = vsel %vm406_vm4, %v6999_v1, %v464_v54  ;;  %v576_v27 = vrot.slane %v6939_v53, 4  ;;  %v430_v41 = vrot.slane %v425_v21, 4 }
 0x260   :  { %v561_v17 = vperm.slane %v555_v6, %v7036_v24  ;;  %v473_v18 = vperm.slane %v465_v7, %v7027_v13  ;;  %v512_v6 = vrot.slane %v497_v33, 4  ;;  %v574_v7 = vrot.slane %v6991_v63, 4 }
 0x261   :  { %v577_v55 = vsel %vm406_vm4, %v6991_v63, %v576_v27  ;;  %v431_v8 = vsel %vm406_vm4, %v430_v41, %v413_v58  ;;  %v456_v10 = vrot.slane %v441_v46, 4  ;;  %v7131_v58 = vperm.slane %v744_v48, %v7027_v13 }
 0x262   :  { %v570_v32 = vrot.slane %v561_v17, 4  ;;  %v500_v34 = vrot.slane %v473_v18, 4  ;;  %v585_v49 = vperm.slane %v577_v55, %v7027_v13  ;;  %v437_v15 = vperm.slane %v431_v8, %v7036_v24 }
 0x263   :  { %v513_v20 = vsel %vm406_vm4, 0.0, %v512_v6  ;;  %v575_v21 = vsel %vm406_vm4, %v574_v7, %v6939_v53  ;;  %v499_v26 = vsel %vm406_vm4, %v498_v25, %v473_v18  ;;  %v684_v40 = vsel %vm406_vm4, %v512_v6, %v493_v9 }
 0x264   :  { %v571_v54 = vsel %vm406_vm4, 0.0, %v570_v32  ;;  %v501_v50 = vsel %vm406_vm4, %v7067_v0, %v500_v34  ;;  %v749_v0 = vsel %vm406_vm4, %v572_v28, %v561_v17  ;;  %v612_v27 = vrot.slane %v585_v49, 4 }
 0x265   :  { %v509_v63 = vperm.slane %v501_v50, %v7036_v24  ;;  %v7139_v17 = vperm.slane %v749_v0, %v7027_v13  ;;  %v755_v22 = vsel %vm406_vm4, %v754_v56, %v571_v54  ;;  %v457_v28 = vsel %vm406_vm4, 0.0, %v456_v10 }
 0x266   :  { %v646_v32 = vrot.slane %v461_v19, 4  ;;  %v689_v33 = vrot.slane %v513_v20, 4  ;;  %v581_v34 = vperm.slane %v575_v21, %v7027_v13  ;;  %v454_v36 = vrot.slane %v437_v15, 4 }
 0x267   :  { %v516_v31 = vrot.slane %v509_v63, 4  ;;  %v505_v18 = vperm.slane %v499_v26, %v7036_v24  ;;  %v630_v25 = vsel %vm406_vm4, %v456_v10, %v437_v15  ;;  %v635_v41 = vrot.slane %v457_v28, 4 }
 0x268   :  { %v613_v60 = vsel %vm406_vm4, %v7105_v44, %v612_v27  ;;  %v7158_v52 = vperm.slane %v755_v22, %v7027_v13  ;;  %v7162_v55 = vsel %vm406_vm4, %v7131_v58, %v762_v23  ;;  %v647_v54 = vsel %vm406_vm4, %v646_v32, %v459_v39 }
 0x269   :  { %v517_v48 = vsel %vm406_vm4, 0.0, %v516_v31  ;;  %v688_v50 = vperm.slane %v684_v40, %v7027_v13  ;;  %v690_v4 = vsel %vm406_vm4, %v689_v33, %v511_v51  ;;  %v600_v5 = vrot.slane %v581_v34, 4  ;;  %v7195_v33 = vpop.permute.xlu1 %848 }
 0x26a   :  { %v455_v44 = vsel %vm406_vm4, 0.0, %v454_v36  ;;  %v634_v6 = vperm.slane %v630_v25, %v7027_v13  ;;  %v645_v7 = vperm.slane %v641_v43, %v7027_v13  ;;  %v599_v8 = vsel %vm406_vm4, %v598_v12, %v581_v34 }
 0x26b   :  { %v611_v56 = vsel %vm406_vm4, %v610_v14, %v585_v49  ;;  %v636_v9 = vsel %vm406_vm4, %v635_v41, %v455_v44  ;;  %v514_v10 = vrot.slane %v505_v18, 4  ;;  %v621_v0 = vperm.slane %v613_v60, %v7036_v24 }
 0x26c   :  { %v651_v15 = vperm.slane %v647_v54, %v7027_v13  ;;  %v694_v16 = vperm.slane %v690_v4, %v7027_v13  ;;  %v700_v19 = vrot.slane %v517_v48, 4  ;;  %v695_v22 = vsel %vm406_vm4, %v516_v31, %v505_v18 }
 0x26d   :  { %v708_v12 = vrot.slane %v688_v50, 4  ;;  %v7183_v49 = vsel %vm406_vm4, %v7102_v62, %v600_v5  ;;  %v640_v14 = vperm.slane %v636_v9, %v7027_v13  ;;  %v654_v23 = vrot.slane %v634_v6, 4 }
 0x26e   :  { %v666_v26 = vrot.slane %v645_v7, 4  ;;  %v7187_v27 = vperm.slane %v611_v56, %v7036_v24  ;;  %v515_v30 = vsel %vm406_vm4, 0.0, %v514_v10  ;;  %v774_v32 = vrot.slane %v7139_v17, 4 }
 0x26f   :  { %v7193_v31 = vperm.slane %v599_v8, %v7036_v24  ;;  %v664_v62 = vrot.slane %v651_v15, 4  ;;  %v699_v34 = vperm.slane %v695_v22, %v7027_v13  ;;  %v701_v36 = vsel %vm406_vm4, %v700_v19, %v515_v30 }
 0x270   :  { %v609_v39 = vperm.slane %v7183_v49, %v7036_v24  ;;  %v7201_v40 = vrot.slane %v621_v0, 4  ;;  %v709_v41 = vsel %vm406_vm4, %v694_v16, %v708_v12  ;;  %v655_v60 = vsel %vm406_vm4, %v640_v14, %v654_v23 }
 0x271   :  { %v706_v51 = vrot.slane %v694_v16, 4  ;;  %v1008_v48 = vrot.slane %v7096_v37, 4  ;;  %v652_v4 = vrot.slane %v640_v14, 4  ;;  %v705_v5 = vperm.slane %v701_v36, %v7027_v13 }
 0x272   :  { %v665_v8 = vsel %vm406_vm4, %v664_v62, %v645_v7  ;;  %v7217_v56 = vperm.slane %v709_v41, %v7036_v24  ;;  %v720_v9 = vrot.slane %v699_v34, 4  ;;  %v1064_v19 = vrot.slane %v7145_v29, 4 }
 0x273   :  { %v707_v22 = vsel %vm406_vm4, %v706_v51, %v688_v50  ;;  %v653_v12 = vsel %vm406_vm4, %v652_v4, %v634_v6  ;;  %v671_v14 = vperm.slane %v665_v8, %v7036_v24  ;;  %v718_v23 = vrot.slane %v705_v5, 4 }
 0x274   :  { %v721_v50 = vsel %vm406_vm4, %v705_v5, %v720_v9  ;;  %v659_v4 = vperm.slane %v653_v12, %v7036_v24 }
 0x275   :  { %v719_v8 = vsel %vm406_vm4, %v718_v23, %v699_v34 }
 0x276   :  { %v7258_v34 = vperm.slane %v719_v8, %v7036_v24 }
 0x288   :  { %v7124_v11 = vpop.permute.xlu2 %858 }
 0x289   :  { %v1020_v20 = vrot.slane %v7124_v11, 4 }
 0x290   :  { %v875_v46 = vpop.permute.xlu2 %874 }
 0x291   :  { %v1018_v21 = vrot.slane %v875_v46, 4  ;;  %v1021_v28 = vsel %vm406_vm4, %v875_v46, %v1020_v20  ;;  %v667_v46 = vsel %vm406_vm4, %v651_v15, %v666_v26  ;;  %v663_v15 = vperm.slane %v655_v60, %v7036_v24 }
 0x292   :  { %v1029_v43 = vperm.slane %v1021_v28, %v7027_v13  ;;  %v675_v16 = vperm.slane %v667_v46, %v7036_v24  ;;  %v7235_v60 = vperm.slane %v707_v22, %v7036_v24 }
 0x293   :  { %v1019_v18 = vsel %vm406_vm4, %v1018_v21, %v7124_v11 }
 0x294   :  { %v7175_v63 = vpop.permute.xlu0 %856  ;;  %v1025_v11 = vperm.slane %v1019_v18, %v7027_v13  ;;  %v1042_v20 = vrot.slane %v1029_v43, 4  ;;  %v682_v18 = vrot.slane %v663_v15, 4  ;;  %v680_v41 = vrot.slane %v675_v16, 4 }
 0x296   :  { %v1030_v26 = vrot.slane %v1025_v11, 4  ;;  %v7252_v22 = vsel %vm406_vm4, %v680_v41, %v663_v15  ;;  %v7255_v12 = vsel %vm406_vm4, %v675_v16, %v682_v18 }
 0x299   :  { %v7205_v25 = vpop.permute.xlu2 %868 }
 0x29c   :  { %v867_v44 = vpop.permute.xlu0 %866 }
 0x29d   :  { %v1006_v10 = vrot.slane %v867_v44, 4  ;;  %v1009_v0 = vsel %vm406_vm4, %v867_v44, %v1008_v48 }
 0x29e   :  { %v1017_v21 = vperm.slane %v1009_v0, %v7027_v13  ;;  %v7247_v0 = vperm.slane %v721_v50, %v7036_v24 }
 0x29f   :  { %v1007_v7 = vsel %vm406_vm4, %v1006_v10, %v7096_v37  ;;  %v676_v10 = vrot.slane %v671_v14, 4 }
 0x2a0   :  { %v1013_v28 = vperm.slane %v1007_v7, %v7027_v13  ;;  %v1043_v30 = vsel %vm406_vm4, %v1042_v20, %v1017_v21  ;;  %v1044_v62 = vrot.slane %v1017_v21, 4 }
 0x2a1   :  { %v7231_v36 = vpop.permute.xlu2 %846  ;;  %v1049_v51 = vperm.slane %v1043_v30, %v7036_v24  ;;  %v678_v30 = vrot.slane %v659_v4, 4 }
 0x2a2   :  { %v1031_v37 = vsel %vm406_vm4, %v1030_v26, %v1013_v28  ;;  %v1032_v6 = vrot.slane %v1013_v28, 4  ;;  %v1045_v46 = vsel %vm406_vm4, %v1029_v43, %v1044_v62  ;;  %v1062_v43 = vrot.slane %v7205_v25, 4 }
 0x2a3   :  { %v1053_v48 = vperm.slane %v1045_v46, %v7036_v24  ;;  %v1037_v9 = vperm.slane %v1031_v37, %v7036_v24  ;;  %v1058_v7 = vrot.slane %v1049_v51, 4  ;;  %v1065_v62 = vsel %vm406_vm4, %v7205_v25, %v1064_v19 }
 0x2a4   :  { %v1033_v5 = vsel %vm406_vm4, %v1025_v11, %v1032_v6  ;;  %v1063_v16 = vsel %vm406_vm4, %v1062_v43, %v7145_v29  ;;  %v7274_v25 = vsel %vm406_vm4, %v676_v10, %v659_v4  ;;  %v7280_v29 = vsel %vm406_vm4, %v7158_v52, %v774_v32  ;;  %v873_v10 = vpop.permute.xlu0 %872 }
 0x2a5   :  { %v1041_v20 = vperm.slane %v1033_v5, %v7036_v24  ;;  %v1060_v21 = vrot.slane %v1053_v48, 4  ;;  %v1054_v15 = vrot.slane %v1037_v9, 4  ;;  %v1073_v4 = vperm.slane %v1065_v62, %v7027_v13 }
 0x2a6   :  { %v964_v62 = vrot.slane %v7175_v63, 4 }
 0x2a7   :  { %v1056_v23 = vrot.slane %v1041_v20, 4  ;;  %v1061_v26 = vsel %vm406_vm4, 0.0, %v1060_v21  ;;  %v1237_v28 = vsel %vm406_vm4, %v1060_v21, %v1049_v51  ;;  %v1059_v51 = vsel %vm406_vm4, 0.0, %v1058_v7 }
 0x2a8   :  { %v1242_v41 = vrot.slane %v1061_v26, 4  ;;  %v1241_v18 = vperm.slane %v1237_v28, %v7027_v13  ;;  %v1069_v20 = vperm.slane %v1063_v16, %v7027_v13  ;;  %v1055_v21 = vsel %vm406_vm4, 0.0, %v1054_v15 }
 0x2a9   :  { %v863_v37 = vpop.permute.xlu2 %862  ;;  %v861_v6 = vpop.permute.xlu1 %860  ;;  %v1057_v46 = vsel %vm406_vm4, 0.0, %v1056_v23  ;;  %v1226_v48 = vsel %vm406_vm4, %v1056_v23, %v1037_v9  ;;  %v7287_v9 = vrot.slane %v609_v39, 4  ;;  %v7295_v28 = vsel %vm406_vm4, %v671_v14, %v678_v30 }
 0x2aa   :  { %v1230_v8 = vperm.slane %v1226_v48, %v7027_v13  ;;  %v1231_v19 = vrot.slane %v1057_v46, 4  ;;  %v1243_v5 = vsel %vm406_vm4, %v1242_v41, %v1059_v51  ;;  %v1262_v26 = vrot.slane %v1241_v18, 4 }
 0x2ab   :  { %v1247_v32 = vperm.slane %v1243_v5, %v7027_v13  ;;  %v962_v46 = vrot.slane %v873_v10, 4  ;;  %v894_v15 = vrot.slane %v863_v37, 4  ;;  %v7303_v48 = vsel %vm406_vm4, 0.0, %v7201_v40 }
 0x2ac   :  { %v1232_v7 = vsel %vm406_vm4, %v1231_v19, %v1055_v21  ;;  %v1250_v23 = vrot.slane %v1230_v8, 4  ;;  %v1088_v51 = vrot.slane %v1069_v20, 4  ;;  %v1100_v19 = vrot.slane %v1073_v4, 4 }
 0x2ad   :  { %v1236_v49 = vperm.slane %v1232_v7, %v7027_v13  ;;  %v1260_v39 = vrot.slane %v1247_v32, 4  ;;  %v1076_v5 = vrot.slane %v861_v6, 4  ;;  %v7307_v14 = vsel %vm406_vm4, 0.0, %v7287_v9 }
 0x2ae   :  { %v896_v30 = vrot.slane %v7231_v36, 4  ;;  %v965_v21 = vsel %vm406_vm4, %v873_v10, %v964_v62  ;;  %v1263_v50 = vsel %vm406_vm4, %v1247_v32, %v1262_v26  ;;  %v963_v41 = vsel %vm406_vm4, %v962_v46, %v7175_v63 }
 0x2af   :  { %v1251_v43 = vsel %vm406_vm4, %v1236_v49, %v1250_v23  ;;  %v1248_v53 = vrot.slane %v1236_v49, 4  ;;  %v1261_v16 = vsel %vm406_vm4, %v1260_v39, %v1241_v18  ;;  %v895_v54 = vsel %vm406_vm4, %v894_v15, %v7231_v36 }
 0x2b0   :  { %v897_v45 = vsel %vm406_vm4, %v863_v37, %v896_v30  ;;  %v973_v32 = vperm.slane %v965_v21, %v7027_v13  ;;  %v1259_v49 = vperm.slane %v1251_v43, %v7036_v24  ;;  %v1271_v18 = vperm.slane %v1263_v50, %v7036_v24 }
 0x2b1   :  { %v877_v7 = vpop.permute.xlu1 %876  ;;  %v7320_v10 = vpop.permute.xlu2 %6328  ;;  %v7330_v36 = vperm.slane %v1261_v16, %v7036_v24  ;;  %v969_v37 = vperm.slane %v963_v41, %v7027_v13  ;;  %v7337_v46 = vperm.slane %v897_v45, %v7027_v13 }
 0x2b2   :  { %v1074_v11 = vrot.slane %v877_v7, 4  ;;  %v1077_v44 = vsel %vm406_vm4, %v877_v7, %v1076_v5  ;;  %v9867_v16 = vunpack.i.l.bf16 %v7320_v10  ;;  %v1276_v5 = vrot.slane %v1271_v18, 4 }
 0x2b3   :  { %v1085_v23 = vperm.slane %v1077_v44, %v7027_v13  ;;  %v7334_v44 = vperm.slane %v895_v54, %v7027_v13  ;;  %v986_v21 = vrot.slane %v973_v32, 4 }
 0x2b4   :  { %v1075_v26 = vsel %vm406_vm4, %v1074_v11, %v861_v6  ;;  %v1249_v11 = vsel %vm406_vm4, %v1248_v53, %v1230_v8  ;;  %v1272_v8 = vrot.slane %v7330_v36, 4  ;;  %v7359_v54 = vsel %vm406_vm4, %v1276_v5, %v1259_v49 }
 0x2b5   :  { %v1081_v39 = vperm.slane %v1075_v26, %v7027_v13  ;;  %v1098_v63 = vrot.slane %v1085_v23, 4  ;;  %v1101_v62 = vsel %vm406_vm4, %v1085_v23, %v1100_v19  ;;  %v871_v19 = vpop.permute.xlu0 %870  ;;  %v7348_v53 = vperm.slane %v1249_v11, %v7036_v24 }
 0x2b6   :  { %v1109_v15 = vperm.slane %v1101_v62, %v7036_v24  ;;  %v920_v26 = vrot.slane %v7334_v44, 4  ;;  %v9901_v11 = vrot.slane %v7195_v33, 4 }
 0x2b7   :  { %v1086_v6 = vrot.slane %v1081_v39, 4  ;;  %v1089_v50 = vsel %vm406_vm4, %v1081_v39, %v1088_v51  ;;  %v1099_v43 = vsel %vm406_vm4, %v1098_v63, %v1073_v4  ;;  %v1278_v51 = vrot.slane %v1259_v49, 4 }
 0x2b8   :  { %v1097_v41 = vperm.slane %v1089_v50, %v7036_v24  ;;  %v974_v4 = vrot.slane %v969_v37, 4  ;;  %v1105_v23 = vperm.slane %v1099_v43, %v7036_v24  ;;  %v932_v39 = vrot.slane %v7337_v46, 4 }
 0x2b9   :  { %v1087_v45 = vsel %vm406_vm4, %v1086_v6, %v1069_v20  ;;  %v865_v30 = vpop.permute.xlu1 %864  ;;  %v906_v63 = vrot.slane %v871_v19, 4  ;;  %v1116_v62 = vrot.slane %v1109_v15, 4  ;;  %v7365_v43 = vpop.permute.xlu2 %6348  ;;  %v7370_v15 = vsel %vm406_vm4, %v1272_v8, %v7348_v53 }
 0x2ba   :  { %v1093_v7 = vperm.slane %v1087_v45, %v7036_v24  ;;  %v1112_v20 = vrot.slane %v1097_v41, 4  ;;  %v950_v6 = vrot.slane %v865_v30, 4  ;;  %v953_v50 = vsel %vm406_vm4, %v865_v30, %v9901_v11 }
 0x2bb   :  { %v7363_v45 = vrot.slane %v9867_v16, 4  ;;  %v961_v42 = vperm.slane %v953_v50, %v7027_v13  ;;  %v7373_v41 = vsel %vm406_vm4, %v1271_v18, %v1278_v51  ;;  %v1114_v38 = vrot.slane %v1105_v23, 4 }
 0x2bc   :  { %v951_v49 = vsel %vm406_vm4, %v950_v6, %v7195_v33  ;;  %v1110_v5 = vrot.slane %v1093_v7, 4  ;;  %v1117_v11 = vsel %vm406_vm4, 0.0, %v1116_v62  ;;  %v1113_v8 = vsel %vm406_vm4, 0.0, %v1112_v20 }
 0x2bd   :  { %v957_v16 = vperm.slane %v951_v49, %v7027_v13  ;;  %v987_v50 = vsel %vm406_vm4, %v986_v21, %v961_v42  ;;  %v988_v35 = vrot.slane %v961_v42, 4  ;;  %v1291_v61 = vsel %vm406_vm4, %v1116_v62, %v1105_v23 }
 0x2be   :  { %v9872_v18 = vunpack.i.h.bf16 %v7365_v43  ;;  %v1280_v51 = vsel %vm406_vm4, %v1112_v20, %v1093_v7  ;;  %v993_v59 = vperm.slane %v987_v50, %v7036_v24  ;;  %v1296_v49 = vrot.slane %v1117_v11, 4 }
 0x2bf   :  { %v975_v33 = vsel %vm406_vm4, %v974_v4, %v957_v16  ;;  %v976_v6 = vrot.slane %v957_v16, 4  ;;  %v989_v30 = vsel %vm406_vm4, %v973_v32, %v988_v35  ;;  %v1111_v23 = vsel %vm406_vm4, 0.0, %v1110_v5 }
 0x2c0   :  { %v7389_v21 = vperm.slane %v975_v33, %v7036_v24  ;;  %v997_v42 = vperm.slane %v989_v30, %v7036_v24  ;;  %v1285_v4 = vrot.slane %v1113_v8, 4  ;;  %v1115_v16 = vsel %vm406_vm4, 0.0, %v1114_v38 }
 0x2c1   :  { %v855_v2 = vpop.permute.xlu1 %854  ;;  %v977_v62 = vsel %vm406_vm4, %v969_v37, %v976_v6  ;;  %v7398_v35 = vrot.slane %v9872_v18, 4  ;;  %v1284_v11 = vperm.slane %v1280_v51, %v7027_v13  ;;  %v1002_v50 = vrot.slane %v993_v59, 4 }
 0x2c2   :  { %v907_v7 = vsel %vm406_vm4, %v906_v63, %v855_v2  ;;  %v908_v20 = vrot.slane %v855_v2, 4  ;;  %v1004_v32 = vrot.slane %v997_v42, 4  ;;  %v1286_v37 = vsel %vm406_vm4, %v1285_v4, %v1111_v23 }
 0x2c3   :  { %v913_v5 = vperm.slane %v907_v7, %v7027_v13  ;;  %v985_v63 = vperm.slane %v977_v62, %v7036_v24  ;;  %v998_v2 = vrot.slane %v7389_v21, 4  ;;  %v1295_v8 = vperm.slane %v1291_v61, %v7027_v13 }
 0x2c4   :  { %v909_v30 = vsel %vm406_vm4, %v871_v19, %v908_v20  ;;  %v1005_v33 = vsel %vm406_vm4, 0.0, %v1004_v32  ;;  %v1183_v6 = vsel %vm406_vm4, %v1004_v32, %v993_v59  ;;  %v1290_v62 = vperm.slane %v1286_v37, %v7027_v13 }
 0x2c5   :  { %v917_v38 = vperm.slane %v909_v30, %v7027_v13  ;;  %v918_v51 = vrot.slane %v913_v5, 4  ;;  %v921_v42 = vsel %vm406_vm4, %v913_v5, %v920_v26  ;;  %v1297_v61 = vsel %vm406_vm4, %v1296_v49, %v1115_v16 }
 0x2c6   :  { %v929_v19 = vperm.slane %v921_v42, %v7036_v24  ;;  %v1304_v30 = vrot.slane %v1284_v11, 4 }
 0x2c7   :  { %v930_v7 = vrot.slane %v917_v38, 4  ;;  %v933_v23 = vsel %vm406_vm4, %v917_v38, %v932_v39  ;;  %v919_v20 = vsel %vm406_vm4, %v918_v51, %v7334_v44  ;;  %v1301_v39 = vperm.slane %v1297_v61, %v7027_v13 }
 0x2c8   :  { %v941_v4 = vperm.slane %v933_v23, %v7036_v24  ;;  %v925_v59 = vperm.slane %v919_v20, %v7036_v24  ;;  %v944_v32 = vrot.slane %v929_v19, 4  ;;  %v1302_v44 = vrot.slane %v1290_v62, 4 }
 0x2c9   :  { %v7418_v18 = vpop.permute.xlu1 %6338  ;;  %v931_v26 = vsel %vm406_vm4, %v930_v7, %v7337_v46  ;;  %v1305_v38 = vsel %vm406_vm4, %v1290_v62, %v1304_v30  ;;  %v1000_v23 = vrot.slane %v985_v63, 4  ;;  %v1003_v46 = vsel %vm406_vm4, 0.0, %v1002_v50 }
 0x2ca   :  { %9902 = vst [vmem:[#allocation24_spill] sm:$0xff] %v7418_v18  ;;  %v7425_v5 = vperm.slane %v931_v26, %v7036_v24  ;;  %v7427_v37 = vrot.slane %v941_v4, 4  ;;  %v942_v49 = vrot.slane %v925_v59, 4  ;;  %v945_v16 = vsel %vm406_vm4, 0.0, %v944_v32 }
 0x2cb   :  { %v1118_v51 = vsel %vm406_vm4, %v944_v32, %v925_v59  ;;  %v1313_v42 = vperm.slane %v1305_v38, %v7036_v24  ;;  %v7435_v19 = vperm.slane %v1183_v6, %v7027_v13  ;;  %v1188_v7 = vrot.slane %v1005_v33, 4 }
 0x2cc   :  { %v946_v20 = vrot.slane %v7425_v5, 4  ;;  %v7440_v4 = vsel %vm406_vm4, 0.0, %v7427_v37  ;;  %v1314_v62 = vrot.slane %v1301_v39, 4  ;;  %v1316_v61 = vrot.slane %v1295_v8, 4 }
 0x2cd   :  { %v7443_v30 = vperm.slane %v1118_v51, %v7027_v13  ;;  %v1123_v59 = vrot.slane %v945_v16, 4  ;;  %v1332_v26 = vrot.slane %v1313_v42, 4  ;;  %v1303_v63 = vsel %vm406_vm4, %v1302_v44, %v1284_v11 }
 0x2ce   :  { %v943_v50 = vsel %vm406_vm4, 0.0, %v942_v49  ;;  %v1317_v6 = vsel %vm406_vm4, %v1301_v39, %v1316_v61  ;;  %v1309_v33 = vperm.slane %v1303_v63, %v7036_v24  ;;  %v1315_v32 = vsel %vm406_vm4, %v1314_v62, %v1295_v8 }
 0x2cf   :  { %v1134_v38 = vrot.slane %v7440_v4, 4  ;;  %v1325_v18 = vperm.slane %v1317_v6, %v7036_v24  ;;  %v1321_v3 = vperm.slane %v1315_v32, %v7036_v24  ;;  %v9903_v51 = vrot.slane %v7348_v53, 4 }
 0x2d0   :  { %v1328_v11 = vrot.slane %v1309_v33, 4  ;;  %v999_v44 = vsel %vm406_vm4, 0.0, %v998_v2  ;;  %v1001_v39 = vsel %vm406_vm4, 0.0, %v1000_v23  ;;  %v1172_v49 = vsel %vm406_vm4, %v1000_v23, %v7389_v21 }
 0x2d1   :  { %v1275_v16 = vsel %vm406_vm4, %v7330_v36, %v9903_v51  ;;  %v1330_v8 = vrot.slane %v1325_v18, 4  ;;  %v1326_v62 = vrot.slane %v1321_v3, 4  ;;  %v1333_v61 = vsel %vm406_vm4, %v1325_v18, %v1332_v26  ;;  %v6344_v6 = vpop.permute.xlu1 %6343 }
 0x2d2   :  { %v1176_v63 = vperm.slane %v1172_v49, %v7027_v13  ;;  %6183 = vmatpush.xpose.msk.msra.mxu0 %vm146_vm0, %v1333_v61  ;;  %v1329_v53 = vsel %vm406_vm4, %v1321_v3, %v1328_v11  ;;  %v1177_v36 = vrot.slane %v1001_v39, 4  ;;  %v1189_v32 = vsel %vm406_vm4, %v1188_v7, %v1003_v46 }
 0x2d3   :  { %v1208_v2 = vrot.slane %v7435_v19, 4  ;;  %v1331_v51 = vsel %vm406_vm4, %v1330_v8, %v1313_v42  ;;  %v1327_v21 = vsel %vm406_vm4, %v1326_v62, %v1309_v33  ;;  %6167 = vmatpush.xpose.msk.msrb.mxu1 %vm146_vm0, %v1329_v53  ;;  %v1193_v18 = vperm.slane %v1189_v32, %v7027_v13 }
 0x2d4   :  { %v1196_v23 = vrot.slane %v1176_v63, 4  ;;  %6175 = vmatpush.xpose.msk.msrb.mxu3 %vm146_vm0, %v1331_v51  ;;  %6159 = vmatpush.xpose.msk.msra.mxu2 %vm146_vm0, %v1327_v21  ;;  %v1178_v3 = vsel %vm406_vm4, %v1177_v36, %v999_v44  ;;  %v6346_v26 = vunpack.i.h.bf16 %v6344_v6  ;;  %v6345_v11 = vunpack.i.l.bf16 %v6344_v6 }
 0x2d5   :  { %v947_v46 = vsel %vm406_vm4, 0.0, %v946_v20  ;;  %v1182_v7 = vperm.slane %v1178_v3, %v7027_v13  ;;  %v1209_v42 = vsel %vm406_vm4, %v1193_v18, %v1208_v2  ;;  %v1206_v33 = vrot.slane %v1193_v18, 4 }
 0x2d6   :  { %v1124_v39 = vsel %vm406_vm4, %v1123_v59, %v943_v50  ;;  %6184 = vmatpush.xpose.msk.msra.mxu0 %vm146_vm0, %v7373_v41  ;;  %v1217_v49 = vperm.slane %v1209_v42, %v7036_v24  ;;  %v1550_v8 = vrot.slane %v6346_v26, 4  ;;  %v1553_v44 = vsel %vm406_vm4, %v6346_v26, %v7363_v45 }
 0x2d7   :  { %v1563_v62 = vsel %vm406_vm4, %v7398_v35, %v6345_v11  ;;  %6168 = vmatpush.xpose.msk.msrb.mxu1 %vm146_vm0, %v1275_v16  ;;  %v1197_v20 = vsel %vm406_vm4, %v1182_v7, %v1196_v23  ;;  %v1561_v61 = vperm.slane %v1553_v44, %v7027_v13  ;;  %v1564_v6 = vrot.slane %v6345_v11, 4 }
 0x2d8   :  { %v1569_v59 = vperm.slane %v1563_v62, %v7027_v13  ;;  %6176 = vmatpush.xpose.msk.msrb.mxu3 %vm146_vm0, %v7359_v54  ;;  %6160 = vmatpush.xpose.msk.msra.mxu2 %vm146_vm0, %v7370_v15  ;;  %v1205_v45 = vperm.slane %v1197_v20, %v7036_v24  ;;  %v1222_v41 = vrot.slane %v1217_v49, 4  ;;  %v9904_v35 = vunpack.i.l.bf16 %v7320_v10 }
 0x2d9   :  { %v1194_v16 = vrot.slane %v1182_v7, 4  ;;  %v1588_v36 = vrot.slane %v1561_v61, 4  ;;  %v9905_v32 = vunpack.i.h.bf16 %v7365_v43  ;;  %v1207_v18 = vsel %vm406_vm4, %v1206_v33, %v7435_v19 }
 0x2da   :  { %v1551_v50 = vsel %vm406_vm4, %v1550_v8, %v9904_v35  ;;  %v1574_v51 = vrot.slane %v1569_v59, 4  ;;  %v1223_v54 = vsel %vm406_vm4, %v1222_v41, %v1205_v45  ;;  %v1213_v11 = vperm.slane %v1207_v18, %v7036_v24 }
 0x2db   :  { %v1557_v53 = vperm.slane %v1551_v50, %v7027_v13  ;;  %v1565_v2 = vsel %vm406_vm4, %v9905_v32, %v1564_v6  ;;  %v1195_v21 = vsel %vm406_vm4, %v1194_v16, %v1176_v63  ;;  %v1224_v44 = vrot.slane %v1205_v45, 4 }
 0x2dc   :  { %v1573_v15 = vperm.slane %v1565_v2, %v7027_v13  ;;  %v1201_v26 = vperm.slane %v1195_v21, %v7036_v24  ;;  %6177 = vmatpush.xpose.msk.msrb.mxu3 %vm146_vm0, %v1223_v54  ;;  %v1218_v19 = vrot.slane %v1213_v11, 4 }
 0x2dd   :  { %v1576_v23 = vrot.slane %v1557_v53, 4  ;;  %v1575_v3 = vsel %vm406_vm4, %v1574_v51, %v1557_v53  ;;  %v1225_v35 = vsel %vm406_vm4, %v1217_v49, %v1224_v44  ;;  %v1129_v49 = vsel %vm406_vm4, %v7427_v37, %v7425_v5 }
 0x2de   :  { %v1581_v7 = vperm.slane %v1575_v3, %v7036_v24  ;;  %v1586_v42 = vrot.slane %v1573_v15, 4  ;;  %v1589_v8 = vsel %vm406_vm4, %v1573_v15, %v1588_v36  ;;  %v1220_v33 = vrot.slane %v1201_v26, 4  ;;  %6185 = vmatpush.xpose.msk.msra.mxu0 %vm146_vm0, %v1225_v35 }
 0x2df   :  { %v1577_v63 = vsel %vm406_vm4, %v1569_v59, %v1576_v23  ;;  %v1597_v62 = vperm.slane %v1589_v8, %v7036_v24  ;;  %v1219_v53 = vsel %vm406_vm4, %v1218_v19, %v1201_v26  ;;  %v1128_v36 = vperm.slane %v1124_v39, %v7027_v13 }
 0x2e0   :  { %v1585_v20 = vperm.slane %v1577_v63, %v7036_v24  ;;  %v1587_v6 = vsel %vm406_vm4, %v1586_v42, %v1561_v61  ;;  %v1598_v41 = vrot.slane %v1581_v7, 4  ;;  %v1221_v59 = vsel %vm406_vm4, %v1213_v11, %v1220_v33  ;;  %6161 = vmatpush.xpose.msk.msra.mxu2 %vm146_vm0, %v1219_v53 }
 0x2e1   :  { %v1593_v50 = vperm.slane %v1587_v6, %v7036_v24  ;;  %v1604_v16 = vrot.slane %v1597_v62, 4  ;;  %6169 = vmatpush.xpose.msk.msrb.mxu1 %vm146_vm0, %v1221_v59  ;;  %v1135_v61 = vsel %vm406_vm4, %v1134_v38, %v947_v46  ;;  %v1133_v51 = vperm.slane %v1129_v49, %v7027_v13 }
 0x2e2   :  { %v1600_v45 = vrot.slane %v1585_v20, 4  ;;  %v1139_v54 = vperm.slane %v1135_v61, %v7027_v13  ;;  %v1142_v39 = vrot.slane %v7443_v30, 4  ;;  %v1140_v18 = vrot.slane %v1128_v36, 4 }
 0x2e3   :  { %v1602_v32 = vrot.slane %v1593_v50, 4  ;;  %v1605_v2 = vsel %vm406_vm4, 0.0, %v1604_v16  ;;  %v1154_v37 = vrot.slane %v1133_v51, 4  ;;  %v1599_v3 = vsel %vm406_vm4, 0.0, %v1598_v41 }
 0x2e4   :  { %v1601_v15 = vsel %vm406_vm4, 0.0, %v1600_v45  ;;  %v1784_v21 = vrot.slane %v1605_v2, 4  ;;  %v1152_v4 = vrot.slane %v1139_v54, 4  ;;  %v1143_v38 = vsel %vm406_vm4, %v1128_v36, %v1142_v39 }
 0x2e5   :  { %v1603_v23 = vsel %vm406_vm4, 0.0, %v1602_v32  ;;  %v1773_v5 = vrot.slane %v1601_v15, 4  ;;  %v1141_v46 = vsel %vm406_vm4, %v1140_v18, %v7443_v30  ;;  %v1768_v26 = vsel %vm406_vm4, %v1600_v45, %v1581_v7 }
 0x2e6   :  { %v1151_v11 = vperm.slane %v1143_v38, %v7036_v24  ;;  %v1155_v42 = vsel %vm406_vm4, %v1139_v54, %v1154_v37  ;;  %v1147_v8 = vperm.slane %v1141_v46, %v7036_v24  ;;  %v1153_v44 = vsel %vm406_vm4, %v1152_v4, %v1133_v51 }
 0x2e7   :  { %v1163_v63 = vperm.slane %v1155_v42, %v7036_v24  ;;  %v1159_v62 = vperm.slane %v1153_v44, %v7036_v24  ;;  %v1772_v19 = vperm.slane %v1768_v26, %v7027_v13  ;;  %v1774_v30 = vsel %vm406_vm4, %v1773_v5, %v1599_v3 }
 0x2e8   :  { %v1170_v33 = vrot.slane %v1151_v11, 4  ;;  %v1166_v20 = vrot.slane %v1147_v8, 4  ;;  %v1778_v7 = vperm.slane %v1774_v30, %v7027_v13  ;;  %v1779_v6 = vsel %vm406_vm4, %v1604_v16, %v1593_v50 }
 0x2e9   :  { %v1168_v41 = vrot.slane %v1163_v63, 4  ;;  %v1164_v35 = vrot.slane %v1159_v62, 4  ;;  %v1783_v53 = vperm.slane %v1779_v6, %v7027_v13  ;;  %v1785_v59 = vsel %vm406_vm4, %v1784_v21, %v1603_v23 }
 0x2ea   :  { %v1171_v45 = vsel %vm406_vm4, %v1163_v63, %v1170_v33  ;;  %v1167_v36 = vsel %vm406_vm4, %v1159_v62, %v1166_v20  ;;  %v1789_v49 = vperm.slane %v1785_v59, %v7027_v13  ;;  %v1792_v61 = vrot.slane %v1772_v19, 4 }
 0x2eb   :  { %6186 = vmatpush.xpose.msk.msra.mxu0 %vm146_vm0, %v1171_v45  ;;  %6170 = vmatpush.xpose.msk.msrb.mxu1 %vm146_vm0, %v1167_v36  ;;  %v1169_v32 = vsel %vm406_vm4, %v1168_v41, %v1151_v11  ;;  %v1165_v50 = vsel %vm406_vm4, %v1164_v35, %v1147_v8  ;;  %v1804_v16 = vrot.slane %v1783_v53, 4  ;;  %v1790_v2 = vrot.slane %v1778_v7, 4 }
 0x2ec   :  { %6178 = vmatpush.xpose.msk.msrb.mxu3 %vm146_vm0, %v1169_v32  ;;  %6162 = vmatpush.xpose.msk.msra.mxu2 %vm146_vm0, %v1165_v50  ;;  %v1793_v51 = vsel %vm406_vm4, %v1778_v7, %v1792_v61  ;;  %v772_v54 = vrot.slane %v7158_v52, 4  ;;  %v1802_v15 = vrot.slane %v1789_v49, 4  ;;  %v808_v21 = vrot.slane %v7303_v48, 4 }
 0x2ed   :  { %v1801_v39 = vperm.slane %v1793_v51, %v7036_v24  ;;  %v1805_v18 = vsel %vm406_vm4, %v1789_v49, %v1804_v16  ;;  %v1791_v23 = vsel %vm406_vm4, %v1790_v2, %v1772_v19  ;;  %v9906_v5 = vrot.slane %v7193_v31, 4 }
 0x2ee   :  { %6187 = vmatmul.msk.f32.vlgmr.msra.gmra.mxu0 %vm146_vm0, %v7255_v12  ;;  %6171 = vmatmul.msk.f32.vlgmr.msrb.gmra.mxu1 %vm146_vm0, %v7295_v28  ;;  %v1813_v52 = vperm.slane %v1805_v18, %v7036_v24  ;;  %v1797_v48 = vperm.slane %v1791_v23, %v7036_v24  ;;  %v1803_v4 = vsel %vm406_vm4, %v1802_v15, %v1783_v53  ;;  %v9907_v38 = vrot.slane %v7187_v27, 4 }
 0x2ef   :  { %v623_v37 = vsel %vm406_vm4, 0.0, %v9906_v5  ;;  %6179 = vmatmul.msk.f32.vlgmr.msrb.gmra.mxu3 %vm146_vm0, %v7252_v22  ;;  %6163 = vmatmul.msk.f32.vlgmr.msra.gmra.mxu2 %vm146_vm0, %v7274_v25  ;;  %v1809_v12 = vperm.slane %v1803_v4, %v7036_v24  ;;  %v1820_v3 = vrot.slane %v1801_v39, 4  ;;  %v792_v28 = vsel %vm406_vm4, %v7287_v9, %v7193_v31 }
 0x2f0   :  { %v627_v46 = vsel %vm406_vm4, 0.0, %v9907_v38  ;;  %v9908_v26 = vrot.slane %v7307_v14, 4  ;;  %v1818_v42 = vrot.slane %v1813_v52, 4  ;;  %v1816_v8 = vrot.slane %v1797_v48, 4 }
 0x2f1   :  { %v803_v22 = vsel %vm406_vm4, %v7201_v40, %v7187_v27  ;;  %v809_v44 = vsel %vm406_vm4, %v808_v21, %v627_v46  ;;  %v9909_v25 = vrot.slane %v7131_v58, 4  ;;  %v773_v31 = vsel %vm406_vm4, %v772_v54, %v7139_v17 }
 0x2f2   :  { %v798_v11 = vsel %vm406_vm4, %v9908_v26, %v623_v37  ;;  %v1814_v9 = vrot.slane %v1809_v12, 4  ;;  %v1821_v14 = vsel %vm406_vm4, %v1813_v52, %v1820_v3  ;;  %v1819_v62 = vsel %vm406_vm4, %v1818_v42, %v1801_v39 }
 0x2f3   :  { %v761_v63 = vsel %vm406_vm4, %v9909_v25, %v7120_v47  ;;  %2357 = vmatpush.msrb.mxu0 %v1821_v14  ;;  %v1817_v19 = vsel %vm406_vm4, %v1809_v12, %v1816_v8  ;;  %v796_v27 = vperm.slane %v792_v28, %v7027_v13  ;;  %v802_v40 = vperm.slane %v798_v11, %v7027_v13 }
 0x2f4   :  { %2316 = vmatpush.msra.mxu3 %v1819_v62  ;;  %v1815_v58 = vsel %vm406_vm4, %v1814_v9, %v1797_v48  ;;  %2275 = vmatpush.msra.mxu1 %v1817_v19  ;;  %v807_v47 = vperm.slane %v803_v22, %v7027_v13  ;;  %v813_v17 = vperm.slane %v809_v44, %v7027_v13  ;;  %v9910_v30 = vrot.slane %v7217_v56, 4 }
 0x2f5   :  { %v771_v20 = vperm.slane %v7162_v55, %v7036_v24  ;;  %2234 = vmatpush.msrb.mxu2 %v1815_v58  ;;  %v9911_v7 = vrot.slane %v7235_v60, 4  ;;  %v9912_v41 = vrot.slane %v7247_v0, 4  ;;  %v783_v53 = vperm.slane %v7280_v29, %v7036_v24 }
 0x2f6   :  { %v737_v33 = vsel %vm406_vm4, %v7247_v0, %v9910_v30  ;;  %v767_v59 = vperm.slane %v761_v63, %v7036_v24  ;;  %v9913_v55 = vrot.slane %v7258_v34, 4  ;;  %v779_v36 = vperm.slane %v773_v31, %v7036_v24 }
 0x2f7   :  { %v733_v6 = vsel %vm406_vm4, %v7258_v34, %v9911_v7  ;;  %v735_v35 = vsel %vm406_vm4, %v9912_v41, %v7217_v56  ;;  %6188 = vmatmul.msk.f32.gmra.mxu0 %vm146_vm0, %v737_v33  ;;  %v816_v49 = vrot.slane %v796_v27, 4  ;;  %v814_v0 = vrot.slane %v802_v40, 4 }
 0x2f8   :  { %6172 = vmatmul.msk.f32.gmra.mxu1 %vm146_vm0, %v733_v6  ;;  %v731_v45 = vsel %vm406_vm4, %v9913_v55, %v7235_v60  ;;  %6180 = vmatmul.msk.f32.gmra.mxu3 %vm146_vm0, %v735_v35  ;;  %v828_v56 = vrot.slane %v807_v47, 4  ;;  %v826_v29 = vrot.slane %v813_v17, 4  ;;  %v790_v61 = vrot.slane %v771_v20, 4 }
 0x2f9   :  { %6164 = vmatmul.msk.f32.gmra.mxu2 %vm146_vm0, %v731_v45  ;;  %v786_v32 = vrot.slane %v767_v59, 4  ;;  %v788_v50 = vrot.slane %v783_v53, 4  ;;  %v784_v16 = vrot.slane %v779_v36, 4  ;;  %v817_v2 = vsel %vm406_vm4, %v802_v40, %v816_v49 }
 0x2fa   :  { %v815_v34 = vsel %vm406_vm4, %v814_v0, %v796_v27  ;;  %v829_v60 = vsel %vm406_vm4, %v813_v17, %v828_v56  ;;  %v827_v51 = vsel %vm406_vm4, %v826_v29, %v807_v47  ;;  %v791_v54 = vsel %vm406_vm4, %v783_v53, %v790_v61  ;;  %v9914_v29 = vld [vmem:[#allocation23_spill] sm:$0xff]  ;;  %v9915_v61 = vld [vmem:[#allocation22_spill] sm:$0xff] }
 0x2fb   :  { %v787_v15 = vsel %vm406_vm4, %v779_v36, %v786_v32  ;;  %v789_v21 = vsel %vm406_vm4, %v788_v50, %v771_v20  ;;  %v825_v39 = vperm.slane %v817_v2, %v7036_v24  ;;  %v821_v18 = vperm.slane %v815_v34, %v7036_v24  ;;  %v9916_v50 = vld [vmem:[#allocation20_spill] sm:$0xff]  ;;  %v7727_v34 = vpop.permute.xlu0 %6333 }
 0x2fc   :  { %v785_v23 = vsel %vm406_vm4, %v784_v16, %v767_v59  ;;  %v837_v5 = vperm.slane %v829_v60, %v7036_v24  ;;  %v833_v37 = vperm.slane %v827_v51, %v7036_v24  ;;  %v6352_v56 = vpack.i.bf16 %v6971_v57, %v6999_v1  ;;  %v9917_v16 = vld [vmem:[#allocation21_spill] sm:$0xff] }
 0x2fd   :  { %v844_v52 = vrot.slane %v825_v39, 4  ;;  %v840_v48 = vrot.slane %v821_v18, 4  ;;  %v6357_v32 = vpack.i.bf16 %v9915_v61, %v9914_v29  ;;  %v6362_v2 = vpack.i.bf16 %v9917_v16, %v9916_v50 }
 0x2fe   :  { %v842_v4 = vrot.slane %v837_v5, 4  ;;  %v838_v38 = vrot.slane %v833_v37, 4  ;;  %v6336_v16 = vunpack.i.h.bf16 %v7727_v34 }
 0x2ff   :  { %6189 = vmatmul.msk.f32.gmra.mxu0 %vm146_vm0, %v791_v54  ;;  %v845_v46 = vsel %vm406_vm4, %v837_v5, %v844_v52  ;;  %v841_v12 = vsel %vm406_vm4, %v833_v37, %v840_v48 }
 0x300   :  { %6173 = vmatmul.msk.f32.gmra.mxu1 %vm146_vm0, %v787_v15  ;;  %6181 = vmatmul.msk.f32.gmra.mxu3 %vm146_vm0, %v789_v21  ;;  %v843_v3 = vsel %vm406_vm4, %v842_v4, %v825_v39  ;;  %v839_v28 = vsel %vm406_vm4, %v838_v38, %v821_v18 }
 0x301   :  { %6165 = vmatmul.msk.f32.gmra.mxu2 %vm146_vm0, %v785_v23 }
 0x307   :  { %6190 = vmatmul.msk.f32.gmra.mxu0 %vm146_vm0, %v845_v46 }
 0x308   :  { %6174 = vmatmul.msk.f32.gmra.mxu1 %vm146_vm0, %v841_v12  ;;  %6182 = vmatmul.msk.f32.gmra.mxu3 %vm146_vm0, %v843_v3 }
 0x309   :  { %6166 = vmatmul.msk.f32.gmra.mxu2 %vm146_vm0, %v839_v28 }
 0x36b   :  { %v7660_v26 = vpop.f32.mrf.mxu0  ;;  %v1916_v11 = vpop.f32.mrf.mxu1 }
 0x36c   :  { %v2070_v42 = vsel %vm186_vm3, %v7660_v26, -inf  ;;  %v2046_v25 = vsel %vm186_vm3, %v1916_v11, -inf }
 0x36d   :  { %2071 = vmax.xlane.f32.xlu2 %v2070_v42 }
 0x372   :  { %v1969_v8 = vpop.f32.mrf.mxu3  ;;  %v7672_v9 = vpop.f32.mrf.mxu2 }
 0x373   :  { %v2058_v22 = vsel %vm186_vm3, %v1969_v8, -inf  ;;  %v2034_v19 = vsel %vm186_vm3, %v7672_v9, -inf }
 0x374   :  { %2059 = vmax.xlane.f32.xlu1 %v2058_v22  ;;  %v7670_v31 = vpop.f32.mrf.mxu0 }
 0x375   :  { %v7665_v44 = vpop.f32.mrf.mxu1  ;;  %2047 = vmax.xlane.f32.xlu2 %v2046_v25  ;;  %v2073_v62 = vsel %vm186_vm3, %v7670_v31, -inf }
 0x376   :  { %v2049_v63 = vsel %vm186_vm3, %v7665_v44, -inf }
 0x377   :  { %2050 = vmax.xlane.f32.xlu0 %v2049_v63 }
 0x37b   :  { %v7674_v14 = vpop.f32.mrf.mxu3 }
 0x37c   :  { %2074 = vmax.xlane.f32.xlu1 %v2073_v62  ;;  %v2061_v27 = vsel %vm186_vm3, %v7674_v14, -inf  ;;  %v7682_v40 = vpop.f32.mrf.mxu0  ;;  %v7684_v58 = vpop.f32.mrf.mxu2 }
 0x37d   :  { %2035 = vmax.xlane.f32.xlu2 %v2034_v19  ;;  %v2037_v17 = vsel %vm186_vm3, %v7684_v58, -inf  ;;  %v2076_v30 = vsel %vm186_vm3, %v7682_v40, -inf  ;;  %v7694_v20 = vpop.f32.mrf.mxu1 }
 0x37e   :  { %v2052_v41 = vsel %vm186_vm3, %v7694_v20, -inf }
 0x37f   :  { %2062 = vmax.xlane.f32.xlu0 %v2061_v27 }
 0x383   :  { %v7686_v47 = vpop.f32.mrf.mxu3 }
 0x384   :  { %2038 = vmax.xlane.f32.xlu1 %v2037_v17  ;;  %v2064_v33 = vsel %vm186_vm3, %v7686_v47, -inf  ;;  %v7696_v7 = vpop.f32.mrf.mxu0  ;;  %v7698_v6 = vpop.f32.mrf.mxu2 }
 0x385   :  { %2077 = vmax.xlane.f32.xlu2 %v2076_v30  ;;  %v2040_v35 = vsel %vm186_vm3, %v7698_v6, -inf  ;;  %v2079_v53 = vsel %vm186_vm3, %v7696_v7, -inf  ;;  %v7708_v55 = vpop.f32.mrf.mxu1 }
 0x386   :  { %v2055_v36 = vsel %vm186_vm3, %v7708_v55, -inf }
 0x387   :  { %2065 = vmax.xlane.f32.xlu0 %v2064_v33  ;;  %v6331_v33 = vunpack.i.h.bf16 %v7320_v10 }
 0x389   :  { %v1496_v29 = vrot.slane %v6331_v33, 4 }
 0x38b   :  { %v7706_v59 = vpop.f32.mrf.mxu3 }
 0x38c   :  { %2053 = vmax.xlane.f32.xlu1 %v2052_v41  ;;  %v2067_v45 = vsel %vm186_vm3, %v7706_v59, -inf  ;;  %v7714_v49 = vpop.f32.mrf.mxu2 }
 0x38d   :  { %2041 = vmax.xlane.f32.xlu2 %v2040_v35  ;;  %v2043_v0 = vsel %vm186_vm3, %v7714_v49, -inf }
 0x38f   :  { %2080 = vmax.xlane.f32.xlu0 %v2079_v53 }
 0x394   :  { %2068 = vmax.xlane.f32.xlu1 %v2067_v45 }
 0x397   :  { %2056 = vmax.xlane.f32.xlu0 %v2055_v36 }
 0x39f   :  { %2044 = vmax.xlane.f32.xlu0 %v2043_v0 }
 0x3a5   :  { %6353 = vrot.lane.b32.xlu2 %v6352_v56, %s6737_s22 }
 0x3ad   :  { %6358 = vrot.lane.b32.xlu1 %v6357_v32, %s6737_s22 }
 0x3b3   :  { %6363 = vrot.lane.b32.xlu0 %v6362_v2, %s6737_s22 }
 0x3e0   :  { %v2072_v60 = vpop.xlane.xlu2 %2071 }
 0x3e1   :  { %v2094_v1 = vsub.f32 %v7660_v26, %v2072_v60 }
 0x3e3   :  { %v2122_v23 = vmul.f32 1.442695, %v2094_v1 }
 0x3e7   :  { %v2060_v51 = vpop.xlane.xlu1 %2059 }
 0x3e8   :  { %v2090_v54 = vsub.f32 %v1969_v8, %v2060_v51  ;;  %v2048_v15 = vpop.xlane.xlu2 %2047 }
 0x3e9   :  { %v2086_v57 = vsub.f32 %v1916_v11, %v2048_v15 }
 0x3ea   :  { %v2051_v21 = vpop.xlane.xlu0 %2050  ;;  %v2114_v39 = vmul.f32 1.442695, %v2090_v54 }
 0x3eb   :  { %v2106_v18 = vmul.f32 1.442695, %v2086_v57  ;;  %v2087_v17 = vsub.f32 %v7665_v44, %v2051_v21 }
 0x3ec   :  { %6416 = vpow2.f32 %v2114_v39  ;;  %v1508_v39 = vrot.slane %v6336_v16, 4 }
 0x3ed   :  { %6418 = vpow2.f32 %v2106_v18  ;;  %v2108_v53 = vmul.f32 1.442695, %v2087_v17 }
 0x3ee   :  { %6420 = vpow2.f32 %v2122_v23 }
 0x3ef   :  { %v2075_v5 = vpop.xlane.xlu1 %2074 }
 0x3f0   :  { %v2036_v37 = vpop.xlane.xlu2 %2035  ;;  %v2095_v12 = vsub.f32 %v7670_v31, %v2075_v5 }
 0x3f1   :  { %v2082_v48 = vsub.f32 %v7672_v9, %v2036_v37 }
 0x3f2   :  { %v2063_v52 = vpop.xlane.xlu0 %2062  ;;  %v7732_v38 = vpop.eup %6416  ;;  %v2124_v42 = vmul.f32 1.442695, %v2095_v12 }
 0x3f3   :  { %v2091_v4 = vsub.f32 %v7674_v14, %v2063_v52  ;;  %v7734_v46 = vpop.eup %6418  ;;  %v2098_v3 = vmul.f32 1.442695, %v2082_v48  ;;  %v2154_v26 = vsel %vm186_vm3, %v7732_v38, 0.0 }
 0x3f4   :  { %2155 = vadd.xlane.f32.xlu2 %v2154_v26  ;;  %v2142_v11 = vsel %vm186_vm3, %v7734_v46, 0.0  ;;  %v7741_v22 = vpop.eup %6420 }
 0x3f5   :  { %v2116_v28 = vmul.f32 1.442695, %v2091_v4  ;;  %6422 = vpow2.f32 %v2098_v3  ;;  %2143 = vadd.xlane.f32.xlu0 %v2142_v11  ;;  %v2166_v19 = vsel %vm186_vm3, %v7741_v22, 0.0 }
 0x3f7   :  { %6424 = vpow2.f32 %v2116_v28  ;;  %v2039_v8 = vpop.xlane.xlu1 %2038 }
 0x3f8   :  { %v2078_v25 = vpop.xlane.xlu2 %2077  ;;  %6426 = vpow2.f32 %v2124_v42  ;;  %v2083_v14 = vsub.f32 %v7684_v58, %v2039_v8  ;;  %v6350_v58 = vunpack.i.l.bf16 %v7365_v43 }
 0x3f9   :  { %v2096_v0 = vsub.f32 %v7682_v40, %v2078_v25 }
 0x3fa   :  { %v2066_v63 = vpop.xlane.xlu0 %2065  ;;  %v2100_v41 = vmul.f32 1.442695, %v2083_v14  ;;  %v1494_v61 = vrot.slane %v6350_v58, 4  ;;  %v1497_v43 = vsel %vm406_vm4, %v6350_v58, %v1496_v29 }
 0x3fb   :  { %v2092_v31 = vsub.f32 %v7686_v47, %v2066_v63  ;;  %v7744_v9 = vpop.eup %6422  ;;  %v2126_v2 = vmul.f32 1.442695, %v2096_v0  ;;  %v1505_v60 = vperm.slane %v1497_v43, %v7027_v13 }
 0x3fc   :  { %v2130_v30 = vsel %vm186_vm3, %v7744_v9, 0.0  ;;  %2167 = vadd.xlane.f32.xlu2 %v2166_v19 }
 0x3fd   :  { %v2118_v62 = vmul.f32 1.442695, %v2092_v31  ;;  %v7749_v27 = vpop.eup %6424  ;;  %2131 = vadd.xlane.f32.xlu1 %v2130_v30 }
 0x3fe   :  { %v2157_v47 = vsel %vm186_vm3, %v7749_v27, 0.0  ;;  %v7758_v44 = vpop.eup %6426 }
 0x3ff   :  { %6428 = vpow2.f32 %v2118_v62  ;;  %2158 = vadd.xlane.f32.xlu0 %v2157_v47  ;;  %v2054_v35 = vpop.xlane.xlu1 %2053  ;;  %v2169_v50 = vsel %vm186_vm3, %v7758_v44, 0.0  ;;  %v6335_v62 = vunpack.i.l.bf16 %v7727_v34 }
 0x400   :  { %v2042_v45 = vpop.xlane.xlu2 %2041  ;;  %6430 = vpow2.f32 %v2100_v41  ;;  %v2088_v54 = vsub.f32 %v7694_v20, %v2054_v35 }
 0x401   :  { %v2084_v56 = vsub.f32 %v7698_v6, %v2042_v45  ;;  %6432 = vpow2.f32 %v2108_v53  ;;  %v1495_v6 = vsel %vm406_vm4, %v1494_v61, %v6331_v33 }
 0x402   :  { %v2081_v36 = vpop.xlane.xlu0 %2080  ;;  %v1501_v18 = vperm.slane %v1495_v6, %v7027_v13  ;;  %v2110_v12 = vmul.f32 1.442695, %v2088_v54 }
 0x403   :  { %v2102_v32 = vmul.f32 1.442695, %v2084_v56  ;;  %v2097_v37 = vsub.f32 %v7696_v7, %v2081_v36 }
 0x404   :  { %v1520_v26 = vrot.slane %v1501_v18, 4 }
 0x405   :  { %v7762_v10 = vpop.eup %6428  ;;  %6434 = vpow2.f32 %v2102_v32  ;;  %2170 = vadd.xlane.f32.xlu1 %v2169_v50  ;;  %v2128_v8 = vmul.f32 1.442695, %v2097_v37 }
 0x406   :  { %v2160_v40 = vsel %vm186_vm3, %v7762_v10, 0.0  ;;  %v7778_v1 = vpop.eup %6430  ;;  %6436 = vpow2.f32 %v2126_v2 }
 0x407   :  { %2161 = vadd.xlane.f32.xlu2 %v2160_v40  ;;  %v2069_v51 = vpop.xlane.xlu1 %2068  ;;  %v7782_v5 = vpop.eup %6432  ;;  %v2133_v28 = vsel %vm186_vm3, %v7778_v1, 0.0 }
 0x408   :  { %v2093_v15 = vsub.f32 %v7706_v59, %v2069_v51  ;;  %v7774_v21 = vpop.permute.xlu2 %6353  ;;  %v1532_v59 = vrot.slane %v1505_v60, 4  ;;  %v2145_v42 = vsel %vm186_vm3, %v7782_v5, 0.0 }
 0x409   :  { %v6356_v23 = vunpack.i.h.bf16 %v7774_v21 }
 0x40a   :  { %v7776_v57 = vpop.xlane.xlu0 %2056  ;;  %v2120_v52 = vmul.f32 1.442695, %v2093_v15 }
 0x40b   :  { %v7785_v20 = vpop.eup %6434  ;;  %v1506_v48 = vrot.slane %v6356_v23, 4  ;;  %v1509_v4 = vsel %vm406_vm4, %v6356_v23, %v1508_v39  ;;  %v2089_v0 = vsub.f32 %v7708_v55, %v7776_v57 }
 0x40c   :  { %6438 = vpow2.f32 %v2120_v52  ;;  %v1517_v3 = vperm.slane %v1509_v4, %v7027_v13  ;;  %v2136_v7 = vsel %vm186_vm3, %v7785_v20, 0.0  ;;  %v7798_v14 = vpop.eup %6436 }
 0x40d   :  { %v1507_v11 = vsel %vm406_vm4, %v1506_v48, %v6336_v16  ;;  %2134 = vadd.xlane.f32.xlu1 %v2133_v28  ;;  %2137 = vadd.xlane.f32.xlu0 %v2136_v7  ;;  %6440 = vpow2.f32 %v2110_v12  ;;  %v2172_v56 = vsel %vm186_vm3, %v7798_v14, 0.0  ;;  %v2112_v39 = vmul.f32 1.442695, %v2089_v0  ;;  %v9918_v28 = vld [vmem:[#allocation24_spill] sm:$0xff] }
 0x40e   :  { %v1513_v25 = vperm.slane %v1507_v11, %v7027_v13  ;;  %v1530_v63 = vrot.slane %v1517_v3, 4  ;;  %v1533_v31 = vsel %vm406_vm4, %v1517_v3, %v1532_v59  ;;  %6442 = vpow2.f32 %v2128_v8 }
 0x40f   :  { %2146 = vadd.xlane.f32.xlu2 %v2145_v42  ;;  %v1541_v19 = vperm.slane %v1533_v31, %v7036_v24  ;;  %v1440_v12 = vrot.slane %v6335_v62, 4  ;;  %v6355_v11 = vunpack.i.l.bf16 %v7774_v21 }
 0x410   :  { %v1518_v17 = vrot.slane %v1513_v25, 4  ;;  %v1521_v30 = vsel %vm406_vm4, %v1513_v25, %v1520_v26  ;;  %v1531_v47 = vsel %vm406_vm4, %v1530_v63, %v1505_v60  ;;  %v6340_v26 = vunpack.i.l.bf16 %v9918_v28 }
 0x411   :  { %v1529_v58 = vperm.slane %v1521_v30, %v7036_v24  ;;  %v1537_v41 = vperm.slane %v1531_v47, %v7036_v24  ;;  %v1548_v35 = vrot.slane %v1541_v19, 4 }
 0x412   :  { %v2045_v33 = vpop.xlane.xlu0 %2044  ;;  %v7807_v45 = vpop.eup %6438  ;;  %v1519_v36 = vsel %vm406_vm4, %v1518_v17, %v1501_v18 }
 0x413   :  { %v2085_v53 = vsub.f32 %v7714_v49, %v2045_v33  ;;  %v1525_v29 = vperm.slane %v1519_v36, %v7036_v24  ;;  %v1544_v61 = vrot.slane %v1529_v58, 4  ;;  %v1546_v32 = vrot.slane %v1537_v41, 4  ;;  %v7822_v51 = vpop.eup %6440 }
 0x414   :  { %v1549_v43 = vsel %vm406_vm4, 0.0, %v1548_v35  ;;  %v2163_v49 = vsel %vm186_vm3, %v7807_v45, 0.0  ;;  %v1725_v2 = vsel %vm406_vm4, %v1548_v35, %v1537_v41  ;;  %v7828_v37 = vpop.eup %6442  ;;  %v2148_v8 = vsel %vm186_vm3, %v7822_v51, 0.0 }
 0x415   :  { %v1730_v50 = vrot.slane %v1549_v43, 4  ;;  %v2104_v16 = vmul.f32 1.442695, %v2085_v53  ;;  %v1545_v40 = vsel %vm406_vm4, 0.0, %v1544_v61  ;;  %2164 = vadd.xlane.f32.xlu1 %v2163_v49  ;;  %v1542_v55 = vrot.slane %v1525_v29, 4  ;;  %2173 = vadd.xlane.f32.xlu0 %v2172_v56 }
 0x416   :  { %v1547_v6 = vsel %vm406_vm4, 0.0, %v1546_v32  ;;  %v1714_v60 = vsel %vm406_vm4, %v1544_v61, %v1525_v29  ;;  %v1719_v15 = vrot.slane %v1545_v40, 4  ;;  %v1729_v57 = vperm.slane %v1725_v2, %v7027_v13 }
 0x417   :  { %6444 = vpow2.f32 %v2104_v16  ;;  %v1718_v54 = vperm.slane %v1714_v60, %v7027_v13  ;;  %v1543_v18 = vsel %vm406_vm4, 0.0, %v1542_v55  ;;  %v1731_v23 = vsel %vm406_vm4, %v1730_v50, %v1547_v6 }
 0x418   :  { %v1720_v52 = vsel %vm406_vm4, %v1719_v15, %v1543_v18  ;;  %v1735_v59 = vperm.slane %v1731_v23, %v7027_v13  ;;  %v1750_v4 = vrot.slane %v1729_v57, 4  ;;  %6446 = vpow2.f32 %v2112_v39 }
 0x419   :  { %v1738_v48 = vrot.slane %v1718_v54, 4  ;;  %v1724_v3 = vperm.slane %v1720_v52, %v7027_v13  ;;  %v2175_v17 = vsel %vm186_vm3, %v7828_v37, 0.0  ;;  %v6341_v35 = vunpack.i.h.bf16 %v9918_v28 }
 0x41a   :  { %v1751_v7 = vsel %vm406_vm4, %v1735_v59, %v1750_v4  ;;  %v1748_v42 = vrot.slane %v1735_v59, 4  ;;  %v1438_v53 = vrot.slane %v6355_v11, 4  ;;  %v1384_v56 = vrot.slane %v6340_v26, 4 }
 0x41b   :  { %v1739_v25 = vsel %vm406_vm4, %v1724_v3, %v1738_v48  ;;  %v1759_v63 = vperm.slane %v1751_v7, %v7036_v24  ;;  %v1736_v31 = vrot.slane %v1724_v3, 4  ;;  %v1441_v29 = vsel %vm406_vm4, %v6355_v11, %v1440_v12 }
 0x41c   :  { %v1747_v30 = vperm.slane %v1739_v25, %v7036_v24  ;;  %v1749_v21 = vsel %vm406_vm4, %v1748_v42, %v1729_v57  ;;  %v1439_v6 = vsel %vm406_vm4, %v1438_v53, %v6335_v62  ;;  %v1452_v57 = vrot.slane %v6341_v35, 4 }
 0x41d   :  { %v7842_v19 = vpop.eup %6444  ;;  %2149 = vadd.xlane.f32.xlu1 %v2148_v8  ;;  %v1764_v47 = vrot.slane %v1759_v63, 4  ;;  %v1737_v58 = vsel %vm406_vm4, %v1736_v31, %v1718_v54  ;;  %v1755_v41 = vperm.slane %v1749_v21, %v7036_v24  ;;  %2176 = vadd.xlane.f32.xlu0 %v2175_v17  ;;  %v1449_v39 = vperm.slane %v1441_v29, %v7027_v13 }
 0x41e   :  { %v2139_v33 = vsel %vm186_vm3, %v7842_v19, 0.0  ;;  %v1743_v36 = vperm.slane %v1737_v58, %v7036_v24  ;;  %v1766_v0 = vrot.slane %v1747_v30, 4  ;;  %v7858_v55 = vpop.eup %6446  ;;  %v1445_v62 = vperm.slane %v1439_v6, %v7027_v13 }
 0x41f   :  { %2140 = vadd.xlane.f32.xlu2 %v2139_v33  ;;  %v1765_v61 = vsel %vm406_vm4, %v1764_v47, %v1747_v30  ;;  %v6359_v32 = vpop.permute.xlu1 %6358  ;;  %v1760_v43 = vrot.slane %v1755_v41, 4  ;;  %v2151_v12 = vsel %vm186_vm3, %v7858_v55, 0.0  ;;  %v1476_v25 = vrot.slane %v1449_v39, 4 }
 0x420   :  { %2317 = vmatpush.msra.mxu3 %v1765_v61  ;;  %v6361_v50 = vunpack.i.h.bf16 %v6359_v32  ;;  %v6360_v16 = vunpack.i.l.bf16 %v6359_v32  ;;  %v1767_v49 = vsel %vm406_vm4, %v1759_v63, %v1766_v0  ;;  %v1762_v2 = vrot.slane %v1743_v36, 4 }
 0x421   :  { %v1761_v40 = vsel %vm406_vm4, %v1760_v43, %v1743_v36  ;;  %2358 = vmatpush.msrb.mxu0 %v1767_v49  ;;  %v1464_v58 = vrot.slane %v1445_v62, 4 }
 0x422   :  { %v1382_v60 = vrot.slane %v6361_v50, 4  ;;  %v1385_v54 = vsel %vm406_vm4, %v6361_v50, %v1384_v56  ;;  %2235 = vmatpush.msrb.mxu2 %v1761_v40  ;;  %v1763_v15 = vsel %vm406_vm4, %v1755_v41, %v1762_v2  ;;  %v1396_v59 = vrot.slane %v6360_v16, 4 }
 0x423   :  { %v1393_v18 = vperm.slane %v1385_v54, %v7027_v13  ;;  %2276 = vmatpush.msra.mxu1 %v1763_v15 }
 0x424   :  { %v1383_v52 = vsel %vm406_vm4, %v1382_v60, %v6340_v26 }
 0x425   :  { %v6364_v23 = vpop.permute.xlu0 %6363  ;;  %v1389_v4 = vperm.slane %v1383_v52, %v7027_v13  ;;  %v1420_v42 = vrot.slane %v1393_v18, 4 }
 0x426   :  { %v6366_v48 = vunpack.i.h.bf16 %v6364_v23  ;;  %v6365_v34 = vunpack.i.l.bf16 %v6364_v23 }
 0x427   :  { %2152 = vadd.xlane.f32.xlu2 %v2151_v12  ;;  %v1408_v63 = vrot.slane %v1389_v4, 4 }
 0x428   :  { %v1394_v3 = vrot.slane %v6366_v48, 4  ;;  %v1397_v28 = vsel %vm406_vm4, %v6366_v48, %v1396_v59  ;;  %v1450_v11 = vrot.slane %v6365_v34, 4  ;;  %v1453_v7 = vsel %vm406_vm4, %v6365_v34, %v1452_v57 }
 0x429   :  { %v1405_v26 = vperm.slane %v1397_v28, %v7027_v13  ;;  %v1461_v8 = vperm.slane %v1453_v7, %v7027_v13 }
 0x42a   :  { %v1395_v31 = vsel %vm406_vm4, %v1394_v3, %v6360_v16  ;;  %v1451_v17 = vsel %vm406_vm4, %v1450_v11, %v6341_v35 }
 0x42b   :  { %v1401_v30 = vperm.slane %v1395_v31, %v7027_v13  ;;  %v1418_v21 = vrot.slane %v1405_v26, 4  ;;  %v1421_v47 = vsel %vm406_vm4, %v1405_v26, %v1420_v42  ;;  %v1457_v33 = vperm.slane %v1451_v17, %v7027_v13 }
 0x42c   :  { %v1429_v41 = vperm.slane %v1421_v47, %v7036_v24  ;;  %v1474_v53 = vrot.slane %v1461_v8, 4  ;;  %v1477_v36 = vsel %vm406_vm4, %v1461_v8, %v1476_v25 }
 0x42d   :  { %v1406_v0 = vrot.slane %v1401_v30, 4  ;;  %v1409_v56 = vsel %vm406_vm4, %v1401_v30, %v1408_v63  ;;  %v1419_v29 = vsel %vm406_vm4, %v1418_v21, %v1393_v18  ;;  %v1462_v61 = vrot.slane %v1457_v33, 4 }
 0x42e   :  { %v1417_v35 = vperm.slane %v1409_v56, %v7036_v24  ;;  %v1425_v32 = vperm.slane %v1419_v29, %v7036_v24  ;;  %v1436_v43 = vrot.slane %v1429_v41, 4  ;;  %v1465_v50 = vsel %vm406_vm4, %v1457_v33, %v1464_v58 }
 0x42f   :  { %v1407_v16 = vsel %vm406_vm4, %v1406_v0, %v1389_v4  ;;  %v1463_v49 = vsel %vm406_vm4, %v1462_v61, %v1445_v62  ;;  %v1473_v2 = vperm.slane %v1465_v50, %v7036_v24  ;;  %v1475_v40 = vsel %vm406_vm4, %v1474_v53, %v1449_v39 }
 0x430   :  { %v1413_v6 = vperm.slane %v1407_v16, %v7036_v24  ;;  %v1432_v60 = vrot.slane %v1417_v35, 4  ;;  %v1434_v54 = vrot.slane %v1425_v32, 4  ;;  %v1437_v15 = vsel %vm406_vm4, 0.0, %v1436_v43 }
 0x431   :  { %v1622_v57 = vrot.slane %v1437_v15, 4  ;;  %v1469_v18 = vperm.slane %v1463_v49, %v7036_v24  ;;  %v1481_v23 = vperm.slane %v1475_v40, %v7036_v24  ;;  %v1485_v52 = vperm.slane %v1477_v36, %v7036_v24 }
 0x432   :  { %v1433_v59 = vsel %vm406_vm4, 0.0, %v1432_v60  ;;  %v1488_v48 = vrot.slane %v1473_v2, 4  ;;  %v1430_v34 = vrot.slane %v1413_v6, 4  ;;  %v1435_v62 = vsel %vm406_vm4, 0.0, %v1434_v54 }
 0x433   :  { %v1490_v39 = vrot.slane %v1481_v23, 4  ;;  %v1492_v4 = vrot.slane %v1485_v52, 4  ;;  %v1486_v12 = vrot.slane %v1469_v18, 4  ;;  %v1606_v3 = vsel %vm406_vm4, %v1432_v60, %v1413_v6 }
 0x434   :  { %v1489_v28 = vsel %vm406_vm4, 0.0, %v1488_v48  ;;  %v1660_v11 = vsel %vm406_vm4, %v1488_v48, %v1469_v18  ;;  %v1431_v7 = vsel %vm406_vm4, 0.0, %v1430_v34  ;;  %v1610_v42 = vperm.slane %v1606_v3, %v7027_v13 }
 0x435   :  { %v1493_v26 = vsel %vm406_vm4, 0.0, %v1492_v4  ;;  %v1487_v8 = vsel %vm406_vm4, 0.0, %v1486_v12  ;;  %v1491_v25 = vsel %vm406_vm4, 0.0, %v1490_v39  ;;  %v1664_v63 = vperm.slane %v1660_v11, %v7027_v13 }
 0x436   :  { %v1676_v31 = vrot.slane %v1493_v26, 4  ;;  %v1665_v17 = vrot.slane %v1489_v28, 4  ;;  %v1671_v30 = vsel %vm406_vm4, %v1492_v4, %v1481_v23  ;;  %v1611_v21 = vrot.slane %v1433_v59, 4 }
 0x437   :  { %v1675_v47 = vperm.slane %v1671_v30, %v7027_v13  ;;  %v1684_v33 = vrot.slane %v1664_v63, 4  ;;  %v1617_v58 = vsel %vm406_vm4, %v1436_v43, %v1425_v32  ;;  %v1623_v41 = vsel %vm406_vm4, %v1622_v57, %v1435_v62 }
 0x438   :  { %v1666_v53 = vsel %vm406_vm4, %v1665_v17, %v1487_v8  ;;  %v1677_v36 = vsel %vm406_vm4, %v1676_v31, %v1491_v25  ;;  %v1612_v0 = vsel %vm406_vm4, %v1611_v21, %v1431_v7  ;;  %v1621_v56 = vperm.slane %v1617_v58, %v7027_v13 }
 0x439   :  { %v1670_v29 = vperm.slane %v1666_v53, %v7027_v13  ;;  %v1681_v61 = vperm.slane %v1677_v36, %v7027_v13  ;;  %v1696_v35 = vrot.slane %v1675_v47, 4  ;;  %v1616_v50 = vperm.slane %v1612_v0, %v7027_v13 }
 0x43a   :  { %v1627_v16 = vperm.slane %v1623_v41, %v7027_v13  ;;  %v1630_v32 = vrot.slane %v1610_v42, 4  ;;  %v1642_v43 = vrot.slane %v1621_v56, 4 }
 0x43b   :  { %v1685_v49 = vsel %vm406_vm4, %v1670_v29, %v1684_v33  ;;  %v1697_v2 = vsel %vm406_vm4, %v1681_v61, %v1696_v35  ;;  %v1682_v40 = vrot.slane %v1670_v29, 4  ;;  %v1694_v6 = vrot.slane %v1681_v61, 4 }
 0x43c   :  { %v1693_v60 = vperm.slane %v1685_v49, %v7036_v24  ;;  %v1705_v54 = vperm.slane %v1697_v2, %v7036_v24  ;;  %v1631_v15 = vsel %vm406_vm4, %v1616_v50, %v1630_v32  ;;  %v1643_v57 = vsel %vm406_vm4, %v1627_v16, %v1642_v43 }
 0x43d   :  { %v1683_v18 = vsel %vm406_vm4, %v1682_v40, %v1664_v63  ;;  %v1695_v23 = vsel %vm406_vm4, %v1694_v6, %v1675_v47  ;;  %v1639_v52 = vperm.slane %v1631_v15, %v7036_v24  ;;  %v1651_v59 = vperm.slane %v1643_v57, %v7036_v24 }
 0x43e   :  { %v1710_v48 = vrot.slane %v1705_v54, 4  ;;  %v1689_v34 = vperm.slane %v1683_v18, %v7036_v24  ;;  %v1701_v62 = vperm.slane %v1695_v23, %v7036_v24  ;;  %v1712_v39 = vrot.slane %v1693_v60, 4 }
 0x43f   :  { %v1656_v4 = vrot.slane %v1651_v59, 4  ;;  %v1628_v12 = vrot.slane %v1616_v50, 4  ;;  %v1640_v3 = vrot.slane %v1627_v16, 4  ;;  %v1658_v28 = vrot.slane %v1639_v52, 4 }
 0x440   :  { %v1711_v11 = vsel %vm406_vm4, %v1710_v48, %v1693_v60  ;;  %v1706_v7 = vrot.slane %v1701_v62, 4  ;;  %v1713_v26 = vsel %vm406_vm4, %v1705_v54, %v1712_v39  ;;  %v1708_v8 = vrot.slane %v1689_v34, 4 }
 0x441   :  { %2318 = vmatpush.msra.mxu3 %v1711_v11  ;;  %v1657_v25 = vsel %vm406_vm4, %v1656_v4, %v1639_v52  ;;  %2359 = vmatpush.msrb.mxu0 %v1713_v26  ;;  %v1629_v63 = vsel %vm406_vm4, %v1628_v12, %v1610_v42  ;;  %v1641_v31 = vsel %vm406_vm4, %v1640_v3, %v1621_v56 }
 0x442   :  { %v1707_v17 = vsel %vm406_vm4, %v1706_v7, %v1689_v34  ;;  %v1635_v30 = vperm.slane %v1629_v63, %v7036_v24  ;;  %v1647_v21 = vperm.slane %v1641_v31, %v7036_v24  ;;  %v1709_v47 = vsel %vm406_vm4, %v1701_v62, %v1708_v8 }
 0x443   :  { %2236 = vmatpush.msrb.mxu2 %v1707_v17  ;;  %2319 = vmatpush.msra.mxu3 %v1657_v25  ;;  %v1659_v33 = vsel %vm406_vm4, %v1651_v59, %v1658_v28 }
 0x444   :  { %v1652_v58 = vrot.slane %v1647_v21, 4  ;;  %2277 = vmatpush.msra.mxu1 %v1709_v47  ;;  %2360 = vmatpush.msrb.mxu0 %v1659_v33  ;;  %v1654_v41 = vrot.slane %v1635_v30, 4 }
 0x446   :  { %v1653_v42 = vsel %vm406_vm4, %v1652_v58, %v1635_v30  ;;  %v1655_v53 = vsel %vm406_vm4, %v1647_v21, %v1654_v41 }
 0x447   :  { %2237 = vmatpush.msrb.mxu2 %v1653_v42  ;;  %2278 = vmatpush.msra.mxu1 %v1655_v53 }
 0x467   :  { %v2156_v36 = vpop.xlane.xlu2 %2155 }
 0x468   :  { %6448 = vrcp.f32 %v2156_v36  ;;  %v2144_v0 = vpop.xlane.xlu0 %2143 }
 0x469   :  { %6450 = vrcp.f32 %v2144_v0 }
 0x46e   :  { %v6449_v56 = vpop.eup %6448 }
 0x46f   :  { %v6451_v29 = vpop.eup %6450  ;;  %v2202_v61 = vmul.f32 %v6449_v56, %v7732_v38  ;;  %v2168_v35 = vpop.xlane.xlu2 %2167 }
 0x470   :  { %v2198_v50 = vmul.f32 %v6451_v29, %v7734_v46  ;;  %v2132_v16 = vpop.xlane.xlu1 %2131  ;;  %6452 = vrcp.f32 %v2168_v35 }
 0x471   :  { %6454 = vrcp.f32 %v2132_v16  ;;  %6199 = vmatmul.msk.f32.vlgmr.msra.gmra.mxu3 %vm186_vm3, %v2202_v61 }
 0x472   :  { %v2159_v32 = vpop.xlane.xlu0 %2158  ;;  %6195 = vmatmul.msk.f32.vlgmr.msra.gmra.mxu1 %vm186_vm3, %v2198_v50 }
 0x473   :  { %6456 = vrcp.f32 %v2159_v32 }
 0x476   :  { %v6453_v43 = vpop.eup %6452 }
 0x477   :  { %v6455_v49 = vpop.eup %6454  ;;  %v2206_v2 = vmul.f32 %v6453_v43, %v7741_v22 }
 0x478   :  { %v2194_v6 = vmul.f32 %v6455_v49, %v7744_v9  ;;  %v2171_v38 = vpop.xlane.xlu1 %2170 }
 0x479   :  { %v6457_v40 = vpop.eup %6456  ;;  %6458 = vrcp.f32 %v2171_v38  ;;  %6203 = vmatmul.msk.f32.vlgmr.msrb.gmra.mxu0 %vm186_vm3, %v2206_v2 }
 0x47a   :  { %v2162_v60 = vpop.xlane.xlu2 %2161  ;;  %v2203_v46 = vmul.f32 %v6457_v40, %v7749_v27  ;;  %6191 = vmatmul.msk.f32.vlgmr.msrb.gmra.mxu2 %vm186_vm3, %v2194_v6 }
 0x47b   :  { %6460 = vrcp.f32 %v2162_v60 }
 0x47c   :  { %6200 = vmatmul.msk.f32.gmra.mxu3 %vm186_vm3, %v2203_v46 }
 0x47f   :  { %v6459_v54 = vpop.eup %6458 }
 0x480   :  { %v2135_v57 = vpop.xlane.xlu1 %2134  ;;  %v2207_v22 = vmul.f32 %v6459_v54, %v7758_v44  ;;  %v2138_v18 = vpop.xlane.xlu0 %2137 }
 0x481   :  { %v6461_v15 = vpop.eup %6460  ;;  %6462 = vrcp.f32 %v2135_v57 }
 0x482   :  { %v2147_v9 = vpop.xlane.xlu2 %2146  ;;  %v2204_v23 = vmul.f32 %v6461_v15, %v7762_v10  ;;  %6204 = vmatmul.msk.f32.gmra.mxu0 %vm186_vm3, %v2207_v22 }
 0x483   :  { %6464 = vrcp.f32 %v2147_v9 }
 0x484   :  { %6201 = vmatmul.msk.f32.gmra.mxu3 %vm186_vm3, %v2204_v23  ;;  %6466 = vrcp.f32 %v2138_v18 }
 0x487   :  { %v6463_v27 = vpop.eup %6462 }
 0x488   :  { %v2165_v52 = vpop.xlane.xlu1 %2164  ;;  %v2195_v59 = vmul.f32 %v6463_v27, %v7778_v1  ;;  %v2174_v34 = vpop.xlane.xlu0 %2173 }
 0x489   :  { %v6465_v48 = vpop.eup %6464  ;;  %6468 = vrcp.f32 %v2165_v52 }
 0x48a   :  { %6470 = vrcp.f32 %v2174_v34  ;;  %6192 = vmatmul.msk.f32.gmra.mxu2 %vm186_vm3, %v2195_v59  ;;  %v2199_v44 = vmul.f32 %v6465_v48, %v7782_v5  ;;  %v6467_v10 = vpop.eup %6466 }
 0x48b   :  { %v2196_v12 = vmul.f32 %v6467_v10, %v7785_v20 }
 0x48c   :  { %6196 = vmatmul.msk.f32.gmra.mxu1 %vm186_vm3, %v2199_v44 }
 0x48f   :  { %v6469_v62 = vpop.eup %6468 }
 0x490   :  { %v6471_v39 = vpop.eup %6470  ;;  %v2150_v4 = vpop.xlane.xlu1 %2149  ;;  %v2205_v3 = vmul.f32 %v6469_v62, %v7807_v45 }
 0x491   :  { %6472 = vrcp.f32 %v2150_v4  ;;  %v2177_v1 = vpop.xlane.xlu0 %2176  ;;  %v2208_v11 = vmul.f32 %v6471_v39, %v7798_v14 }
 0x492   :  { %v2141_v28 = vpop.xlane.xlu2 %2140  ;;  %6474 = vrcp.f32 %v2177_v1  ;;  %6193 = vmatmul.msk.f32.gmra.mxu2 %vm186_vm3, %v2196_v12  ;;  %6202 = vmatmul.msk.f32.gmra.mxu3 %vm186_vm3, %v2205_v3 }
 0x493   :  { %6476 = vrcp.f32 %v2141_v28  ;;  %6205 = vmatmul.msk.f32.gmra.mxu0 %vm186_vm3, %v2208_v11 }
 0x497   :  { %v6473_v5 = vpop.eup %6472 }
 0x498   :  { %v6475_v7 = vpop.eup %6474  ;;  %v2200_v26 = vmul.f32 %v6473_v5, %v7822_v51 }
 0x499   :  { %v6477_v20 = vpop.eup %6476  ;;  %v2209_v45 = vmul.f32 %v6475_v7, %v7828_v37 }
 0x49a   :  { %v2153_v8 = vpop.xlane.xlu2 %2152  ;;  %6197 = vmatmul.msk.f32.gmra.mxu1 %vm186_vm3, %v2200_v26  ;;  %v2197_v14 = vmul.f32 %v6477_v20, %v7842_v19 }
 0x49b   :  { %6478 = vrcp.f32 %v2153_v8  ;;  %6206 = vmatmul.msk.f32.gmra.mxu0 %vm186_vm3, %v2209_v45 }
 0x49c   :  { %6194 = vmatmul.msk.f32.gmra.mxu2 %vm186_vm3, %v2197_v14 }
 0x4a1   :  { %v6479_v25 = vpop.eup %6478 }
 0x4a2   :  { %v2201_v63 = vmul.f32 %v6479_v25, %v7858_v55 }
 0x4a4   :  { %6198 = vmatmul.msk.f32.gmra.mxu1 %vm186_vm3, %v2201_v63 }
 0x4ef   :  { %v2280_v31 = vpop.f32.mrf.mxu1 }
 0x4f0   :  { %v2388_v30 = vrot.slane %v2280_v31, 4 }
 0x4f4   :  { %v2321_v21 = vpop.f32.mrf.mxu3 }
 0x4f5   :  { %v2374_v33 = vrot.slane %v2321_v21, 4 }
 0x4f6   :  { %v2362_v51 = vpop.f32.mrf.mxu0 }
 0x4f7   :  { %v2386_v17 = vrot.slane %v2362_v51, 4  ;;  %v2389_v47 = vsel %vm406_vm4, %v2362_v51, %v2388_v30 }
 0x4f8   :  { %v2397_v58 = vperm.slane %v2389_v47, %v7027_v13 }
 0x4f9   :  { %v2387_v37 = vsel %vm406_vm4, %v2386_v17, %v2280_v31 }
 0x4fa   :  { %v2393_v19 = vperm.slane %v2387_v37, %v7027_v13  ;;  %v2410_v29 = vrot.slane %v2397_v58, 4 }
 0x4fc   :  { %v2398_v53 = vrot.slane %v2393_v19, 4 }
 0x4fd   :  { %v2239_v41 = vpop.f32.mrf.mxu2 }
 0x4fe   :  { %v2375_v42 = vsel %vm406_vm4, %v2374_v33, %v2239_v41  ;;  %v2376_v55 = vrot.slane %v2239_v41, 4 }
 0x4ff   :  { %v2381_v36 = vperm.slane %v2375_v42, %v7027_v13  ;;  %v2324_v56 = vpop.f32.mrf.mxu3  ;;  %v2365_v6 = vpop.f32.mrf.mxu0 }
 0x500   :  { %v2377_v0 = vsel %vm406_vm4, %v2321_v21, %v2376_v55  ;;  %v2442_v15 = vrot.slane %v2365_v6, 4  ;;  %v2430_v59 = vrot.slane %v2324_v56, 4 }
 0x501   :  { %v2385_v61 = vperm.slane %v2377_v0, %v7027_v13  ;;  %v2399_v35 = vsel %vm406_vm4, %v2398_v53, %v2381_v36  ;;  %v2400_v50 = vrot.slane %v2381_v36, 4 }
 0x502   :  { %v2405_v16 = vperm.slane %v2399_v35, %v7036_v24 }
 0x503   :  { %v2401_v32 = vsel %vm406_vm4, %v2393_v19, %v2400_v50  ;;  %v2411_v43 = vsel %vm406_vm4, %v2410_v29, %v2385_v61  ;;  %v2412_v49 = vrot.slane %v2385_v61, 4 }
 0x504   :  { %v2409_v2 = vperm.slane %v2401_v32, %v7036_v24  ;;  %v2417_v40 = vperm.slane %v2411_v43, %v7036_v24  ;;  %v2422_v60 = vrot.slane %v2405_v16, 4 }
 0x505   :  { %v2413_v38 = vsel %vm406_vm4, %v2397_v58, %v2412_v49 }
 0x506   :  { %v2421_v46 = vperm.slane %v2413_v38, %v7036_v24  ;;  %v2424_v54 = vrot.slane %v2409_v2, 4  ;;  %v2426_v22 = vrot.slane %v2417_v40, 4  ;;  %v2423_v23 = vsel %vm406_vm4, 0.0, %v2422_v60 }
 0x507   :  { %v7997_v44 = vpop.f32.mrf.mxu3 }
 0x508   :  { %v2425_v57 = vsel %vm406_vm4, 0.0, %v2424_v54  ;;  %v2428_v18 = vrot.slane %v2421_v46, 4  ;;  %v2598_v9 = vsel %vm406_vm4, %v2424_v54, %v2405_v16  ;;  %v2427_v11 = vsel %vm406_vm4, 0.0, %v2426_v22 }
 0x509   :  { %v2602_v27 = vperm.slane %v2598_v9, %v7027_v13  ;;  %v2603_v52 = vrot.slane %v2425_v57, 4  ;;  %v2283_v48 = vpop.f32.mrf.mxu1  ;;  %v2486_v26 = vrot.slane %v7997_v44, 4 }
 0x50a   :  { %v2429_v34 = vsel %vm406_vm4, 0.0, %v2428_v18  ;;  %v2443_v10 = vsel %vm406_vm4, %v2442_v15, %v2283_v48  ;;  %v2444_v62 = vrot.slane %v2283_v48, 4  ;;  %v2609_v39 = vsel %vm406_vm4, %v2428_v18, %v2417_v40 }
 0x50b   :  { %v2604_v4 = vsel %vm406_vm4, %v2603_v52, %v2423_v23  ;;  %v2449_v12 = vperm.slane %v2443_v10, %v7027_v13  ;;  %v2613_v3 = vperm.slane %v2609_v39, %v7027_v13  ;;  %v2614_v1 = vrot.slane %v2429_v34, 4 }
 0x50c   :  { %v2445_v28 = vsel %vm406_vm4, %v2365_v6, %v2444_v62  ;;  %v2608_v5 = vperm.slane %v2604_v4, %v7027_v13  ;;  %v2622_v7 = vrot.slane %v2602_v27, 4 }
 0x50d   :  { %v2453_v20 = vperm.slane %v2445_v28, %v7027_v13  ;;  %v2242_v8 = vpop.f32.mrf.mxu2  ;;  %v2615_v45 = vsel %vm406_vm4, %v2614_v1, %v2427_v11  ;;  %v2634_v14 = vrot.slane %v2613_v3, 4  ;;  %v2454_v17 = vrot.slane %v2449_v12, 4 }
 0x50e   :  { %v2431_v25 = vsel %vm406_vm4, %v2430_v59, %v2242_v8  ;;  %v2432_v63 = vrot.slane %v2242_v8, 4  ;;  %v2619_v31 = vperm.slane %v2615_v45, %v7027_v13  ;;  %v2623_v51 = vsel %vm406_vm4, %v2608_v5, %v2622_v7 }
 0x50f   :  { %v2437_v30 = vperm.slane %v2431_v25, %v7027_v13  ;;  %v2631_v21 = vperm.slane %v2623_v51, %v7036_v24  ;;  %v2620_v37 = vrot.slane %v2608_v5, 4  ;;  %v2466_v47 = vrot.slane %v2453_v20, 4 }
 0x510   :  { %v2433_v19 = vsel %vm406_vm4, %v2324_v56, %v2432_v63  ;;  %v2368_v33 = vpop.f32.mrf.mxu0  ;;  %v2635_v58 = vsel %vm406_vm4, %v2619_v31, %v2634_v14  ;;  %v2632_v41 = vrot.slane %v2619_v31, 4 }
 0x511   :  { %v2441_v42 = vperm.slane %v2433_v19, %v7027_v13  ;;  %v2455_v55 = vsel %vm406_vm4, %v2454_v17, %v2437_v30  ;;  %v2456_v53 = vrot.slane %v2437_v30, 4  ;;  %v2498_v36 = vrot.slane %v2368_v33, 4 }
 0x512   :  { %v2461_v0 = vperm.slane %v2455_v55, %v7036_v24  ;;  %v2643_v29 = vperm.slane %v2635_v58, %v7036_v24  ;;  %v2650_v61 = vrot.slane %v2631_v21, 4  ;;  %v2621_v35 = vsel %vm406_vm4, %v2620_v37, %v2602_v27 }
 0x513   :  { %v2457_v50 = vsel %vm406_vm4, %v2449_v12, %v2456_v53  ;;  %v2467_v56 = vsel %vm406_vm4, %v2466_v47, %v2441_v42  ;;  %v2468_v16 = vrot.slane %v2441_v42, 4  ;;  %v8025_v32 = vperm.slane %v2621_v35, %v7036_v24 }
 0x514   :  { %v2465_v43 = vperm.slane %v2457_v50, %v7036_v24  ;;  %v2473_v49 = vperm.slane %v2467_v56, %v7036_v24  ;;  %v2478_v2 = vrot.slane %v2461_v0, 4  ;;  %v2651_v40 = vsel %vm406_vm4, %v2643_v29, %v2650_v61 }
 0x515   :  { %v2469_v6 = vsel %vm406_vm4, %v2453_v20, %v2468_v16  ;;  %2850 = vrot.lane.b32.xlu2 %v2651_v40, %s6740_s2  ;;  %v2245_v38 = vpop.f32.mrf.mxu2  ;;  %v8032_v60 = vpop.f32.mrf.mxu3  ;;  %v2648_v46 = vrot.slane %v2643_v29, 4  ;;  %v2633_v54 = vsel %vm406_vm4, %v2632_v41, %v2613_v3  ;;  %v2646_v15 = vrot.slane %v8025_v32, 4 }
 0x516   :  { %v2477_v57 = vperm.slane %v2469_v6, %v7036_v24  ;;  %v2479_v22 = vsel %vm406_vm4, 0.0, %v2478_v2  ;;  %v2480_v18 = vrot.slane %v2465_v43, 4  ;;  %v2482_v9 = vrot.slane %v2473_v49, 4 }
 0x517   :  { %v2487_v23 = vsel %vm406_vm4, %v2486_v26, %v2245_v38  ;;  %v2488_v27 = vrot.slane %v2245_v38, 4  ;;  %v2542_v52 = vrot.slane %v8032_v60, 4  ;;  %v2649_v59 = vsel %vm406_vm4, %v2648_v46, %v2631_v21  ;;  %v2286_v48 = vpop.f32.mrf.mxu1 }
 0x518   :  { %v2481_v34 = vsel %vm406_vm4, 0.0, %v2480_v18  ;;  %v2484_v10 = vrot.slane %v2477_v57, 4  ;;  %v2652_v62 = vsel %vm406_vm4, %v2480_v18, %v2461_v0  ;;  %v2493_v39 = vperm.slane %v2487_v23, %v7027_v13  ;;  %2834 = vrot.lane.b32.xlu0 %v2649_v59, %s6741_s8  ;;  %v2371_v28 = vpop.f32.mrf.mxu0 }
 0x519   :  { %v8046_v4 = vperm.slane %v2652_v62, %v7027_v13  ;;  %v2657_v12 = vrot.slane %v2481_v34, 4  ;;  %v2489_v3 = vsel %vm406_vm4, %v7997_v44, %v2488_v27  ;;  %v8051_v1 = vperm.slane %v2633_v54, %v7036_v24 }
 0x51a   :  { %v2485_v11 = vsel %vm406_vm4, 0.0, %v2484_v10  ;;  %v2497_v5 = vperm.slane %v2489_v3, %v7027_v13  ;;  %v2512_v7 = vrot.slane %v2493_v39, 4  ;;  %v2499_v26 = vsel %vm406_vm4, %v2498_v36, %v2286_v48 }
 0x51b   :  { %v2658_v20 = vsel %vm406_vm4, %v2657_v12, %v2479_v22  ;;  %v2644_v8 = vrot.slane %v8051_v1, 4  ;;  %v2647_v45 = vsel %vm406_vm4, %v8051_v1, %v2646_v15  ;;  %v2500_v14 = vrot.slane %v2286_v48, 4 }
 0x51c   :  { %v2524_v44 = vrot.slane %v2497_v5, 4  ;;  %2818 = vrot.lane.b32.xlu1 %v2647_v45, %s6730_s9  ;;  %v2505_v25 = vperm.slane %v2499_v26, %v7027_v13  ;;  %v2554_v63 = vrot.slane %v2371_v28, 4  ;;  %v2483_v31 = vsel %vm406_vm4, 0.0, %v2482_v9 }
 0x51d   :  { %v2501_v51 = vsel %vm406_vm4, %v2368_v33, %v2500_v14  ;;  %v2662_v17 = vperm.slane %v2658_v20, %v7027_v13  ;;  %v2663_v30 = vsel %vm406_vm4, %v2484_v10, %v2473_v49  ;;  %v2668_v21 = vrot.slane %v2485_v11, 4 }
 0x51e   :  { %v2509_v37 = vperm.slane %v2501_v51, %v7027_v13  ;;  %v2510_v47 = vrot.slane %v2505_v25, 4  ;;  %v2513_v19 = vsel %vm406_vm4, %v2505_v25, %v2512_v7  ;;  %v8069_v58 = vperm.slane %v2663_v30, %v7027_v13 }
 0x51f   :  { %v2521_v41 = vperm.slane %v2513_v19, %v7036_v24  ;;  %v2248_v42 = vpop.f32.mrf.mxu2  ;;  %v2669_v55 = vsel %vm406_vm4, %v2668_v21, %v2483_v31  ;;  %v2676_v33 = vrot.slane %v8046_v4, 4  ;;  %v2674_v53 = vrot.slane %v2662_v17, 4 }
 0x520   :  { %v2511_v36 = vsel %vm406_vm4, %v2510_v47, %v2493_v39  ;;  %v2522_v0 = vrot.slane %v2509_v37, 4  ;;  %v2525_v29 = vsel %vm406_vm4, %v2509_v37, %v2524_v44  ;;  %v2543_v61 = vsel %vm406_vm4, %v2542_v52, %v2248_v42 }
 0x521   :  { %v2289_v35 = vpop.f32.mrf.mxu1  ;;  %v2517_v50 = vperm.slane %v2511_v36, %v7036_v24  ;;  %v2533_v56 = vperm.slane %v2525_v29, %v7036_v24  ;;  %v2536_v16 = vrot.slane %v2521_v41, 4  ;;  %v2544_v43 = vrot.slane %v2248_v42, 4 }
 0x522   :  { %v2523_v49 = vsel %vm406_vm4, %v2522_v0, %v2497_v5  ;;  %v2549_v2 = vperm.slane %v2543_v61, %v7027_v13  ;;  %v2555_v40 = vsel %vm406_vm4, %v2554_v63, %v2289_v35  ;;  %v2556_v6 = vrot.slane %v2289_v35, 4 }
 0x523   :  { %v2529_v38 = vperm.slane %v2523_v49, %v7036_v24  ;;  %v2534_v46 = vrot.slane %v2517_v50, 4  ;;  %v2537_v54 = vsel %vm406_vm4, 0.0, %v2536_v16  ;;  %v2540_v15 = vrot.slane %v2533_v56, 4 }
 0x524   :  { %v2706_v57 = vsel %vm406_vm4, %v2536_v16, %v2517_v50  ;;  %v2711_v22 = vrot.slane %v2537_v54, 4  ;;  %v2545_v18 = vsel %vm406_vm4, %v8032_v60, %v2544_v43  ;;  %v2568_v9 = vrot.slane %v2549_v2, 4 }
 0x525   :  { %v2535_v23 = vsel %vm406_vm4, 0.0, %v2534_v46  ;;  %v2538_v27 = vrot.slane %v2529_v38, 4  ;;  %v2541_v52 = vsel %vm406_vm4, 0.0, %v2540_v15  ;;  %v8090_v59 = vperm.slane %v2706_v57, %v7027_v13 }
 0x526   :  { %v2722_v48 = vrot.slane %v2541_v52, 4  ;;  %v2553_v34 = vperm.slane %v2545_v18, %v7027_v13  ;;  %v2557_v10 = vsel %vm406_vm4, %v2371_v28, %v2556_v6  ;;  %v2561_v62 = vperm.slane %v2555_v40, %v7027_v13 }
 0x527   :  { %v2565_v39 = vperm.slane %v2557_v10, %v7027_v13  ;;  %v2673_v60 = vperm.slane %v2669_v55, %v7027_v13  ;;  %v2677_v12 = vsel %vm406_vm4, %v2662_v17, %v2676_v33  ;;  %v2688_v3 = vrot.slane %v8069_v58, 4 }
 0x528   :  { %v2580_v11 = vrot.slane %v2553_v34, 4  ;;  %v2566_v5 = vrot.slane %v2561_v62, 4  ;;  %v2569_v7 = vsel %vm406_vm4, %v2561_v62, %v2568_v9  ;;  %v2685_v26 = vperm.slane %v2677_v12, %v7036_v24 }
 0x529   :  { %v2577_v20 = vperm.slane %v2569_v7, %v7036_v24  ;;  %v2578_v45 = vrot.slane %v2565_v39, 4  ;;  %v2689_v28 = vsel %vm406_vm4, %v2673_v60, %v2688_v3  ;;  %v2675_v14 = vsel %vm406_vm4, %v2674_v53, %v8046_v4 }
 0x52a   :  { %v2567_v44 = vsel %vm406_vm4, %v2566_v5, %v2549_v2  ;;  %v2581_v25 = vsel %vm406_vm4, %v2565_v39, %v2580_v11  ;;  %v2697_v63 = vperm.slane %v2689_v28, %v7036_v24  ;;  %v2704_v31 = vrot.slane %v2685_v26, 4 }
 0x52b   :  { %v2573_v51 = vperm.slane %v2567_v44, %v7036_v24  ;;  %v2579_v17 = vsel %vm406_vm4, %v2578_v45, %v2553_v34  ;;  %v2589_v30 = vperm.slane %v2581_v25, %v7036_v24  ;;  %v2592_v21 = vrot.slane %v2577_v20, 4 }
 0x52c   :  { %v2585_v37 = vperm.slane %v2579_v17, %v7036_v24  ;;  %v2705_v47 = vsel %vm406_vm4, %v2697_v63, %v2704_v31  ;;  %v2702_v19 = vrot.slane %v2697_v63, 4  ;;  %v8114_v4 = vperm.slane %v2675_v14, %v7036_v24 }
 0x52d   :  { %v2590_v41 = vrot.slane %v2573_v51, 4  ;;  %v2593_v42 = vsel %vm406_vm4, 0.0, %v2592_v21  ;;  %v2596_v55 = vrot.slane %v2589_v30, 4  ;;  %v2760_v33 = vsel %vm406_vm4, %v2592_v21, %v2573_v51  ;;  %2852 = vrot.lane.b32.xlu2 %v2705_v47, %s6740_s2 }
 0x52e   :  { %v2594_v53 = vrot.slane %v2585_v37, 4  ;;  %v2764_v36 = vperm.slane %v2760_v33, %v7027_v13  ;;  %v2765_v0 = vrot.slane %v2593_v42, 4  ;;  %v2703_v29 = vsel %vm406_vm4, %v2702_v19, %v2685_v26 }
 0x52f   :  { %v2591_v61 = vsel %vm406_vm4, 0.0, %v2590_v41  ;;  %v2597_v35 = vsel %vm406_vm4, 0.0, %v2596_v55  ;;  %2836 = vrot.lane.b32.xlu1 %v2703_v29, %s6741_s8  ;;  %v2686_v50 = vrot.slane %v2673_v60, 4  ;;  %v2700_v56 = vrot.slane %v8114_v4, 4 }
 0x530   :  { %v2776_v16 = vrot.slane %v2597_v35, 4  ;;  %v2539_v43 = vsel %vm406_vm4, 0.0, %v2538_v27  ;;  %v2712_v49 = vsel %vm406_vm4, %v2711_v22, %v2535_v23  ;;  %v2717_v2 = vsel %vm406_vm4, %v2540_v15, %v2529_v38 }
 0x531   :  { %v2687_v40 = vsel %vm406_vm4, %v2686_v50, %v8069_v58  ;;  %v2716_v6 = vperm.slane %v2712_v49, %v7027_v13  ;;  %v2721_v46 = vperm.slane %v2717_v2, %v7027_v13  ;;  %v2723_v54 = vsel %vm406_vm4, %v2722_v48, %v2539_v43  ;;  %v304_v43 = vld [vmem:[%s9854_s12 + $0x8] sm:$0xff]  ;;  %v303_v49 = vld [vmem:[%s9854_s12] sm:$0xff] }
 0x532   :  { %v2693_v57 = vperm.slane %v2687_v40, %v7036_v24  ;;  %v2727_v18 = vperm.slane %v2723_v54, %v7027_v13  ;;  %v2730_v9 = vrot.slane %v8090_v59, 4  ;;  %v2595_v27 = vsel %vm406_vm4, 0.0, %v2594_v53 }
 0x533   :  { %v2742_v22 = vrot.slane %v2721_v46, 4  ;;  %v2728_v23 = vrot.slane %v2716_v6, 4  ;;  %v2766_v38 = vsel %vm406_vm4, %v2765_v0, %v2591_v61  ;;  %v2771_v58 = vsel %vm406_vm4, %v2596_v55, %v2585_v37 }
 0x534   :  { %v2698_v15 = vrot.slane %v2693_v57, 4  ;;  %v2701_v52 = vsel %vm406_vm4, %v2693_v57, %v2700_v56  ;;  %v2731_v34 = vsel %vm406_vm4, %v2716_v6, %v2730_v9  ;;  %v2740_v48 = vrot.slane %v2727_v18, 4  ;;  %v306_v56 = vld [vmem:[%s9854_s12 + $0x18] sm:$0xff] }
 0x535   :  { %2820 = vrot.lane.b32.xlu0 %v2701_v52, %s6730_s9  ;;  %v2739_v10 = vperm.slane %v2731_v34, %v7036_v24  ;;  %v2743_v62 = vsel %vm406_vm4, %v2727_v18, %v2742_v22  ;;  %v2729_v39 = vsel %vm406_vm4, %v2728_v23, %v8090_v59  ;;  %v2770_v60 = vperm.slane %v2766_v38, %v7027_v13 }
 0x536   :  { %v2751_v12 = vperm.slane %v2743_v62, %v7036_v24  ;;  %v2735_v3 = vperm.slane %v2729_v39, %v7036_v24  ;;  %v2741_v11 = vsel %vm406_vm4, %v2740_v48, %v2721_v46  ;;  %v2775_v5 = vperm.slane %v2771_v58, %v7027_v13  ;;  %2901 = vmatpush.msra.mxu2 %v306_v56 }
 0x537   :  { %v2758_v7 = vrot.slane %v2739_v10, 4  ;;  %v2747_v26 = vperm.slane %v2741_v11, %v7036_v24  ;;  %v2777_v20 = vsel %vm406_vm4, %v2776_v16, %v2595_v27  ;;  %v2784_v45 = vrot.slane %v2764_v36, 4  ;;  %v305_v16 = vld [vmem:[%s9854_s12 + $0x10] sm:$0xff] }
 0x538   :  { %v2756_v28 = vrot.slane %v2751_v12, 4  ;;  %v2754_v14 = vrot.slane %v2735_v3, 4  ;;  %v2781_v59 = vperm.slane %v2777_v20, %v7027_v13  ;;  %v2796_v44 = vrot.slane %v2775_v5, 4  ;;  %2902 = vmatpush.msra.mxu2 %v305_v16 }
 0x539   :  { %v2759_v25 = vsel %vm406_vm4, %v2751_v12, %v2758_v7  ;;  %v2752_v63 = vrot.slane %v2747_v26, 4  ;;  %v2785_v31 = vsel %vm406_vm4, %v2770_v60, %v2784_v45  ;;  %v2782_v51 = vrot.slane %v2770_v60, 4  ;;  %v9919_v45 = vld [vmem:[#allocation16_spill] sm:$0xff] }
 0x53a   :  { %2854 = vrot.lane.b32.xlu2 %v2759_v25, %s6740_s2  ;;  %v2757_v17 = vsel %vm406_vm4, %v2756_v28, %v2739_v10  ;;  %v2755_v30 = vsel %vm406_vm4, %v2747_v26, %v2754_v14  ;;  %v2793_v21 = vperm.slane %v2785_v31, %v7036_v24  ;;  %v2797_v37 = vsel %vm406_vm4, %v2781_v59, %v2796_v44  ;;  %v9920_v25 = vld [vmem:[#allocation17_spill] sm:$0xff] }
 0x53b   :  { %2838 = vrot.lane.b32.xlu1 %v2757_v17, %s6741_s8  ;;  %v2805_v47 = vperm.slane %v2797_v37, %v7036_v24  ;;  %v2783_v19 = vsel %vm406_vm4, %v2782_v51, %v2764_v36  ;;  %v2794_v41 = vrot.slane %v2781_v59, 4  ;;  %v2645_v42 = vsel %vm406_vm4, %v2644_v8, %v8025_v32  ;;  %2903 = vmatpush.msra.mxu2 %v304_v43 }
 0x53c   :  { %v2812_v55 = vrot.slane %v2793_v21, 4  ;;  %v2789_v33 = vperm.slane %v2783_v19, %v7036_v24  ;;  %v2699_v53 = vsel %vm406_vm4, %v2698_v15, %v8114_v4  ;;  %v2753_v0 = vsel %vm406_vm4, %v2752_v63, %v2735_v3 }
 0x53d   :  { %2822 = vrot.lane.b32.xlu0 %v2755_v30, %s6730_s9  ;;  %v2810_v29 = vrot.slane %v2805_v47, 4  ;;  %v2795_v61 = vsel %vm406_vm4, %v2794_v41, %v2775_v5  ;;  %2904 = vmatpush.msra.mxu2 %v303_v49  ;;  %v8213_v5 = vld [vmem:[%s9858_s16] sm:$0x3f]  ;;  %v9921_v30 = vld [vmem:[#allocation18_spill] sm:$0xff]  ;;  %v9922_v41 = vld [vmem:[#allocation19_spill] sm:$0xff] }
 0x53e   :  { %v2801_v36 = vperm.slane %v2795_v61, %v7036_v24  ;;  %v2808_v35 = vrot.slane %v2789_v33, 4  ;;  %v2813_v1 = vsel %vm406_vm4, %v2805_v47, %v2812_v55  ;;  %v2876_v7 = vperm.slane %v8213_v5, 0 }
 0x53f   :  { %v2811_v32 = vsel %vm406_vm4, %v2810_v29, %v2793_v21 }
 0x540   :  { %v2806_v8 = vrot.slane %v2801_v36, 4  ;;  %v2809_v50 = vsel %vm406_vm4, %v2801_v36, %v2808_v35 }
 0x542   :  { %2856 = vrot.lane.b32.xlu2 %v2813_v1, %s6740_s2  ;;  %v2807_v4 = vsel %vm406_vm4, %v2806_v8, %v2789_v33  ;;  %v6742_v33 = vmov 32.0  }
 0x543   :  { %2840 = vrot.lane.b32.xlu1 %v2811_v32, %s6741_s8  ;;  %6480 = vrcp.f32 %v6742_v33  ;;  %v316_v33 = vld [vmem:[%s9857_s15 + $0x20] sm:$0xff] }
 0x545   :  { %2824 = vrot.lane.b32.xlu0 %v2809_v50, %s6730_s9 }
 0x56f   :  { %v2851_v46 = vpop.permute.xlu2 %2850 }
 0x587   :  { %v2853_v9 = vpop.permute.xlu2 %2852 }
 0x58a   :  { %v2835_v2 = vpop.permute.xlu0 %2834 }
 0x58e   :  { %v2819_v40 = vpop.permute.xlu1 %2818 }
 0x58f   :  { %v2862_v6 = vsel %vm146_vm0, %v2645_v42, %v2819_v40 }
 0x590   :  { %v2867_v54 = vsel %vm2866_vm5, %v2862_v6, %v2835_v2 }
 0x591   :  { %v2872_v57 = vsel %vm2871_vm6, %v2867_v54, %v2851_v46 }
 0x592   :  { %6207 = vmatmul.msk.f32.vlgmr.msra.gmra.mxu2 %vm186_vm3, %v2872_v57 }
 0x594   :  { %v2855_v34 = vpop.permute.xlu2 %2854 }
 0x59c   :  { %v2857_v12 = vpop.permute.xlu2 %2856 }
 0x5a1   :  { %v2837_v18 = vpop.permute.xlu1 %2836 }
 0x5a7   :  { %v2821_v27 = vpop.permute.xlu0 %2820 }
 0x5a8   :  { %v2863_v22 = vsel %vm146_vm0, %v2699_v53, %v2821_v27  ;;  %v6481_v53 = vpop.eup %6480 }
 0x5a9   :  { %v2868_v23 = vsel %vm2866_vm5, %v2863_v22, %v2837_v18  ;;  %vm2939_vm7 = vweird.f32 %v6481_v53 }
 0x5aa   :  { %v2873_v38 = vsel %vm2871_vm6, %v2868_v23, %v2853_v9 }
 0x5ab   :  { %6208 = vmatmul.msk.f32.gmra.mxu2 %vm186_vm3, %v2873_v38 }
 0x5ad   :  { %v2839_v58 = vpop.permute.xlu1 %2838 }
 0x5af   :  { %v2823_v15 = vpop.permute.xlu0 %2822 }
 0x5b0   :  { %v2864_v52 = vsel %vm146_vm0, %v2753_v0, %v2823_v15  ;;  %v2935_v0 = vmul.f32 32.0, %v6481_v53 }
 0x5b1   :  { %v2869_v48 = vsel %vm2866_vm5, %v2864_v52, %v2839_v58 }
 0x5b2   :  { %v2874_v10 = vsel %vm2871_vm6, %v2869_v48, %v2855_v34  ;;  %v2936_v29 = vsub.f32 1.0, %v2935_v0 }
 0x5b3   :  { %6209 = vmatmul.msk.f32.gmra.mxu2 %vm186_vm3, %v2874_v10  ;;  %v310_v10 = vld [vmem:[%s9855_s13 + $0x18] sm:$0xff] }
 0x5b4   :  { %v2937_v61 = vmul.f32 %v6481_v53, %v2936_v29  ;;  %3054 = vmatpush.msrb.mxu1 %v310_v10  ;;  %v312_v10 = vld [vmem:[%s9857_s15] sm:$0xff] }
 0x5b5   :  { %v2841_v62 = vpop.permute.xlu1 %2840 }
 0x5b6   :  { %v2938_v36 = vadd.f32 %v6481_v53, %v2937_v61  ;;  %v315_v61 = vld [vmem:[%s9857_s15 + $0x18] sm:$0xff] }
 0x5b7   :  { %v2825_v39 = vpop.permute.xlu0 %2824 }
 0x5b8   :  { %v2865_v60 = vsel %vm146_vm0, %v2807_v4, %v2825_v39  ;;  %v8224_v35 = vsel %vm2939_vm7, %v6481_v53, %v2938_v36 }
 0x5b9   :  { %v2870_v3 = vsel %vm2866_vm5, %v2865_v60, %v2841_v62  ;;  %9923 = vst [vmem:[#allocation23_spill] sm:$0xff] %v8224_v35  ;;  %v309_v62 = vld [vmem:[%s9855_s13 + $0x10] sm:$0xff] }
 0x5ba   :  { %v2875_v11 = vsel %vm2871_vm6, %v2870_v3, %v2857_v12  ;;  %3055 = vmatpush.msrb.mxu1 %v309_v62  ;;  %v8254_v3 = vperm.slane %v8213_v5, 2 }
 0x5bb   :  { %6210 = vmatmul.msk.f32.gmra.mxu2 %vm186_vm3, %v2875_v11 }
 0x615   :  { %v2906_v26 = vpop.f32.mrf.mxu2 }
 0x616   :  { %v2907_v20 = vadd.f32 %v2906_v26, %v2876_v7  ;;  %v308_v26 = vld [vmem:[%s9855_s13 + $0x8] sm:$0xff] }
 0x617   :  { %3056 = vmatpush.msrb.mxu1 %v308_v26 }
 0x618   :  { %v2918_v28 = vadd.f32 %v2907_v20, %v9919_v45  ;;  %v307_v20 = vld [vmem:[%s9855_s13] sm:$0xff]  ;;  %v8263_v45 = vperm.slane %v8213_v5, 3 }
 0x619   :  { %3057 = vmatpush.msrb.mxu1 %v307_v20 }
 0x61a   :  { %v2922_v14 = vsel %vm186_vm3, %v2918_v28, 0.0 }
 0x61b   :  { %2923 = vadd.xlane.f32.xlu0 %v2922_v14 }
 0x62e   :  { %v2909_v59 = vpop.f32.mrf.mxu2 }
 0x62f   :  { %v2910_v44 = vadd.f32 %v2909_v59, %v2876_v7 }
 0x631   :  { %v2919_v63 = vadd.f32 %v2910_v44, %v9920_v25 }
 0x633   :  { %v2925_v31 = vsel %vm186_vm3, %v2919_v63, 0.0 }
 0x634   :  { %2926 = vadd.xlane.f32.xlu1 %v2925_v31 }
 0x636   :  { %v2912_v51 = vpop.f32.mrf.mxu2 }
 0x637   :  { %v2913_v17 = vadd.f32 %v2912_v51, %v2876_v7 }
 0x639   :  { %v2920_v21 = vadd.f32 %v2913_v17, %v9921_v30 }
 0x63b   :  { %v2928_v37 = vsel %vm186_vm3, %v2920_v21, 0.0 }
 0x63c   :  { %2929 = vadd.xlane.f32.xlu2 %v2928_v37  ;;  %v318_v37 = vld [vmem:[%s9857_s15 + $0x30] sm:$0xff] }
 0x63e   :  { %v2915_v47 = vpop.f32.mrf.mxu2 }
 0x63f   :  { %v2916_v19 = vadd.f32 %v2915_v47, %v2876_v7 }
 0x641   :  { %v2921_v42 = vadd.f32 %v2916_v19, %v9922_v41  ;;  %v317_v19 = vld [vmem:[%s9857_s15 + $0x28] sm:$0xff] }
 0x643   :  { %v2931_v55 = vsel %vm186_vm3, %v2921_v42, 0.0 }
 0x644   :  { %2932 = vadd.xlane.f32.xlu0 %v2931_v55 }
 0x68e   :  { %v2924_v1 = vpop.xlane.xlu0 %2923 }
 0x68f   :  { %v2941_v32 = vmul.f32 %v8224_v35, %v2924_v1 }
 0x691   :  { %v2945_v8 = vsub.f32 %v2918_v28, %v2941_v32 }
 0x693   :  { %v2949_v50 = vmul.f32 %v2945_v8, %v2945_v8 }
 0x695   :  { %v2953_v4 = vsel %vm186_vm3, %v2949_v50, 0.0 }
 0x696   :  { %2954 = vadd.xlane.f32.xlu1 %v2953_v4 }
 0x6a7   :  { %v2927_v56 = vpop.xlane.xlu1 %2926 }
 0x6a8   :  { %v2942_v16 = vmul.f32 %v8224_v35, %v2927_v56 }
 0x6aa   :  { %v8229_v43 = vsub.f32 %v2919_v63, %v2942_v16 }
 0x6ac   :  { %v2950_v49 = vmul.f32 %v8229_v43, %v8229_v43 }
 0x6ae   :  { %v2956_v2 = vsel %vm186_vm3, %v2950_v49, 0.0 }
 0x6af   :  { %v2930_v40 = vpop.xlane.xlu2 %2929  ;;  %2957 = vadd.xlane.f32.xlu2 %v2956_v2 }
 0x6b0   :  { %v2943_v6 = vmul.f32 %v8224_v35, %v2930_v40 }
 0x6b2   :  { %v8235_v46 = vsub.f32 %v2920_v21, %v2943_v6  ;;  %v319_v21 = vld [vmem:[%s9857_s15 + $0x38] sm:$0xff] }
 0x6b3   :  { %3097 = vmatpush.msrb.mxu3 %v319_v21 }
 0x6b4   :  { %v2951_v54 = vmul.f32 %v8235_v46, %v8235_v46 }
 0x6b5   :  { %3098 = vmatpush.msrb.mxu3 %v318_v37 }
 0x6b6   :  { %v2959_v57 = vsel %vm186_vm3, %v2951_v54, 0.0 }
 0x6b7   :  { %2960 = vadd.xlane.f32.xlu0 %v2959_v57  ;;  %v2933_v18 = vpop.xlane.xlu0 %2932  ;;  %3099 = vmatpush.msrb.mxu3 %v317_v19 }
 0x6b8   :  { %v2944_v9 = vmul.f32 %v8224_v35, %v2933_v18 }
 0x6b9   :  { %3100 = vmatpush.msrb.mxu3 %v316_v33 }
 0x6ba   :  { %v8241_v27 = vsub.f32 %v2921_v42, %v2944_v9 }
 0x6bb   :  { %3101 = vmatpush.msrb.mxu3 %v315_v61 }
 0x6bc   :  { %v2952_v22 = vmul.f32 %v8241_v27, %v8241_v27 }
 0x6be   :  { %v2962_v23 = vsel %vm186_vm3, %v2952_v22, 0.0 }
 0x6bf   :  { %2963 = vadd.xlane.f32.xlu1 %v2962_v23 }
 0x709   :  { %v2955_v38 = vpop.xlane.xlu1 %2954 }
 0x70a   :  { %v2965_v58 = vmul.f32 %v2955_v38, %v8224_v35 }
 0x70c   :  { %v2969_v15 = vadd.f32 1e-05, %v2965_v58 }
 0x70e   :  { %6482 = vrsqrt.f32 %v2969_v15  ;;  %vm2979_vm9 = vweird.f32 %v2969_v15 }
 0x714   :  { %v6483_v52 = vpop.eup %6482 }
 0x715   :  { %v2974_v34 = vmul.f32 %v6483_v52, %v2969_v15  ;;  %vm2980_vm8 = vweird.f32 %v6483_v52 }
 0x716   :  { %vm2981_vm10 = vmor %vm2979_vm9, %vm2980_vm8  ;;  %vm3076_vm9 = vcmask 523264  }
 0x717   :  { %v2975_v48 = vmul.f32 %v6483_v52, %v2974_v34 }
 0x719   :  { %v2976_v39 = vmul.f32 0.5, %v2975_v48  ;;  %v313_v48 = vld [vmem:[%s9857_s15 + $0x8] sm:$0xff] }
 0x71b   :  { %v2977_v60 = vsub.f32 1.5, %v2976_v39 }
 0x71d   :  { %v2978_v12 = vmul.f32 %v6483_v52, %v2977_v60 }
 0x71f   :  { %v2982_v11 = vsel %vm2981_vm10, %v6483_v52, %v2978_v12 }
 0x720   :  { %v3013_v7 = vmul.f32 %v2982_v11, %v2945_v8 }
 0x722   :  { %v3018_v28 = vmul.f32 %v8254_v3, %v3013_v7  ;;  %v2958_v14 = vpop.xlane.xlu2 %2957 }
 0x723   :  { %v2966_v59 = vmul.f32 %v2958_v14, %v8224_v35 }
 0x724   :  { %v8268_v44 = vadd.f32 %v8263_v45, %v3018_v28 }
 0x725   :  { %v2970_v25 = vadd.f32 1e-05, %v2966_v59  ;;  %v3075_v59 = vperm.slane %v8213_v5, 1 }
 0x726   :  { %6211 = vmatmul.msk.f32.vlgmr.msrb.gmra.mxu1 %vm186_vm3, %v8268_v44 }
 0x727   :  { %6484 = vrsqrt.f32 %v2970_v25  ;;  %vm2989_vm12 = vweird.f32 %v2970_v25 }
 0x72a   :  { %v2961_v63 = vpop.xlane.xlu0 %2960 }
 0x72b   :  { %v2967_v31 = vmul.f32 %v2961_v63, %v8224_v35 }
 0x72d   :  { %v6485_v51 = vpop.eup %6484  ;;  %v2971_v17 = vadd.f32 1e-05, %v2967_v31 }
 0x72e   :  { %v2984_v30 = vmul.f32 %v6485_v51, %v2970_v25  ;;  %vm2990_vm11 = vweird.f32 %v6485_v51 }
 0x72f   :  { %6486 = vrsqrt.f32 %v2971_v17  ;;  %vm2991_vm13 = vmor %vm2989_vm12, %vm2990_vm11  ;;  %vm2999_vm15 = vweird.f32 %v2971_v17 }
 0x730   :  { %v2985_v47 = vmul.f32 %v6485_v51, %v2984_v30 }
 0x732   :  { %v2986_v41 = vmul.f32 0.5, %v2985_v47  ;;  %v2964_v42 = vpop.xlane.xlu1 %2963 }
 0x733   :  { %v2968_v55 = vmul.f32 %v2964_v42, %v8224_v35 }
 0x734   :  { %v2987_v53 = vsub.f32 1.5, %v2986_v41 }
 0x735   :  { %v6487_v0 = vpop.eup %6486  ;;  %v2972_v29 = vadd.f32 1e-05, %v2968_v55 }
 0x736   :  { %v2988_v36 = vmul.f32 %v6485_v51, %v2987_v53  ;;  %v2994_v1 = vmul.f32 %v6487_v0, %v2971_v17  ;;  %vm3000_vm14 = vweird.f32 %v6487_v0 }
 0x737   :  { %6488 = vrsqrt.f32 %v2972_v29  ;;  %vm3001_vm1 = vmor %vm2999_vm15, %vm3000_vm14  ;;  %vm3009_vm7 = vweird.f32 %v2972_v29 }
 0x738   :  { %v2992_v32 = vsel %vm2991_vm13, %v6485_v51, %v2988_v36  ;;  %v2995_v8 = vmul.f32 %v6487_v0, %v2994_v1 }
 0x739   :  { %v3014_v50 = vmul.f32 %v2992_v32, %v8229_v43 }
 0x73a   :  { %v2996_v4 = vmul.f32 0.5, %v2995_v8 }
 0x73b   :  { %v3019_v56 = vmul.f32 %v8254_v3, %v3014_v50 }
 0x73c   :  { %v2997_v16 = vsub.f32 1.5, %v2996_v4 }
 0x73d   :  { %v6489_v49 = vpop.eup %6488  ;;  %v3024_v2 = vadd.f32 %v8263_v45, %v3019_v56 }
 0x73e   :  { %v2998_v40 = vmul.f32 %v6487_v0, %v2997_v16  ;;  %v3004_v6 = vmul.f32 %v6489_v49, %v2972_v29  ;;  %vm3010_vm2 = vweird.f32 %v6489_v49 }
 0x73f   :  { %6212 = vmatmul.msk.f32.gmra.mxu1 %vm186_vm3, %v3024_v2  ;;  %vm3011_vm8 = vmor %vm3009_vm7, %vm3010_vm2 }
 0x740   :  { %v3002_v54 = vsel %vm3001_vm1, %v6487_v0, %v2998_v40  ;;  %v3005_v57 = vmul.f32 %v6489_v49, %v3004_v6 }
 0x741   :  { %v3015_v18 = vmul.f32 %v3002_v54, %v8235_v46  ;;  %v314_v46 = vld [vmem:[%s9857_s15 + $0x10] sm:$0xff] }
 0x742   :  { %v3006_v9 = vmul.f32 0.5, %v3005_v57  ;;  %3102 = vmatpush.msrb.mxu3 %v314_v46  ;;  %v6221_v46 = vld [vmem:[%s9852_s10 + $0x30] sm:$0xff] }
 0x743   :  { %v3020_v43 = vmul.f32 %v8254_v3, %v3015_v18 }
 0x744   :  { %v3007_v22 = vsub.f32 1.5, %v3006_v9  ;;  %3103 = vmatpush.msrb.mxu3 %v313_v48 }
 0x745   :  { %v3025_v23 = vadd.f32 %v8263_v45, %v3020_v43 }
 0x746   :  { %v3008_v38 = vmul.f32 %v6489_v49, %v3007_v22  ;;  %3104 = vmatpush.msrb.mxu3 %v312_v10 }
 0x747   :  { %6213 = vmatmul.msk.f32.gmra.mxu1 %vm186_vm3, %v3025_v23 }
 0x748   :  { %v3012_v58 = vsel %vm3011_vm8, %v6489_v49, %v3008_v38 }
 0x749   :  { %v3016_v15 = vmul.f32 %v3012_v58, %v8241_v27  ;;  %v6412_v27 = vld [vmem:[%s9856_s14] ss:$0 sm:$0xff] }
 0x74b   :  { %v3021_v52 = vmul.f32 %v8254_v3, %v3016_v15 }
 0x74d   :  { %v3026_v34 = vadd.f32 %v8263_v45, %v3021_v52 }
 0x74f   :  { %6214 = vmatmul.msk.f32.gmra.mxu1 %vm186_vm3, %v3026_v34 }
 0x7a3   :  { %v3059_v62 = vpop.f32.mrf.mxu1 }
 0x7a4   :  { %v3060_v39 = vadd.f32 %v6412_v27, %v3059_v62  ;;  %v8351_v62 = vperm.slane %v8213_v5, 4 }
 0x7a6   :  { %v3071_v60 = vmax.f32 %v3060_v39, 0.0 }
 0x7a8   :  { %6215 = vmatmul.msk.f32.vlgmr.msrb.gmra.mxu3 %vm3076_vm9, %v3071_v60 }
 0x7bc   :  { %v3062_v12 = vpop.f32.mrf.mxu1 }
 0x7bd   :  { %v3063_v3 = vadd.f32 %v6412_v27, %v3062_v12  ;;  %v6220_v12 = vld [vmem:[%s9852_s10 + $0x28] sm:$0xff] }
 0x7bf   :  { %v3072_v11 = vmax.f32 %v3063_v3, 0.0  ;;  %v6219_v3 = vld [vmem:[%s9852_s10 + $0x20] sm:$0xff] }
 0x7c1   :  { %6216 = vmatmul.msk.f32.gmra.mxu3 %vm3076_vm9, %v3072_v11  ;;  %v3215_v11 = vperm.slane %v8213_v5, 5 }
 0x7c4   :  { %v3065_v7 = vpop.f32.mrf.mxu1 }
 0x7c5   :  { %v3066_v26 = vadd.f32 %v6412_v27, %v3065_v7 }
 0x7c7   :  { %v3073_v20 = vmax.f32 %v3066_v26, 0.0 }
 0x7c9   :  { %6217 = vmatmul.msk.f32.gmra.mxu3 %vm3076_vm9, %v3073_v20 }
 0x7cc   :  { %v3068_v45 = vpop.f32.mrf.mxu1 }
 0x7cd   :  { %v3069_v28 = vadd.f32 %v6412_v27, %v3068_v45 }
 0x7cf   :  { %v3074_v14 = vmax.f32 %v3069_v28, 0.0 }
 0x7d1   :  { %6218 = vmatmul.msk.f32.gmra.mxu3 %vm3076_vm9, %v3074_v14 }
 0x82b   :  { %v3106_v25 = vpop.f32.mrf.mxu3 }
 0x82c   :  { %v3107_v63 = vadd.f32 %v3106_v25, %v3075_v59 }
 0x82e   :  { %v3118_v31 = vadd.f32 %v3107_v63, %v8268_v44 }
 0x830   :  { %v3122_v51 = vsel %vm186_vm3, %v3118_v31, 0.0 }
 0x831   :  { %3123 = vadd.xlane.f32.xlu2 %v3122_v51 }
 0x844   :  { %v3109_v17 = vpop.f32.mrf.mxu3 }
 0x845   :  { %v3110_v30 = vadd.f32 %v3109_v17, %v3075_v59 }
 0x847   :  { %v3119_v21 = vadd.f32 %v3110_v30, %v3024_v2 }
 0x849   :  { %v3125_v37 = vsel %vm186_vm3, %v3119_v21, 0.0 }
 0x84a   :  { %3126 = vadd.xlane.f32.xlu0 %v3125_v37 }
 0x84c   :  { %v3112_v47 = vpop.f32.mrf.mxu3 }
 0x84d   :  { %v3113_v19 = vadd.f32 %v3112_v47, %v3075_v59 }
 0x84f   :  { %v3120_v41 = vadd.f32 %v3113_v19, %v3025_v23 }
 0x851   :  { %v3128_v42 = vsel %vm186_vm3, %v3120_v41, 0.0 }
 0x852   :  { %3129 = vadd.xlane.f32.xlu1 %v3128_v42 }
 0x854   :  { %v3115_v55 = vpop.f32.mrf.mxu3 }
 0x855   :  { %v3116_v33 = vadd.f32 %v3115_v55, %v3075_v59 }
 0x857   :  { %v3121_v53 = vadd.f32 %v3116_v33, %v3026_v34  ;;  %v6222_v34 = vld [vmem:[%s9852_s10 + $0x38] sm:$0xff] }
 0x858   :  { %3277 = vmatpush.msra.mxu0 %v6222_v34 }
 0x859   :  { %v3131_v44 = vsel %vm186_vm3, %v3121_v53, 0.0 }
 0x85a   :  { %3132 = vadd.xlane.f32.xlu2 %v3131_v44  ;;  %3278 = vmatpush.msra.mxu0 %v6221_v46 }
 0x85c   :  { %3279 = vmatpush.msra.mxu0 %v6220_v12 }
 0x85e   :  { %3280 = vmatpush.msra.mxu0 %v6219_v3 }
 0x8a4   :  { %v3124_v0 = vpop.xlane.xlu2 %3123 }
 0x8a5   :  { %v3134_v29 = vmul.f32 %v3124_v0, %v8224_v35 }
 0x8a7   :  { %v3138_v61 = vsub.f32 %v3118_v31, %v3134_v29 }
 0x8a9   :  { %v3142_v36 = vmul.f32 %v3138_v61, %v3138_v61 }
 0x8ab   :  { %v3146_v1 = vsel %vm186_vm3, %v3142_v36, 0.0 }
 0x8ac   :  { %3147 = vadd.xlane.f32.xlu0 %v3146_v1 }
 0x8bd   :  { %v3127_v32 = vpop.xlane.xlu0 %3126 }
 0x8be   :  { %v3135_v8 = vmul.f32 %v3127_v32, %v8224_v35 }
 0x8c0   :  { %v8326_v50 = vsub.f32 %v3119_v21, %v3135_v8 }
 0x8c2   :  { %v3143_v4 = vmul.f32 %v8326_v50, %v8326_v50 }
 0x8c4   :  { %v3149_v56 = vsel %vm186_vm3, %v3143_v4, 0.0 }
 0x8c5   :  { %v3130_v16 = vpop.xlane.xlu1 %3129  ;;  %3150 = vadd.xlane.f32.xlu1 %v3149_v56 }
 0x8c6   :  { %v3136_v49 = vmul.f32 %v3130_v16, %v8224_v35 }
 0x8c8   :  { %v8332_v2 = vsub.f32 %v3120_v41, %v3136_v49 }
 0x8ca   :  { %v3144_v40 = vmul.f32 %v8332_v2, %v8332_v2 }
 0x8cc   :  { %v3152_v6 = vsel %vm186_vm3, %v3144_v40, 0.0 }
 0x8cd   :  { %3153 = vadd.xlane.f32.xlu2 %v3152_v6  ;;  %v3133_v54 = vpop.xlane.xlu2 %3132 }
 0x8ce   :  { %v3137_v57 = vmul.f32 %v3133_v54, %v8224_v35 }
 0x8d0   :  { %v8338_v18 = vsub.f32 %v3121_v53, %v3137_v57 }
 0x8d2   :  { %v3145_v9 = vmul.f32 %v8338_v18, %v8338_v18 }
 0x8d4   :  { %v3155_v43 = vsel %vm186_vm3, %v3145_v9, 0.0 }
 0x8d5   :  { %3156 = vadd.xlane.f32.xlu0 %v3155_v43  ;;  %v6413_v43 = vld [vmem:[%s9853_s11 + $0x1] ss:$0 sm:$0xff] }
 0x91f   :  { %v3148_v22 = vpop.xlane.xlu0 %3147 }
 0x920   :  { %v3158_v23 = vmul.f32 %v3148_v22, %v8224_v35 }
 0x922   :  { %v3162_v38 = vadd.f32 1e-05, %v3158_v23 }
 0x924   :  { %6490 = vrsqrt.f32 %v3162_v38  ;;  %vm3172_vm11 = vweird.f32 %v3162_v38 }
 0x92a   :  { %v6491_v58 = vpop.eup %6490 }
 0x92b   :  { %v3167_v15 = vmul.f32 %v6491_v58, %v3162_v38  ;;  %vm3173_vm10 = vweird.f32 %v6491_v58 }
 0x92c   :  { %vm3174_vm12 = vmor %vm3172_vm11, %vm3173_vm10 }
 0x92d   :  { %v3168_v52 = vmul.f32 %v6491_v58, %v3167_v15 }
 0x92f   :  { %v3169_v48 = vmul.f32 0.5, %v3168_v52 }
 0x931   :  { %v3170_v10 = vsub.f32 1.5, %v3169_v48 }
 0x933   :  { %v3171_v27 = vmul.f32 %v6491_v58, %v3170_v10 }
 0x935   :  { %v3175_v39 = vsel %vm3174_vm12, %v6491_v58, %v3171_v27 }
 0x936   :  { %v3206_v60 = vmul.f32 %v3175_v39, %v3138_v61 }
 0x938   :  { %v3211_v7 = vmul.f32 %v8351_v62, %v3206_v60  ;;  %v3151_v26 = vpop.xlane.xlu1 %3150 }
 0x939   :  { %v3159_v20 = vmul.f32 %v3151_v26, %v8224_v35 }
 0x93a   :  { %v8362_v45 = vadd.f32 %v3215_v11, %v3211_v7 }
 0x93b   :  { %v3163_v28 = vadd.f32 1e-05, %v3159_v20 }
 0x93c   :  { %9924 = vst [vmem:[#allocation22_spill] sm:$0xff] %v8362_v45  ;;  %6242 = vmatmul.msk.f32.vlgmr.msra.gmra.mxu0 %vm186_vm3, %v8362_v45 }
 0x93d   :  { %6492 = vrsqrt.f32 %v3163_v28  ;;  %vm3182_vm14 = vweird.f32 %v3163_v28 }
 0x940   :  { %v3154_v14 = vpop.xlane.xlu2 %3153 }
 0x941   :  { %v3160_v59 = vmul.f32 %v3154_v14, %v8224_v35 }
 0x943   :  { %v6493_v25 = vpop.eup %6492  ;;  %v3164_v63 = vadd.f32 1e-05, %v3160_v59 }
 0x944   :  { %v3177_v5 = vmul.f32 %v6493_v25, %v3163_v28  ;;  %vm3183_vm13 = vweird.f32 %v6493_v25 }
 0x945   :  { %6494 = vrsqrt.f32 %v3164_v63  ;;  %vm3184_vm15 = vmor %vm3182_vm14, %vm3183_vm13  ;;  %vm3192_vm2 = vweird.f32 %v3164_v63 }
 0x946   :  { %v3178_v31 = vmul.f32 %v6493_v25, %v3177_v5 }
 0x948   :  { %v3179_v51 = vmul.f32 0.5, %v3178_v31  ;;  %v3157_v17 = vpop.xlane.xlu0 %3156 }
 0x949   :  { %v3161_v30 = vmul.f32 %v3157_v17, %v8224_v35 }
 0x94a   :  { %v3180_v21 = vsub.f32 1.5, %v3179_v51 }
 0x94b   :  { %v6495_v37 = vpop.eup %6494  ;;  %v3165_v47 = vadd.f32 1e-05, %v3161_v30 }
 0x94c   :  { %v3181_v19 = vmul.f32 %v6493_v25, %v3180_v21  ;;  %v3187_v41 = vmul.f32 %v6495_v37, %v3164_v63  ;;  %vm3193_vm1 = vweird.f32 %v6495_v37 }
 0x94d   :  { %6496 = vrsqrt.f32 %v3165_v47  ;;  %vm3194_vm7 = vmor %vm3192_vm2, %vm3193_vm1  ;;  %vm3202_vm10 = vweird.f32 %v3165_v47 }
 0x94e   :  { %v3185_v42 = vsel %vm3184_vm15, %v6493_v25, %v3181_v19  ;;  %v3188_v55 = vmul.f32 %v6495_v37, %v3187_v41 }
 0x94f   :  { %v3207_v33 = vmul.f32 %v3185_v42, %v8326_v50 }
 0x950   :  { %v3189_v53 = vmul.f32 0.5, %v3188_v55 }
 0x951   :  { %v3212_v44 = vmul.f32 %v8351_v62, %v3207_v33 }
 0x952   :  { %v3190_v0 = vsub.f32 1.5, %v3189_v53 }
 0x953   :  { %v6497_v29 = vpop.eup %6496  ;;  %v8370_v61 = vadd.f32 %v3215_v11, %v3212_v44 }
 0x954   :  { %v3191_v36 = vmul.f32 %v6495_v37, %v3190_v0  ;;  %v3197_v1 = vmul.f32 %v6497_v29, %v3165_v47  ;;  %vm3203_vm8 = vweird.f32 %v6497_v29 }
 0x955   :  { %9925 = vst [vmem:[#allocation20_spill] sm:$0xff] %v8370_v61  ;;  %6243 = vmatmul.msk.f32.gmra.mxu0 %vm186_vm3, %v8370_v61  ;;  %vm3204_vm11 = vmor %vm3202_vm10, %vm3203_vm8 }
 0x956   :  { %v3195_v32 = vsel %vm3194_vm7, %v6495_v37, %v3191_v36  ;;  %v3198_v8 = vmul.f32 %v6497_v29, %v3197_v1 }
 0x957   :  { %v3208_v4 = vmul.f32 %v3195_v32, %v8332_v2 }
 0x958   :  { %v3199_v50 = vmul.f32 0.5, %v3198_v8 }
 0x959   :  { %v3213_v56 = vmul.f32 %v8351_v62, %v3208_v4 }
 0x95a   :  { %v3200_v16 = vsub.f32 1.5, %v3199_v50 }
 0x95b   :  { %v8376_v49 = vadd.f32 %v3215_v11, %v3213_v56 }
 0x95c   :  { %v3201_v40 = vmul.f32 %v6497_v29, %v3200_v16 }
 0x95d   :  { %9926 = vst [vmem:[#allocation21_spill] sm:$0xff] %v8376_v49  ;;  %6244 = vmatmul.msk.f32.gmra.mxu0 %vm186_vm3, %v8376_v49 }
 0x95e   :  { %v3205_v6 = vsel %vm3204_vm11, %v6497_v29, %v3201_v40 }
 0x95f   :  { %v3209_v54 = vmul.f32 %v3205_v6, %v8338_v18 }
 0x961   :  { %v3214_v57 = vmul.f32 %v8351_v62, %v3209_v54 }
 0x963   :  { %v8382_v9 = vadd.f32 %v3215_v11, %v3214_v57 }
 0x965   :  { %9927 = vst [vmem:[#allocation24_spill] sm:$0xff] %v8382_v9  ;;  %6245 = vmatmul.msk.f32.gmra.mxu0 %vm186_vm3, %v8382_v9 }
 0x9b9   :  { %v3282_v2 = vpop.f32.mrf.mxu0 }
 0x9ba   :  { %v8409_v52 = vadd.f32 %v6413_v43, %v3282_v2 }
 0x9bc   :  { %v3336_v32 = vrot.slane %v8409_v52, 4 }
 0x9d2   :  { %v3285_v22 = vpop.f32.mrf.mxu0 }
 0x9d3   :  { %v8389_v23 = vadd.f32 %v6413_v43, %v3285_v22 }
 0x9d5   :  { %3300 = vrot.lane.b32.xlu1 %v8389_v23, %s6733_s30  ;;  %v3392_v16 = vrot.slane %v8389_v23, 4 }
 0x9da   :  { %v3288_v38 = vpop.f32.mrf.mxu0 }
 0x9db   :  { %v8393_v18 = vadd.f32 %v6413_v43, %v3288_v38 }
 0x9dd   :  { %3326 = vrot.lane.b32.xlu2 %v8393_v18, %s6735_s1  ;;  %3314 = vrot.lane.b32.xlu0 %v8393_v18, %s6734_s20  ;;  %v3448_v3 = vrot.slane %v8393_v18, 4 }
 0x9de   :  { %3302 = vrot.lane.b32.xlu1 %v8393_v18, %s6733_s30 }
 0x9e2   :  { %v3291_v58 = vpop.f32.mrf.mxu0 }
 0x9e3   :  { %v8401_v15 = vadd.f32 %v6413_v43, %v3291_v58 }
 0x9e5   :  { %3328 = vrot.lane.b32.xlu0 %v8401_v15, %s6735_s1  ;;  %3316 = vrot.lane.b32.xlu2 %v8401_v15, %s6734_s20  ;;  %v3504_v26 = vrot.slane %v8401_v15, 4  ;;  %v6367_v2 = vpack.i.bf16 %v8393_v18, %v8401_v15 }
 0x9e6   :  { %3304 = vrot.lane.b32.xlu1 %v8401_v15, %s6733_s30 }
 0x9ed   :  { %3312 = vrot.lane.b32.xlu0 %v8389_v23, %s6734_s20  ;;  %3324 = vrot.lane.b32.xlu2 %v8389_v23, %s6735_s1 }
 0x9ee   :  { %3298 = vrot.lane.b32.xlu1 %v8409_v52, %s6733_s30 }
 0x9f5   :  { %3310 = vrot.lane.b32.xlu0 %v8409_v52, %s6734_s20  ;;  %3322 = vrot.lane.b32.xlu2 %v8409_v52, %s6735_s1 }
 0x9f6   :  { %3778 = vrot.lane.b32.xlu1 %v8393_v18, %s6736_s4 }
 0x9fd   :  { %3776 = vrot.lane.b32.xlu0 %v8389_v23, %s6736_s4 }
 0x9fe   :  { %3780 = vrot.lane.b32.xlu1 %v8401_v15, %s6736_s4 }
 0xa37   :  { %v8427_v34 = vpop.permute.xlu2 %3326 }
 0xa38   :  { %v3458_v11 = vrot.slane %v8427_v34, 4 }
 0xa3f   :  { %v8429_v46 = vpop.permute.xlu2 %3316 }
 0xa40   :  { %v3502_v12 = vrot.slane %v8429_v46, 4  ;;  %v3505_v31 = vsel %vm406_vm4, %v8429_v46, %v3504_v26 }
 0xa41   :  { %v3513_v42 = vperm.slane %v3505_v31, %v7027_v13 }
 0xa42   :  { %v3503_v5 = vsel %vm406_vm4, %v3502_v12, %v8401_v15 }
 0xa43   :  { %v3509_v41 = vperm.slane %v3503_v5, %v7027_v13  ;;  %v3540_v6 = vrot.slane %v3513_v42, 4 }
 0xa45   :  { %v3528_v40 = vrot.slane %v3509_v41, 4 }
 0xa47   :  { %v8431_v48 = vpop.permute.xlu1 %3300  ;;  %v8433_v10 = vpop.permute.xlu2 %3324 }
 0xa48   :  { %v3404_v27 = vrot.slane %v8431_v48, 4  ;;  %3784 = vrot.lane.b32.xlu1 %v8431_v48, %s6736_s4  ;;  %v3402_v62 = vrot.slane %v8433_v10, 4  ;;  %v6377_v58 = vpack.i.bf16 %v8431_v48, %v8409_v52 }
 0xa4a   :  { %v3403_v39 = vsel %vm406_vm4, %v3402_v62, %v8431_v48  ;;  %v3405_v60 = vsel %vm406_vm4, %v8433_v10, %v3404_v27 }
 0xa4b   :  { %v8476_v33 = vperm.slane %v3403_v39, %v7027_v13  ;;  %v8481_v29 = vperm.slane %v3405_v60, %v7027_v13 }
 0xa4d   :  { %v3414_v43 = vrot.slane %v8476_v33, 4  ;;  %v3426_v27 = vrot.slane %v8481_v29, 4 }
 0xa4f   :  { %v8446_v7 = vpop.permute.xlu0 %3314  ;;  %v8495_v54 = vpop.permute.xlu2 %3322 }
 0xa50   :  { %v8449_v20 = vpop.permute.xlu1 %3302  ;;  %v3446_v28 = vrot.slane %v8446_v7, 4  ;;  %v3449_v14 = vsel %vm406_vm4, %v8446_v7, %v3448_v3  ;;  %3794 = vrot.lane.b32.xlu1 %v8446_v7, %s6736_s4  ;;  %9928 = vst [vmem:[#allocation16_spill] sm:$0xff] %v8495_v54  ;;  %v3346_v3 = vrot.slane %v8495_v54, 4 }
 0xa51   :  { %v3459_v59 = vsel %vm406_vm4, %v3458_v11, %v8449_v20  ;;  %v3460_v25 = vrot.slane %v8449_v20, 4  ;;  %v3457_v63 = vperm.slane %v3449_v14, %v7027_v13  ;;  %3786 = vrot.lane.b32.xlu2 %v8449_v20, %s6736_s4  ;;  %v6372_v26 = vpack.i.bf16 %v8449_v20, %v8389_v23 }
 0xa52   :  { %v3465_v51 = vperm.slane %v3459_v59, %v7027_v13  ;;  %v3447_v17 = vsel %vm406_vm4, %v3446_v28, %v8393_v18 }
 0xa53   :  { %v3461_v30 = vsel %vm406_vm4, %v8427_v34, %v3460_v25  ;;  %v3453_v21 = vperm.slane %v3447_v17, %v7027_v13  ;;  %v3484_v37 = vrot.slane %v3457_v63, 4 }
 0xa54   :  { %v3469_v47 = vperm.slane %v3461_v30, %v7027_v13  ;;  %v3470_v19 = vrot.slane %v3465_v51, 4 }
 0xa55   :  { %v3472_v55 = vrot.slane %v3453_v21, 4 }
 0xa56   :  { %v3482_v53 = vrot.slane %v3469_v47, 4  ;;  %v3471_v44 = vsel %vm406_vm4, %v3470_v19, %v3453_v21  ;;  %v3485_v0 = vsel %vm406_vm4, %v3469_v47, %v3484_v37 }
 0xa57   :  { %v3473_v36 = vsel %vm406_vm4, %v3465_v51, %v3472_v55  ;;  %v8484_v1 = vpop.permute.xlu0 %3328  ;;  %v3493_v4 = vperm.slane %v3485_v0, %v7036_v24  ;;  %v3477_v22 = vperm.slane %v3471_v44, %v7036_v24 }
 0xa58   :  { %v3483_v8 = vsel %vm406_vm4, %v3482_v53, %v3457_v63  ;;  %3800 = vrot.lane.b32.xlu1 %v8433_v10, %s6736_s4  ;;  %v8491_v50 = vpop.permute.xlu1 %3304  ;;  %v3514_v56 = vrot.slane %v8484_v1, 4  ;;  %v3481_v62 = vperm.slane %v3473_v36, %v7036_v24  ;;  %v6387_v25 = vpack.i.bf16 %v8484_v1, %v8446_v7 }
 0xa59   :  { %3802 = vrot.lane.b32.xlu2 %v8427_v34, %s6736_s4  ;;  %v3516_v57 = vrot.slane %v8491_v50, 4  ;;  %3788 = vrot.lane.b32.xlu0 %v8491_v50, %s6736_s4  ;;  %v8515_v12 = vrot.slane %v3493_v4, 4  ;;  %v8522_v28 = vperm.slane %v3483_v8, %v7036_v24  ;;  %v3494_v63 = vrot.slane %v3477_v22, 4 }
 0xa5a   :  { %v3515_v38 = vsel %vm406_vm4, %v3514_v56, %v8491_v50  ;;  %v3496_v17 = vrot.slane %v3481_v62, 4  ;;  %v6382_v47 = vpack.i.bf16 %v8429_v46, %v8491_v50 }
 0xa5b   :  { %v3517_v39 = vsel %vm406_vm4, %v8484_v1, %v3516_v57  ;;  %v3521_v60 = vperm.slane %v3515_v38, %v7027_v13  ;;  %v3501_v19 = vsel %vm406_vm4, 0.0, %v8515_v12  ;;  %v3498_v4 = vrot.slane %v8522_v28, 4 }
 0xa5c   :  { %v3525_v11 = vperm.slane %v3517_v39, %v7027_v13  ;;  %v3682_v57 = vrot.slane %v3501_v19, 4 }
 0xa5d   :  { %v3526_v14 = vrot.slane %v3521_v60, 4  ;;  %v3529_v59 = vsel %vm406_vm4, %v3521_v60, %v3528_v40  ;;  %v3499_v18 = vsel %vm406_vm4, 0.0, %v3498_v4 }
 0xa5e   :  { %v3537_v5 = vperm.slane %v3529_v59, %v7036_v24  ;;  %v3538_v31 = vrot.slane %v3525_v11, 4  ;;  %v3541_v51 = vsel %vm406_vm4, %v3525_v11, %v3540_v6 }
 0xa5f   :  { %v3527_v30 = vsel %vm406_vm4, %v3526_v14, %v3509_v41  ;;  %v3549_v21 = vperm.slane %v3541_v51, %v7036_v24  ;;  %v8531_v37 = vpop.permute.xlu0 %3312 }
 0xa60   :  { %v3539_v55 = vsel %vm406_vm4, %v3538_v31, %v3513_v42  ;;  %v8538_v53 = vrot.slane %v3537_v5, 4  ;;  %3798 = vrot.lane.b32.xlu1 %v8495_v54, %s6736_s4  ;;  %v8542_v44 = vpop.permute.xlu1 %3298  ;;  %v3390_v41 = vrot.slane %v8531_v37, 4  ;;  %v3393_v6 = vsel %vm406_vm4, %v8531_v37, %v3392_v16 }
 0xa61   :  { %v8546_v0 = vperm.slane %v3539_v55, %v7036_v24  ;;  %v8548_v36 = vrot.slane %v3549_v21, 4  ;;  %3796 = vrot.lane.b32.xlu2 %v8429_v46, %s6736_s4  ;;  %v3347_v42 = vsel %vm406_vm4, %v3346_v3, %v8542_v44  ;;  %v3348_v8 = vrot.slane %v8542_v44, 4  ;;  %3804 = vrot.lane.b32.xlu0 %v8484_v1, %s6736_s4 }
 0xa62   :  { %v3353_v56 = vperm.slane %v3347_v42, %v7027_v13  ;;  %v3391_v40 = vsel %vm406_vm4, %v3390_v41, %v8389_v23  ;;  %v8571_v60 = vperm.slane %v3527_v30, %v7036_v24  ;;  %v8575_v3 = vsel %vm406_vm4, 0.0, %v8538_v53 }
 0xa63   :  { %v8565_v38 = vsel %vm406_vm4, 0.0, %v8548_v36  ;;  %v3349_v62 = vsel %vm406_vm4, %v8495_v54, %v3348_v8  ;;  %v3397_v39 = vperm.slane %v3391_v40, %v7027_v13  ;;  %v3401_v16 = vperm.slane %v3393_v6, %v7027_v13 }
 0xa64   :  { %v3357_v11 = vperm.slane %v3349_v62, %v7027_v13  ;;  %v3554_v14 = vrot.slane %v8546_v0, 4  ;;  %v3736_v59 = vrot.slane %v8565_v38, 4  ;;  %v3358_v51 = vrot.slane %v3353_v56, 4 }
 0xa65   :  { %v3415_v5 = vsel %vm406_vm4, %v3414_v43, %v3397_v39  ;;  %v3416_v31 = vrot.slane %v3397_v39, 4  ;;  %v3427_v30 = vsel %vm406_vm4, %v3426_v27, %v3401_v16  ;;  %v3428_v19 = vrot.slane %v3401_v16, 4 }
 0xa66   :  { %v8583_v21 = vperm.slane %v3415_v5, %v7036_v24  ;;  %v3433_v41 = vperm.slane %v3427_v30, %v7036_v24  ;;  %v3495_v8 = vsel %vm406_vm4, 0.0, %v3494_v63  ;;  %v3666_v40 = vsel %vm406_vm4, %v3496_v17, %v3477_v22 }
 0xa67   :  { %v3417_v55 = vsel %vm406_vm4, %v8476_v33, %v3416_v31  ;;  %v8589_v42 = vpop.permute.xlu0 %3310  ;;  %v3370_v43 = vrot.slane %v3357_v11, 4  ;;  %v3429_v6 = vsel %vm406_vm4, %v8481_v29, %v3428_v19  ;;  %v3497_v33 = vsel %vm406_vm4, 0.0, %v3496_v17 }
 0xa68   :  { %6368 = vrot.lane.b32.xlu1 %v6367_v2, %s6737_s22  ;;  %v3334_v27 = vrot.slane %v8589_v42, 4  ;;  %v3425_v62 = vperm.slane %v3417_v55, %v7036_v24  ;;  %v3437_v39 = vperm.slane %v3429_v6, %v7036_v24  ;;  %v3337_v29 = vsel %vm406_vm4, %v8589_v42, %v3336_v32 }
 0xa69   :  { %3774 = vrot.lane.b32.xlu2 %v8409_v52, %s6736_s4  ;;  %3792 = vrot.lane.b32.xlu0 %v8531_v37, %s6736_s4  ;;  %v3438_v15 = vrot.slane %v8583_v21, 4  ;;  %v3442_v2 = vrot.slane %v3433_v41, 4  ;;  %v3345_v63 = vperm.slane %v3337_v29, %v7027_v13  ;;  %v3671_v5 = vrot.slane %v3497_v33, 4 }
 0xa6a   :  { %v3335_v22 = vsel %vm406_vm4, %v3334_v27, %v8409_v52  ;;  %v3444_v17 = vrot.slane %v3437_v39, 4  ;;  %v3677_v32 = vsel %vm406_vm4, %v8515_v12, %v8522_v28  ;;  %v3670_v4 = vperm.slane %v3666_v40, %v7027_v13 }
 0xa6b   :  { %v3341_v16 = vperm.slane %v3335_v22, %v7027_v13  ;;  %v3371_v31 = vsel %vm406_vm4, %v3370_v43, %v3345_v63  ;;  %v3372_v30 = vrot.slane %v3345_v63, 4  ;;  %v3683_v19 = vsel %vm406_vm4, %v3682_v57, %v3499_v18 }
 0xa6c   :  { %v3445_v55 = vsel %vm406_vm4, 0.0, %v3444_v17  ;;  %v3377_v39 = vperm.slane %v3371_v31, %v7036_v24  ;;  %v3672_v12 = vsel %vm406_vm4, %v3671_v5, %v3495_v8  ;;  %v3681_v28 = vperm.slane %v3677_v32, %v7027_v13 }
 0xa6d   :  { %v3359_v6 = vsel %vm406_vm4, %v3358_v51, %v3341_v16  ;;  %v3360_v27 = vrot.slane %v3341_v16, 4  ;;  %v3373_v29 = vsel %vm406_vm4, %v3357_v11, %v3372_v30  ;;  %v3440_v43 = vrot.slane %v3425_v62, 4 }
 0xa6e   :  { %v8627_v33 = vperm.slane %v3359_v6, %v7036_v24  ;;  %v3381_v57 = vperm.slane %v3373_v29, %v7036_v24  ;;  %v3386_v18 = vrot.slane %v3377_v39, 4  ;;  %v3628_v22 = vrot.slane %v3445_v55, 4 }
 0xa6f   :  { %v3361_v40 = vsel %vm406_vm4, %v3353_v56, %v3360_v27  ;;  %v3676_v11 = vperm.slane %v3672_v12, %v7027_v13  ;;  %v3443_v56 = vsel %vm406_vm4, 0.0, %v3442_v2  ;;  %v3687_v16 = vperm.slane %v3683_v19, %v7027_v13 }
 0xa70   :  { %v3369_v51 = vperm.slane %v3361_v40, %v7036_v24  ;;  %v3382_v63 = vrot.slane %v8627_v33, 4  ;;  %6388 = vrot.lane.b32.xlu1 %v6387_v25, %s6737_s22  ;;  %v3387_v8 = vsel %vm406_vm4, 0.0, %v3386_v18  ;;  %v3388_v62 = vrot.slane %v3381_v57, 4 }
 0xa71   :  { %3790 = vrot.lane.b32.xlu2 %v8589_v42, %s6736_s4  ;;  %3782 = vrot.lane.b32.xlu0 %v8542_v44, %s6736_s4  ;;  %v3690_v7 = vrot.slane %v3670_v4, 4  ;;  %v3702_v1 = vrot.slane %v3681_v28, 4  ;;  %v3439_v30 = vsel %vm406_vm4, 0.0, %v3438_v15  ;;  %v3623_v55 = vsel %vm406_vm4, %v3444_v17, %v3433_v41 }
 0xa72   :  { %v3383_v5 = vsel %vm406_vm4, 0.0, %v3382_v63  ;;  %v3384_v32 = vrot.slane %v3369_v51, 4  ;;  %v3389_v25 = vsel %vm406_vm4, 0.0, %v3388_v62  ;;  %v3569_v31 = vsel %vm406_vm4, %v3388_v62, %v3377_v39 }
 0xa73   :  { %v3574_v27 = vrot.slane %v3389_v25, 4  ;;  %v3627_v2 = vperm.slane %v3623_v55, %v7027_v13  ;;  %v3691_v19 = vsel %vm406_vm4, %v3676_v11, %v3690_v7  ;;  %v3441_v12 = vsel %vm406_vm4, 0.0, %v3440_v43 }
 0xa74   :  { %v3385_v6 = vsel %vm406_vm4, 0.0, %v3384_v32  ;;  %v3612_v40 = vsel %vm406_vm4, %v3440_v43, %v8583_v21  ;;  %v3699_v57 = vperm.slane %v3691_v19, %v7036_v24  ;;  %v3617_v15 = vrot.slane %v3441_v12, 4 }
 0xa75   :  { %v3563_v29 = vrot.slane %v3385_v6, 4  ;;  %v3616_v39 = vperm.slane %v3612_v40, %v7027_v13  ;;  %v3629_v41 = vsel %vm406_vm4, %v3628_v22, %v3443_v56  ;;  %v3648_v17 = vrot.slane %v3627_v2, 4 }
 0xa76   :  { %v3633_v18 = vperm.slane %v3629_v41, %v7027_v13  ;;  %v3703_v51 = vsel %vm406_vm4, %v3687_v16, %v3702_v1  ;;  %v3718_v63 = vrot.slane %v3699_v57, 4  ;;  %v3688_v62 = vrot.slane %v3676_v11, 4 }
 0xa77   :  { %v3618_v7 = vsel %vm406_vm4, %v3617_v15, %v3439_v30  ;;  %v3636_v25 = vrot.slane %v3616_v39, 4  ;;  %v3711_v55 = vperm.slane %v3703_v51, %v7036_v24  ;;  %v3700_v21 = vrot.slane %v3687_v16, 4 }
 0xa78   :  { %v3622_v43 = vperm.slane %v3618_v7, %v7027_v13  ;;  %v3649_v22 = vsel %vm406_vm4, %v3633_v18, %v3648_v17  ;;  %v3646_v11 = vrot.slane %v3633_v18, 4  ;;  %v3689_v56 = vsel %vm406_vm4, %v3688_v62, %v3670_v4 }
 0xa79   :  { %6378 = vrot.lane.b32.xlu2 %v6377_v58, %s6737_s22  ;;  %6373 = vrot.lane.b32.xlu0 %v6372_v26, %s6737_s22  ;;  %v3657_v1 = vperm.slane %v3649_v22, %v7036_v24  ;;  %v8679_v16 = vsel %vm406_vm4, %v3711_v55, %v3718_v63  ;;  %v3695_v52 = vperm.slane %v3689_v56, %v7036_v24  ;;  %v3716_v15 = vrot.slane %v3711_v55, 4 }
 0xa7a   :  { %v3701_v48 = vsel %vm406_vm4, %v3700_v21, %v3681_v28  ;;  %v3637_v58 = vsel %vm406_vm4, %v3622_v43, %v3636_v25  ;;  %v3634_v23 = vrot.slane %v3622_v43, 4  ;;  %v3647_v20 = vsel %vm406_vm4, %v3646_v11, %v3627_v2 }
 0xa7b   :  { %v3707_v26 = vperm.slane %v3701_v48, %v7036_v24  ;;  %v3573_v30 = vperm.slane %v3569_v31, %v7027_v13  ;;  %v3645_v4 = vperm.slane %v3637_v58, %v7036_v24  ;;  %v3653_v6 = vperm.slane %v3647_v20, %v7036_v24 }
 0xa7c   :  { %v3662_v19 = vrot.slane %v3657_v1, 4  ;;  %v3558_v12 = vsel %vm406_vm4, %v3384_v32, %v8627_v33  ;;  %v3635_v40 = vsel %vm406_vm4, %v3634_v23, %v3616_v39  ;;  %v3714_v28 = vrot.slane %v3695_v52, 4 }
 0xa7d   :  { %v3562_v41 = vperm.slane %v3558_v12, %v7027_v13  ;;  %v3575_v2 = vsel %vm406_vm4, %v3574_v27, %v3387_v8  ;;  %v3594_v17 = vrot.slane %v3573_v30, 4  ;;  %v3664_v18 = vrot.slane %v3645_v4, 4 }
 0xa7e   :  { %v3579_v31 = vperm.slane %v3575_v2, %v7027_v13  ;;  %v3641_v51 = vperm.slane %v3635_v40, %v7036_v24  ;;  %v8697_v63 = vsel %vm406_vm4, %v3662_v19, %v3645_v4  ;;  %v3658_v62 = vrot.slane %v3653_v6, 4 }
 0xa7f   :  { %v3564_v33 = vsel %vm406_vm4, %v3563_v29, %v3383_v5  ;;  %v3582_v32 = vrot.slane %v3562_v41, 4  ;;  %v8701_v39 = vsel %vm406_vm4, %v3657_v1, %v3664_v18  ;;  %v8704_v7 = vsel %vm406_vm4, %v3707_v26, %v3714_v28 }
 0xa80   :  { %v3568_v8 = vperm.slane %v3564_v33, %v7027_v13  ;;  %v3595_v27 = vsel %vm406_vm4, %v3579_v31, %v3594_v17  ;;  %v3592_v25 = vrot.slane %v3579_v31, 4  ;;  %v3660_v55 = vrot.slane %v3641_v51, 4 }
 0xa81   :  { %6383 = vrot.lane.b32.xlu2 %v6382_v47, %s6737_s22  ;;  %v3603_v5 = vperm.slane %v3595_v27, %v7036_v24  ;;  %v8714_v29 = vsel %vm406_vm4, %v3658_v62, %v3641_v51  ;;  %v8717_v21 = vsel %vm406_vm4, %v3716_v15, %v3699_v57  ;;  %v3712_v43 = vrot.slane %v3707_v26, 4 }
 0xa82   :  { %v3583_v22 = vsel %vm406_vm4, %v3568_v8, %v3582_v32  ;;  %v3580_v11 = vrot.slane %v3568_v8, 4  ;;  %v3593_v46 = vsel %vm406_vm4, %v3592_v25, %v3573_v30  ;;  %v8722_v50 = vsel %vm406_vm4, %v3653_v6, %v3660_v55 }
 0xa83   :  { %v3591_v47 = vperm.slane %v3583_v22, %v7036_v24  ;;  %v3599_v56 = vperm.slane %v3593_v46, %v7036_v24  ;;  %v3608_v1 = vrot.slane %v3603_v5, 4  ;;  %v8727_v48 = vsel %vm406_vm4, %v3712_v43, %v3695_v52 }
 0xa84   :  { %v3581_v57 = vsel %vm406_vm4, %v3580_v11, %v3562_v41  ;;  %v3550_v58 = vrot.slane %v8571_v60, 4  ;;  %v3555_v23 = vsel %vm406_vm4, 0.0, %v3554_v14  ;;  %v3720_v20 = vsel %vm406_vm4, %v8538_v53, %v8571_v60 }
 0xa85   :  { %v3610_v26 = vrot.slane %v3591_v47, 4  ;;  %v3587_v30 = vperm.slane %v3581_v57, %v7036_v24  ;;  %v8739_v4 = vsel %vm406_vm4, %v3608_v1, %v3591_v47  ;;  %v3604_v52 = vrot.slane %v3599_v56, 4  ;;  %v3779_v1 = vpop.permute.xlu1 %3778 }
 0xa86   :  { %v3551_v6 = vsel %vm406_vm4, 0.0, %v3550_v58  ;;  %v3724_v19 = vperm.slane %v3720_v20, %v7027_v13  ;;  %v3725_v12 = vrot.slane %v8575_v3, 4  ;;  %v3731_v14 = vsel %vm406_vm4, %v8548_v36, %v8546_v0 }
 0xa87   :  { %v8748_v40 = vsel %vm406_vm4, %v3603_v5, %v3610_v26  ;;  %v3606_v53 = vrot.slane %v3587_v30, 4  ;;  %v8751_v60 = vsel %vm406_vm4, %v3604_v52, %v3587_v30  ;;  %v3735_v28 = vperm.slane %v3731_v14, %v7027_v13 }
 0xa88   :  { %v3726_v15 = vsel %vm406_vm4, %v3725_v12, %v3551_v6  ;;  %v3737_v41 = vsel %vm406_vm4, %v3736_v59, %v3555_v23  ;;  %v3744_v3 = vrot.slane %v3724_v19, 4  ;;  %v3936_v14 = vrot.slane %v3779_v1, 4 }
 0xa89   :  { %v8759_v2 = vsel %vm406_vm4, %v3599_v56, %v3606_v53  ;;  %v3730_v0 = vperm.slane %v3726_v15, %v7027_v13  ;;  %v3741_v36 = vperm.slane %v3737_v41, %v7027_v13  ;;  %v3756_v17 = vrot.slane %v3735_v28, 4  ;;  %v8791_v15 = vpop.permute.xlu0 %3776 }
 0xa8b   :  { %v3745_v31 = vsel %vm406_vm4, %v3730_v0, %v3744_v3  ;;  %v3757_v51 = vsel %vm406_vm4, %v3741_v36, %v3756_v17  ;;  %v3742_v62 = vrot.slane %v3730_v0, 4  ;;  %v3754_v38 = vrot.slane %v3741_v36, 4 }
 0xa8c   :  { %v3753_v59 = vperm.slane %v3745_v31, %v7036_v24  ;;  %v3765_v33 = vperm.slane %v3757_v51, %v7036_v24 }
 0xa8d   :  { %v3743_v32 = vsel %vm406_vm4, %v3742_v62, %v3724_v19  ;;  %v3755_v8 = vsel %vm406_vm4, %v3754_v38, %v3735_v28  ;;  %v3781_v58 = vpop.permute.xlu1 %3780 }
 0xa8e   :  { %v3772_v27 = vrot.slane %v3753_v59, 4  ;;  %v3749_v25 = vperm.slane %v3743_v32, %v7036_v24  ;;  %v3761_v55 = vperm.slane %v3755_v8, %v7036_v24  ;;  %v3770_v5 = vrot.slane %v3765_v33, 4 }
 0xa90   :  { %v8774_v43 = vsel %vm406_vm4, %v3765_v33, %v3772_v27  ;;  %v3768_v22 = vrot.slane %v3749_v25, 4  ;;  %v8777_v11 = vsel %vm406_vm4, %v3770_v5, %v3753_v59  ;;  %v3766_v46 = vrot.slane %v3761_v55, 4 }
 0xa91   :  { %v3992_v5 = vrot.slane %v3781_v58, 4 }
 0xa92   :  { %v8780_v47 = vsel %vm406_vm4, %v3761_v55, %v3768_v22  ;;  %v8783_v56 = vsel %vm406_vm4, %v3766_v46, %v3749_v25 }
 0xaab   :  { %v3787_v57 = vpop.permute.xlu2 %3786 }
 0xaac   :  { %v3948_v26 = vrot.slane %v3787_v57, 4 }
 0xab3   :  { %v3803_v23 = vpop.permute.xlu2 %3802 }
 0xab4   :  { %v3946_v30 = vrot.slane %v3803_v23, 4  ;;  %v3949_v6 = vsel %vm406_vm4, %v3803_v23, %v3948_v26 }
 0xab5   :  { %v3957_v12 = vperm.slane %v3949_v6, %v7027_v13 }
 0xab6   :  { %v3947_v19 = vsel %vm406_vm4, %v3946_v30, %v3787_v57 }
 0xab7   :  { %v3953_v53 = vperm.slane %v3947_v19, %v7027_v13  ;;  %v3970_v36 = vrot.slane %v3957_v12, 4 }
 0xab9   :  { %v3958_v51 = vrot.slane %v3953_v53, 4 }
 0xaba   :  { %v8785_v20 = vpop.permute.xlu1 %3784 }
 0xabb   :  { %v3797_v52 = vpop.permute.xlu2 %3796 }
 0xabc   :  { %v3990_v22 = vrot.slane %v3797_v52, 4  ;;  %v3993_v19 = vsel %vm406_vm4, %v3797_v52, %v3992_v5  ;;  %v3892_v52 = vrot.slane %v8785_v20, 4 }
 0xac2   :  { %v3795_v28 = vpop.permute.xlu1 %3794 }
 0xac3   :  { %v8793_v41 = vpop.permute.xlu2 %3774  ;;  %v3934_v3 = vrot.slane %v3795_v28, 4  ;;  %v3937_v0 = vsel %vm406_vm4, %v3795_v28, %v3936_v14 }
 0xac4   :  { %v3945_v17 = vperm.slane %v3937_v0, %v7027_v13  ;;  %v3991_v0 = vsel %vm406_vm4, %v3990_v22, %v3781_v58 }
 0xac5   :  { %v3935_v31 = vsel %vm406_vm4, %v3934_v3, %v3779_v1 }
 0xac6   :  { %v3941_v62 = vperm.slane %v3935_v31, %v7027_v13  ;;  %v3971_v38 = vsel %vm406_vm4, %v3970_v36, %v3945_v17  ;;  %v3972_v59 = vrot.slane %v3945_v17, 4 }
 0xac7   :  { %v3977_v33 = vperm.slane %v3971_v38, %v7036_v24 }
 0xac8   :  { %v3959_v32 = vsel %vm406_vm4, %v3958_v51, %v3941_v62  ;;  %v3960_v8 = vrot.slane %v3941_v62, 4  ;;  %v3973_v27 = vsel %vm406_vm4, %v3957_v12, %v3972_v59 }
 0xac9   :  { %v3965_v25 = vperm.slane %v3959_v32, %v7036_v24  ;;  %v3981_v55 = vperm.slane %v3973_v27, %v7036_v24  ;;  %v3986_v23 = vrot.slane %v3977_v33, 4 }
 0xaca   :  { %v3961_v46 = vsel %vm406_vm4, %v3953_v53, %v3960_v8  ;;  %v3801_v1 = vpop.permute.xlu1 %3800  ;;  %v4001_v53 = vperm.slane %v3993_v19, %v7027_v13 }
 0xacb   :  { %v3969_v57 = vperm.slane %v3961_v46, %v7036_v24  ;;  %v3988_v26 = vrot.slane %v3981_v55, 4  ;;  %v3791_v30 = vpop.permute.xlu2 %3790  ;;  %v3789_v6 = vpop.permute.xlu0 %3788  ;;  %v3982_v14 = vrot.slane %v3965_v25, 4  ;;  %v3987_v31 = vsel %vm406_vm4, 0.0, %v3986_v23 }
 0xacc   :  { %v3890_v59 = vrot.slane %v3801_v1, 4  ;;  %v3822_v32 = vrot.slane %v3791_v30, 4  ;;  %v4004_v27 = vrot.slane %v3789_v6, 4  ;;  %v3824_v23 = vrot.slane %v8793_v41, 4 }
 0xacd   :  { %v3984_v28 = vrot.slane %v3969_v57, 4  ;;  %v3989_v12 = vsel %vm406_vm4, 0.0, %v3988_v26  ;;  %v4165_v3 = vsel %vm406_vm4, %v3988_v26, %v3977_v33  ;;  %v3997_v33 = vperm.slane %v3991_v0, %v7027_v13 }
 0xace   :  { %v4170_v36 = vrot.slane %v3989_v12, 4  ;;  %v8815_v51 = vperm.slane %v4165_v3, %v7027_v13  ;;  %v3983_v58 = vsel %vm406_vm4, 0.0, %v3982_v14  ;;  %v4028_v57 = vrot.slane %v4001_v53, 4 }
 0xacf   :  { %v3985_v17 = vsel %vm406_vm4, 0.0, %v3984_v28  ;;  %v4154_v8 = vsel %vm406_vm4, %v3984_v28, %v3965_v25  ;;  %v3893_v26 = vsel %vm406_vm4, %v3801_v1, %v3892_v52  ;;  %v3891_v28 = vsel %vm406_vm4, %v3890_v59, %v8785_v20 }
 0xad0   :  { %v4159_v62 = vrot.slane %v3985_v17, 4  ;;  %v4171_v38 = vsel %vm406_vm4, %v4170_v36, %v3987_v31  ;;  %v4158_v5 = vperm.slane %v4154_v8, %v7027_v13  ;;  %v4190_v25 = vrot.slane %v8815_v51, 4 }
 0xad1   :  { %v8827_v46 = vperm.slane %v4171_v38, %v7027_v13  ;;  %v3823_v36 = vsel %vm406_vm4, %v3822_v32, %v8793_v41  ;;  %v4016_v52 = vrot.slane %v3997_v33, 4  ;;  %v3825_v20 = vsel %vm406_vm4, %v3791_v30, %v3824_v23 }
 0xad2   :  { %v8822_v55 = vpop.permute.xlu1 %3798  ;;  %v4160_v22 = vsel %vm406_vm4, %v4159_v62, %v3983_v58  ;;  %v4178_v31 = vrot.slane %v4158_v5, 4  ;;  %v8844_v62 = vperm.slane %v3893_v26, %v7027_v13  ;;  %v8849_v59 = vperm.slane %v3891_v28, %v7027_v13 }
 0xad3   :  { %v8831_v19 = vpop.permute.xlu2 %6378  ;;  %v3805_v14 = vpop.permute.xlu0 %3804  ;;  %v4164_v0 = vperm.slane %v4160_v22, %v7027_v13  ;;  %v4191_v1 = vsel %vm406_vm4, %v8827_v46, %v4190_v25  ;;  %v8854_v8 = vperm.slane %v3823_v36, %v7027_v13  ;;  %v8864_v25 = vperm.slane %v3825_v20, %v7027_v13 }
 0xad4   :  { %9929 = vst [vmem:[#allocation17_spill] sm:$0xff] %v8831_v19  ;;  %v4002_v12 = vrot.slane %v3805_v14, 4  ;;  %v4005_v3 = vsel %vm406_vm4, %v3805_v14, %v4004_v27  ;;  %v8858_v22 = vperm.slane %v4191_v1, %v7036_v24  ;;  %v3902_v20 = vrot.slane %v8849_v59, 4 }
 0xad5   :  { %v4013_v17 = vperm.slane %v4005_v3, %v7027_v13  ;;  %v4176_v26 = vrot.slane %v4164_v0, 4  ;;  %v4179_v14 = vsel %vm406_vm4, %v4164_v0, %v4178_v31  ;;  %v3880_v31 = vrot.slane %v8791_v15, 4 }
 0xad6   :  { %v4003_v38 = vsel %vm406_vm4, %v4002_v12, %v3789_v6 }
 0xad7   :  { %v4009_v58 = vperm.slane %v4003_v38, %v7027_v13  ;;  %v4026_v41 = vrot.slane %v4013_v17, 4  ;;  %v4029_v32 = vsel %vm406_vm4, %v4013_v17, %v4028_v57  ;;  %v4177_v0 = vsel %vm406_vm4, %v4176_v26, %v4158_v5 }
 0xad8   :  { %v4037_v27 = vperm.slane %v4029_v32, %v7036_v24  ;;  %v3914_v38 = vrot.slane %v8844_v62, 4  ;;  %v8886_v26 = vperm.slane %v4177_v0, %v7036_v24 }
 0xad9   :  { %v4014_v30 = vrot.slane %v4009_v58, 4  ;;  %v4017_v6 = vsel %vm406_vm4, %v4009_v58, %v4016_v52  ;;  %v4027_v23 = vsel %vm406_vm4, %v4026_v41, %v4001_v53  ;;  %v8873_v52 = vperm.slane %v4179_v14, %v7036_v24 }
 0xada   :  { %v4025_v57 = vperm.slane %v4017_v6, %v7036_v24  ;;  %v4044_v28 = vrot.slane %v4037_v27, 4  ;;  %v8867_v12 = vpop.permute.xlu1 %6368  ;;  %v4033_v36 = vperm.slane %v4027_v23, %v7036_v24  ;;  %v4204_v53 = vrot.slane %v8858_v22, 4 }
 0xadb   :  { %9930 = vst [vmem:[#allocation18_spill] sm:$0xff] %v8867_v12  ;;  %v4015_v3 = vsel %vm406_vm4, %v4014_v30, %v3997_v33  ;;  %v6370_v17 = vunpack.i.l.bf16 %v8867_v12  ;;  %v6384_v1 = vpop.permute.xlu2 %6383  ;;  %v3793_v58 = vpop.permute.xlu0 %3792 }
 0xadc   :  { %v4021_v32 = vperm.slane %v4015_v3, %v7036_v24  ;;  %v4040_v27 = vrot.slane %v4025_v57, 4  ;;  %v4045_v30 = vsel %vm406_vm4, 0.0, %v4044_v28  ;;  %v4042_v23 = vrot.slane %v4033_v36, 4 }
 0xadd   :  { %v6386_v5 = vunpack.i.h.bf16 %v6384_v1  ;;  %v4480_v14 = vrot.slane %v6370_v17, 4  ;;  %v3878_v18 = vrot.slane %v3793_v58, 4  ;;  %v8890_v33 = vsel %vm406_vm4, %v4204_v53, %v8873_v52 }
 0xade   :  { %v4219_v3 = vsel %vm406_vm4, %v4044_v28, %v4033_v36  ;;  %v4224_v57 = vrot.slane %v4045_v30, 4  ;;  %v3881_v9 = vsel %vm406_vm4, %v3793_v58, %v3880_v31  ;;  %v4038_v6 = vrot.slane %v4021_v32, 4 }
 0xadf   :  { %v4478_v35 = vrot.slane %v6386_v5, 4  ;;  %v8896_v49 = vsel %vm406_vm4, 0.0, %v4040_v27  ;;  %v3879_v0 = vsel %vm406_vm4, %v3878_v18, %v8791_v15  ;;  %v3889_v61 = vperm.slane %v3881_v9, %v7027_v13 }
 0xae0   :  { %v4043_v53 = vsel %vm406_vm4, 0.0, %v4042_v23  ;;  %v6385_v41 = vunpack.i.l.bf16 %v6384_v1  ;;  %v3885_v28 = vperm.slane %v3879_v0, %v7027_v13  ;;  %v4481_v58 = vsel %vm406_vm4, %v6386_v5, %v4480_v14 }
 0xae1   :  { %v4479_v31 = vsel %vm406_vm4, %v4478_v35, %v6370_v17  ;;  %v3915_v30 = vsel %vm406_vm4, %v3914_v38, %v3889_v61  ;;  %v3916_v19 = vrot.slane %v3889_v61, 4  ;;  %v4208_v23 = vsel %vm406_vm4, %v4040_v27, %v4021_v32 }
 0xae2   :  { %v8901_v45 = vpop.permute.xlu1 %6388  ;;  %v3903_v18 = vsel %vm406_vm4, %v3902_v20, %v3885_v28  ;;  %v3904_v15 = vrot.slane %v3885_v28, 4  ;;  %v3921_v9 = vperm.slane %v3915_v30, %v7036_v24  ;;  %v8913_v1 = vperm.slane %v4219_v3, %v7027_v13 }
 0xae3   :  { %9931 = vst [vmem:[#allocation19_spill] sm:$0xff] %v8901_v45  ;;  %v6391_v36 = vunpack.i.h.bf16 %v8901_v45  ;;  %v4225_v0 = vsel %vm406_vm4, %v4224_v57, %v4043_v53  ;;  %v3917_v35 = vsel %vm406_vm4, %v8844_v62, %v3916_v19  ;;  %v4485_v17 = vperm.slane %v4479_v31, %v7027_v13 }
 0xae4   :  { %v4489_v61 = vperm.slane %v4481_v58, %v7027_v13  ;;  %v3905_v20 = vsel %vm406_vm4, %v8849_v59, %v3904_v15  ;;  %v3925_v38 = vperm.slane %v3917_v35, %v7036_v24  ;;  %v4492_v5 = vrot.slane %v6385_v41, 4 }
 0xae5   :  { %v4490_v12 = vrot.slane %v6391_v36, 4  ;;  %v8924_v32 = vperm.slane %v3903_v18, %v7036_v24  ;;  %v3913_v27 = vperm.slane %v3905_v20, %v7036_v24  ;;  %v3930_v14 = vrot.slane %v3921_v9, 4 }
 0xae6   :  { %v4039_v3 = vsel %vm406_vm4, 0.0, %v4038_v6  ;;  %v4213_v19 = vrot.slane %v8896_v49, 4  ;;  %v3932_v62 = vrot.slane %v3925_v38, 4  ;;  %v8931_v53 = vperm.slane %v4225_v0, %v7027_v13  ;;  %v3783_v0 = vpop.permute.xlu0 %3782 }
 0xae7   :  { %v4491_v57 = vsel %vm406_vm4, %v4490_v12, %v6385_v41  ;;  %v8933_v59 = vrot.slane %v3913_v27, 4  ;;  %v4493_v28 = vsel %vm406_vm4, %v6391_v36, %v4492_v5  ;;  %v4504_v58 = vrot.slane %v4485_v17, 4 }
 0xae8   :  { %v4497_v31 = vperm.slane %v4491_v57, %v7027_v13  ;;  %v4516_v30 = vrot.slane %v4489_v61, 4  ;;  %v3933_v18 = vsel %vm406_vm4, 0.0, %v3932_v62  ;;  %v4501_v6 = vperm.slane %v4493_v28, %v7027_v13 }
 0xae9   :  { %v4244_v49 = vrot.slane %v8913_v1, 4  ;;  %v3931_v12 = vsel %vm406_vm4, 0.0, %v3930_v14  ;;  %v4111_v35 = vsel %vm406_vm4, %v3932_v62, %v3921_v9  ;;  %v8947_v5 = vsel %vm406_vm4, 0.0, %v8933_v59 }
 0xaea   :  { %v4502_v41 = vrot.slane %v4497_v31, 4  ;;  %v4505_v36 = vsel %vm406_vm4, %v4497_v31, %v4504_v58  ;;  %v4514_v20 = vrot.slane %v4501_v6, 4  ;;  %v4517_v38 = vsel %vm406_vm4, %v4501_v6, %v4516_v30 }
 0xaeb   :  { %v4116_v27 = vrot.slane %v3933_v18, 4  ;;  %v4513_v57 = vperm.slane %v4505_v36, %v7036_v24  ;;  %v4525_v28 = vperm.slane %v4517_v38, %v7036_v24  ;;  %v9932_v9 = vrot.slane %v8822_v55, 4 }
 0xaec   :  { %v4503_v14 = vsel %vm406_vm4, %v4502_v41, %v4485_v17  ;;  %v4515_v15 = vsel %vm406_vm4, %v4514_v20, %v4489_v61  ;;  %v3836_v31 = vrot.slane %v3783_v0, 4  ;;  %v8957_v58 = vperm.slane %v4111_v35, %v7027_v13 }
 0xaed   :  { %v3835_v62 = vsel %vm406_vm4, %v9932_v9, %v3783_v0  ;;  %v8959_v30 = vrot.slane %v4513_v57, 4  ;;  %v8961_v6 = vrot.slane %v4525_v28, 4  ;;  %v4212_v61 = vperm.slane %v4208_v23, %v7027_v13 }
 0xaee   :  { %v3841_v18 = vperm.slane %v3835_v62, %v7027_v13  ;;  %v3837_v17 = vsel %vm406_vm4, %v8822_v55, %v3836_v31  ;;  %v4214_v41 = vsel %vm406_vm4, %v4213_v19, %v4039_v3  ;;  %v8970_v0 = vsel %vm406_vm4, %v4116_v27, %v3931_v12 }
 0xaef   :  { %v8973_v35 = vperm.slane %v4503_v14, %v7036_v24  ;;  %v8976_v20 = vperm.slane %v4515_v15, %v7036_v24  ;;  %v3845_v38 = vperm.slane %v3837_v17, %v7027_v13  ;;  %v8981_v57 = vsel %vm406_vm4, 0.0, %v8959_v30 }
 0xaf0   :  { %v8985_v55 = vsel %vm406_vm4, 0.0, %v8961_v6  ;;  %v3846_v23 = vrot.slane %v3841_v18, 4  ;;  %v9933_v3 = vrot.slane %v8854_v8, 4  ;;  %v9934_v15 = vrot.slane %v8864_v25, 4 }
 0xaf1   :  { %v3858_v27 = vrot.slane %v3845_v38, 4  ;;  %v4218_v14 = vperm.slane %v4214_v41, %v7027_v13  ;;  %v4232_v31 = vrot.slane %v4212_v61, 4  ;;  %v4245_v17 = vsel %vm406_vm4, %v8931_v53, %v4244_v49 }
 0xaf2   :  { %v3849_v19 = vsel %vm406_vm4, %v3841_v18, %v9933_v3  ;;  %v3861_v28 = vsel %vm406_vm4, %v3845_v38, %v9934_v15  ;;  %v3847_v9 = vsel %vm406_vm4, %v3846_v23, %v8854_v8  ;;  %v4253_v36 = vperm.slane %v4245_v17, %v7036_v24 }
 0xaf3   :  { %v3857_v12 = vperm.slane %v3849_v19, %v7036_v24  ;;  %v3869_v62 = vperm.slane %v3861_v28, %v7036_v24  ;;  %v3853_v18 = vperm.slane %v3847_v9, %v7036_v24  ;;  %v3859_v3 = vsel %vm406_vm4, %v3858_v27, %v8864_v25 }
 0xaf4   :  { %v4233_v15 = vsel %vm406_vm4, %v4218_v14, %v4232_v31  ;;  %v4230_v8 = vrot.slane %v4218_v14, 4  ;;  %v3865_v23 = vperm.slane %v3859_v3, %v7036_v24  ;;  %v4258_v31 = vrot.slane %v4253_v36, 4 }
 0xaf5   :  { %v3872_v19 = vrot.slane %v3857_v12, 4  ;;  %v3876_v41 = vrot.slane %v3869_v62, 4  ;;  %v3870_v28 = vrot.slane %v3853_v18, 4  ;;  %v4241_v49 = vperm.slane %v4233_v15, %v7036_v24 }
 0xaf6   :  { %v4231_v14 = vsel %vm406_vm4, %v4230_v8, %v4212_v61  ;;  %v4242_v15 = vrot.slane %v8931_v53, 4  ;;  %v3874_v9 = vrot.slane %v3865_v23, 4 }
 0xaf7   :  { %v3873_v45 = vsel %vm406_vm4, 0.0, %v3872_v19  ;;  %v4046_v27 = vsel %vm406_vm4, %v3872_v19, %v3853_v18  ;;  %v3877_v62 = vsel %vm406_vm4, 0.0, %v3876_v41  ;;  %v3871_v3 = vsel %vm406_vm4, 0.0, %v3870_v28 }
 0xaf8   :  { %v4051_v17 = vrot.slane %v3873_v45, 4  ;;  %v4237_v38 = vperm.slane %v4231_v14, %v7036_v24  ;;  %v4260_v54 = vrot.slane %v4241_v49, 4  ;;  %v9019_v25 = vperm.slane %v4046_v27, %v7027_v13 }
 0xaf9   :  { %v4259_v12 = vsel %vm406_vm4, %v4258_v31, %v4241_v49  ;;  %v9935_v18 = vrot.slane %v8827_v46, 4  ;;  %v4243_v61 = vsel %vm406_vm4, %v4242_v15, %v8913_v1  ;;  %v4062_v27 = vrot.slane %v3877_v62, 4 }
 0xafa   :  { %6262 = vmatpush.xpose.msk.msra.mxu3 %vm146_vm0, %v4259_v12  ;;  %v4261_v19 = vsel %vm406_vm4, %v4253_v36, %v4260_v54  ;;  %v4256_v53 = vrot.slane %v4237_v38, 4  ;;  %v4052_v28 = vsel %vm406_vm4, %v4051_v17, %v3871_v3  ;;  %v4249_v49 = vperm.slane %v4243_v61, %v7036_v24 }
 0xafb   :  { %v4189_v45 = vsel %vm406_vm4, %v9935_v18, %v8815_v51  ;;  %6270 = vmatpush.xpose.msk.msrb.mxu0 %vm146_vm0, %v4261_v19  ;;  %v4206_v46 = vrot.slane %v8873_v52, 4  ;;  %v4202_v12 = vrot.slane %v8886_v26, 4  ;;  %v9936_v31 = vrot.slane %v8924_v32, 4 }
 0xafc   :  { %v4195_v8 = vperm.slane %v4189_v45, %v7036_v24  ;;  %v4100_v54 = vsel %vm406_vm4, %v8933_v59, %v8924_v32  ;;  %v4254_v36 = vrot.slane %v4249_v49, 4  ;;  %v4257_v62 = vsel %vm406_vm4, %v4249_v49, %v4256_v53 }
 0xafd   :  { %v3927_v1 = vsel %vm406_vm4, 0.0, %v9936_v31  ;;  %v4207_v17 = vsel %vm406_vm4, %v8858_v22, %v4206_v46  ;;  %v4104_v14 = vperm.slane %v4100_v54, %v7027_v13  ;;  %6254 = vmatpush.xpose.msk.msra.mxu1 %vm146_vm0, %v4257_v62  ;;  %v9937_v32 = vrot.slane %v8947_v5, 4 }
 0xafe   :  { %v4200_v51 = vrot.slane %v4195_v8, 4  ;;  %6263 = vmatpush.xpose.msk.msra.mxu3 %vm146_vm0, %v8890_v33  ;;  %v4203_v3 = vsel %vm406_vm4, %v4195_v8, %v4202_v12  ;;  %v4136_v15 = vrot.slane %v8957_v58, 4  ;;  %v4255_v22 = vsel %vm406_vm4, %v4254_v36, %v4237_v38 }
 0xaff   :  { %v4106_v59 = vsel %vm406_vm4, %v9937_v32, %v3927_v1  ;;  %6271 = vmatpush.xpose.msk.msrb.mxu0 %vm146_vm0, %v4207_v17  ;;  %v4121_v33 = vperm.slane %v8970_v0, %v7027_v13  ;;  %v4124_v45 = vrot.slane %v4104_v14, 4  ;;  %6246 = vmatpush.xpose.msk.msrb.mxu2 %vm146_vm0, %v4255_v22  ;;  %v4056_v5 = vperm.slane %v4052_v28, %v7027_v13 }
 0xb00   :  { %v4201_v52 = vsel %vm406_vm4, %v4200_v51, %v8886_v26  ;;  %v4110_v18 = vperm.slane %v4106_v59, %v7027_v13  ;;  %v3875_v26 = vsel %vm406_vm4, 0.0, %v3874_v9  ;;  %v4057_v61 = vsel %vm406_vm4, %v3876_v41, %v3865_v23 }
 0xb01   :  { %v4070_v19 = vrot.slane %v9019_v25, 4  ;;  %v4137_v53 = vsel %vm406_vm4, %v4121_v33, %v4136_v15  ;;  %v4134_v49 = vrot.slane %v4121_v33, 4  ;;  %6255 = vmatpush.xpose.msk.msra.mxu1 %vm146_vm0, %v4203_v3  ;;  %v4061_v9 = vperm.slane %v4057_v61, %v7027_v13 }
 0xb02   :  { %v4125_v38 = vsel %vm406_vm4, %v4110_v18, %v4124_v45  ;;  %v4122_v8 = vrot.slane %v4110_v18, 4  ;;  %v4145_v46 = vperm.slane %v4137_v53, %v7036_v24  ;;  %v4063_v28 = vsel %vm406_vm4, %v4062_v27, %v3875_v26 }
 0xb03   :  { %v4133_v0 = vperm.slane %v4125_v38, %v7036_v24  ;;  %v4135_v23 = vsel %vm406_vm4, %v4134_v49, %v8957_v58  ;;  %v4067_v51 = vperm.slane %v4063_v28, %v7027_v13  ;;  %v4071_v12 = vsel %vm406_vm4, %v4056_v5, %v4070_v19  ;;  %6247 = vmatpush.xpose.msk.msrb.mxu2 %vm146_vm0, %v4201_v52 }
 0xb04   :  { %v4123_v41 = vsel %vm406_vm4, %v4122_v8, %v4104_v14  ;;  %v4150_v31 = vrot.slane %v4145_v46, 4  ;;  %v4141_v54 = vperm.slane %v4135_v23, %v7036_v24  ;;  %v4079_v62 = vperm.slane %v4071_v12, %v7036_v24 }
 0xb05   :  { %v4129_v1 = vperm.slane %v4123_v41, %v7036_v24  ;;  %v4152_v36 = vrot.slane %v4133_v0, 4  ;;  %v4082_v27 = vrot.slane %v4061_v9, 4  ;;  %v4068_v17 = vrot.slane %v4056_v5, 4 }
 0xb06   :  { %v4080_v14 = vrot.slane %v4067_v51, 4  ;;  %v4151_v3 = vsel %vm406_vm4, %v4150_v31, %v4133_v0  ;;  %v4146_v58 = vrot.slane %v4141_v54, 4  ;;  %v4098_v15 = vrot.slane %v4079_v62, 4 }
 0xb07   :  { %v4153_v32 = vsel %vm406_vm4, %v4145_v46, %v4152_v36  ;;  %v4148_v59 = vrot.slane %v4129_v1, 4  ;;  %6264 = vmatpush.xpose.msk.msra.mxu3 %vm146_vm0, %v4151_v3  ;;  %v4083_v52 = vsel %vm406_vm4, %v4067_v51, %v4082_v27  ;;  %v4069_v22 = vsel %vm406_vm4, %v4068_v17, %v9019_v25 }
 0xb08   :  { %6272 = vmatpush.xpose.msk.msrb.mxu0 %vm146_vm0, %v4153_v32  ;;  %v4081_v18 = vsel %vm406_vm4, %v4080_v14, %v4061_v9  ;;  %v4147_v33 = vsel %vm406_vm4, %v4146_v58, %v4129_v1  ;;  %v4091_v26 = vperm.slane %v4083_v52, %v7036_v24  ;;  %v4075_v5 = vperm.slane %v4069_v22, %v7036_v24 }
 0xb09   :  { %v4149_v45 = vsel %vm406_vm4, %v4141_v54, %v4148_v59  ;;  %6248 = vmatpush.xpose.msk.msrb.mxu2 %vm146_vm0, %v4147_v33  ;;  %v4087_v61 = vperm.slane %v4081_v18, %v7036_v24  ;;  %v9938_v19 = vrot.slane %v8973_v35, 4  ;;  %v9939_v38 = vrot.slane %v8976_v20, 4 }
 0xb0a   :  { %6256 = vmatpush.xpose.msk.msra.mxu1 %vm146_vm0, %v4149_v45  ;;  %v4696_v8 = vsel %vm406_vm4, %v8959_v30, %v8973_v35  ;;  %v4099_v49 = vsel %vm406_vm4, %v4091_v26, %v4098_v15  ;;  %v4094_v0 = vrot.slane %v4075_v5, 4  ;;  %v4096_v46 = vrot.slane %v4091_v26, 4 }
 0xb0b   :  { %v4527_v25 = vsel %vm406_vm4, 0.0, %v9938_v19  ;;  %v4531_v53 = vsel %vm406_vm4, 0.0, %v9939_v38  ;;  %v4700_v9 = vperm.slane %v4696_v8, %v7027_v13  ;;  %v9940_v28 = vrot.slane %v8981_v57, 4 }
 0xb0c   :  { %6273 = vmatpush.xpose.msk.msrb.mxu0 %vm146_vm0, %v4099_v49  ;;  %v4707_v23 = vsel %vm406_vm4, %v8961_v6, %v8976_v20  ;;  %v9941_v51 = vrot.slane %v8985_v55, 4  ;;  %v4092_v35 = vrot.slane %v4087_v61, 4  ;;  %v4095_v12 = vsel %vm406_vm4, %v4087_v61, %v4094_v0 }
 0xb0d   :  { %v4702_v41 = vsel %vm406_vm4, %v9940_v28, %v4527_v25  ;;  %v4097_v31 = vsel %vm406_vm4, %v4096_v46, %v4079_v62  ;;  %v4711_v54 = vperm.slane %v4707_v23, %v7027_v13  ;;  %v4720_v6 = vrot.slane %v4700_v9, 4 }
 0xb0e   :  { %v4713_v30 = vsel %vm406_vm4, %v9941_v51, %v4531_v53  ;;  %v4706_v1 = vperm.slane %v4702_v41, %v7027_v13  ;;  %6257 = vmatpush.xpose.msk.msra.mxu1 %vm146_vm0, %v4095_v12  ;;  %6265 = vmatpush.xpose.msk.msra.mxu3 %vm146_vm0, %v4097_v31  ;;  %v4093_v20 = vsel %vm406_vm4, %v4092_v35, %v4075_v5 }
 0xb0f   :  { %v4717_v57 = vperm.slane %v4713_v30, %v7027_v13  ;;  %v4732_v55 = vrot.slane %v4711_v54, 4  ;;  %6274 = vmatmul.msk.f32.vlgmr.msrb.gmra.mxu0 %vm146_vm0, %v8748_v40  ;;  %6249 = vmatpush.xpose.msk.msrb.mxu2 %vm146_vm0, %v4093_v20  ;;  %v6392_v31 = vpack.i.bf16 %v8427_v34, %v8531_v37 }
 0xb10   :  { %v4718_v36 = vrot.slane %v4706_v1, 4  ;;  %v4721_v62 = vsel %vm406_vm4, %v4706_v1, %v4720_v6  ;;  %v9942_v1 = vpack.i.bf16 %v8589_v42, %v8542_v44  ;;  %v9233_v6 = vpop.permute.xlu0 %6373 }
 0xb11   :  { %v4730_v27 = vrot.slane %v4717_v57, 4  ;;  %v4729_v17 = vperm.slane %v4721_v62, %v7036_v24  ;;  %v4733_v14 = vsel %vm406_vm4, %v4717_v57, %v4732_v55  ;;  %6258 = vmatmul.msk.f32.vlgmr.msra.gmra.mxu1 %vm146_vm0, %v8759_v2  ;;  %6266 = vmatmul.msk.f32.vlgmr.msra.gmra.mxu3 %vm146_vm0, %v8739_v4 }
 0xb12   :  { %v4719_v3 = vsel %vm406_vm4, %v4718_v36, %v4700_v9  ;;  %v4741_v40 = vperm.slane %v4733_v14, %v7036_v24  ;;  %6250 = vmatmul.msk.f32.vlgmr.msrb.gmra.mxu2 %vm146_vm0, %v8751_v60 }
 0xb13   :  { %v4725_v58 = vperm.slane %v4719_v3, %v7036_v24  ;;  %v4731_v32 = vsel %vm406_vm4, %v4730_v27, %v4711_v54  ;;  %v4748_v59 = vrot.slane %v4729_v17, 4  ;;  %v9943_v54 = vld [vmem:[#allocation16_spill] sm:$0xff] }
 0xb14   :  { %v4737_v52 = vperm.slane %v4731_v32, %v7036_v24  ;;  %v4746_v15 = vrot.slane %v4741_v40, 4  ;;  %v6402_v57 = vpack.i.bf16 %v9943_v54, %v8433_v10 }
 0xb15   :  { %v4744_v22 = vrot.slane %v4725_v58, 4  ;;  %v4749_v18 = vsel %vm406_vm4, %v4741_v40, %v4748_v59 }
 0xb16   :  { %v4742_v2 = vrot.slane %v4737_v52, 4  ;;  %5285 = vmatpush.msra.mxu0 %v4749_v18  ;;  %v4747_v4 = vsel %vm406_vm4, %v4746_v15, %v4729_v17 }
 0xb17   :  { %v4745_v33 = vsel %vm406_vm4, %v4737_v52, %v4744_v22  ;;  %5244 = vmatpush.msrb.mxu3 %v4747_v4  ;;  %6275 = vmatmul.msk.f32.gmra.mxu0 %vm146_vm0, %v8701_v39 }
 0xb18   :  { %5203 = vmatpush.msrb.mxu1 %v4745_v33  ;;  %v4743_v45 = vsel %vm406_vm4, %v4742_v2, %v4725_v58 }
 0xb19   :  { %5162 = vmatpush.msra.mxu2 %v4743_v45  ;;  %6259 = vmatmul.msk.f32.gmra.mxu1 %vm146_vm0, %v8722_v50 }
 0xb1a   :  { %6267 = vmatmul.msk.f32.gmra.mxu3 %vm146_vm0, %v8697_v63  ;;  %6251 = vmatmul.msk.f32.gmra.mxu2 %vm146_vm0, %v8714_v29 }
 0xb1f   :  { %6276 = vmatmul.msk.f32.gmra.mxu0 %vm146_vm0, %v8679_v16 }
 0xb21   :  { %6260 = vmatmul.msk.f32.gmra.mxu1 %vm146_vm0, %v8704_v7 }
 0xb22   :  { %6268 = vmatmul.msk.f32.gmra.mxu3 %vm146_vm0, %v8717_v21  ;;  %6252 = vmatmul.msk.f32.gmra.mxu2 %vm146_vm0, %v8727_v48 }
 0xb27   :  { %6277 = vmatmul.msk.f32.gmra.mxu0 %vm146_vm0, %v8774_v43 }
 0xb29   :  { %6261 = vmatmul.msk.f32.gmra.mxu1 %vm146_vm0, %v8780_v47 }
 0xb2a   :  { %6269 = vmatmul.msk.f32.gmra.mxu3 %vm146_vm0, %v8777_v11  ;;  %6253 = vmatmul.msk.f32.gmra.mxu2 %vm146_vm0, %v8783_v56 }
 0xb8c   :  { %v4950_v16 = vpop.f32.mrf.mxu0 }
 0xb8d   :  { %v4998_v63 = vsel %vm186_vm3, %v4950_v16, -inf }
 0xb8e   :  { %4999 = vmax.xlane.f32.xlu0 %v4998_v63  ;;  %v4844_v39 = vpop.f32.mrf.mxu1 }
 0xb8f   :  { %v4974_v7 = vsel %vm186_vm3, %v4844_v39, -inf }
 0xb90   :  { %4975 = vmax.xlane.f32.xlu1 %v4974_v7 }
 0xb94   :  { %v4897_v29 = vpop.f32.mrf.mxu3  ;;  %v9174_v48 = vpop.f32.mrf.mxu0 }
 0xb95   :  { %v4986_v21 = vsel %vm186_vm3, %v4897_v29, -inf  ;;  %v4791_v50 = vpop.f32.mrf.mxu2  ;;  %v5001_v26 = vsel %vm186_vm3, %v9174_v48, -inf }
 0xb96   :  { %4987 = vmax.xlane.f32.xlu0 %v4986_v21  ;;  %v4962_v60 = vsel %vm186_vm3, %v4791_v50, -inf  ;;  %v9177_v43 = vpop.f32.mrf.mxu1 }
 0xb97   :  { %4963 = vmax.xlane.f32.xlu2 %v4962_v60  ;;  %v4977_v56 = vsel %vm186_vm3, %v9177_v43, -inf }
 0xb9c   :  { %v9187_v5 = vpop.f32.mrf.mxu0 }
 0xb9d   :  { %v9179_v11 = vpop.f32.mrf.mxu3  ;;  %v9189_v61 = vpop.f32.mrf.mxu2  ;;  %v5004_v25 = vsel %vm186_vm3, %v9187_v5, -inf }
 0xb9e   :  { %v4989_v47 = vsel %vm186_vm3, %v9179_v11, -inf  ;;  %4978 = vmax.xlane.f32.xlu0 %v4977_v56  ;;  %v4965_v53 = vsel %vm186_vm3, %v9189_v61, -inf  ;;  %v9199_v8 = vpop.f32.mrf.mxu1 }
 0xb9f   :  { %4990 = vmax.xlane.f32.xlu1 %v4989_v47  ;;  %5002 = vmax.xlane.f32.xlu2 %v5001_v26  ;;  %v4980_v28 = vsel %vm186_vm3, %v9199_v8, -inf }
 0xba4   :  { %v9201_v49 = vpop.f32.mrf.mxu0 }
 0xba5   :  { %v9191_v19 = vpop.f32.mrf.mxu3  ;;  %v9203_v0 = vpop.f32.mrf.mxu2  ;;  %v5007_v46 = vsel %vm186_vm3, %v9201_v49, -inf }
 0xba6   :  { %v4992_v38 = vsel %vm186_vm3, %v9191_v19, -inf  ;;  %v4968_v9 = vsel %vm186_vm3, %v9203_v0, -inf  ;;  %v9211_v41 = vpop.f32.mrf.mxu1 }
 0xba7   :  { %5005 = vmax.xlane.f32.xlu1 %v5004_v25  ;;  %4993 = vmax.xlane.f32.xlu0 %v4992_v38  ;;  %v4983_v51 = vsel %vm186_vm3, %v9211_v41, -inf }
 0xba8   :  { %4966 = vmax.xlane.f32.xlu2 %v4965_v53 }
 0xbad   :  { %v9213_v23 = vpop.f32.mrf.mxu3  ;;  %v9219_v35 = vpop.f32.mrf.mxu2 }
 0xbae   :  { %v4995_v30 = vsel %vm186_vm3, %v9213_v23, -inf  ;;  %v4971_v12 = vsel %vm186_vm3, %v9219_v35, -inf }
 0xbaf   :  { %5008 = vmax.xlane.f32.xlu0 %v5007_v46  ;;  %4969 = vmax.xlane.f32.xlu1 %v4968_v9 }
 0xbb0   :  { %4981 = vmax.xlane.f32.xlu2 %v4980_v28 }
 0xbb7   :  { %4984 = vmax.xlane.f32.xlu0 %v4983_v51 }
 0xbb8   :  { %4996 = vmax.xlane.f32.xlu2 %v4995_v30 }
 0xbbf   :  { %4972 = vmax.xlane.f32.xlu0 %v4971_v12 }
 0xbc8   :  { %6393 = vrot.lane.b32.xlu1 %v6392_v31, %s6737_s22 }
 0xbd0   :  { %6398 = vrot.lane.b32.xlu2 %v9942_v1, %s6737_s22 }
 0xbd3   :  { %6403 = vrot.lane.b32.xlu0 %v6402_v57, %s6737_s22 }
 0xc01   :  { %v5000_v20 = vpop.xlane.xlu0 %4999 }
 0xc02   :  { %v5022_v55 = vsub.f32 %v4950_v16, %v5000_v20  ;;  %v9944_v20 = vld [vmem:[#allocation19_spill] sm:$0xff] }
 0xc03   :  { %v4976_v36 = vpop.xlane.xlu1 %4975 }
 0xc04   :  { %v5050_v62 = vmul.f32 1.442695, %v5022_v55  ;;  %v5014_v27 = vsub.f32 %v4844_v39, %v4976_v36  ;;  %v6390_v55 = vunpack.i.l.bf16 %v9944_v20 }
 0xc06   :  { %6498 = vpow2.f32 %v5050_v62  ;;  %v5034_v34 = vmul.f32 1.442695, %v5014_v27  ;;  %v9945_v62 = vld [vmem:[#allocation18_spill] sm:$0xff] }
 0xc07   :  { %v6371_v27 = vunpack.i.h.bf16 %v9945_v62 }
 0xc08   :  { %6500 = vpow2.f32 %v5034_v34 }
 0xc09   :  { %v4988_v37 = vpop.xlane.xlu0 %4987 }
 0xc0a   :  { %v5018_v17 = vsub.f32 %v4897_v29, %v4988_v37  ;;  %v4964_v14 = vpop.xlane.xlu2 %4963 }
 0xc0b   :  { %v5010_v44 = vsub.f32 %v4791_v50, %v4964_v14 }
 0xc0c   :  { %v9235_v42 = vpop.eup %6498  ;;  %v5042_v3 = vmul.f32 1.442695, %v5018_v17 }
 0xc0d   :  { %v5026_v10 = vmul.f32 1.442695, %v5010_v44  ;;  %v5094_v40 = vsel %vm186_vm3, %v9235_v42, 0.0 }
 0xc0e   :  { %v9239_v58 = vpop.eup %6500  ;;  %6502 = vpow2.f32 %v5042_v3  ;;  %5095 = vadd.xlane.f32.xlu2 %v5094_v40  ;;  %v4424_v3 = vrot.slane %v6371_v27, 4 }
 0xc0f   :  { %6504 = vpow2.f32 %v5026_v10  ;;  %v5070_v32 = vsel %vm186_vm3, %v9239_v58, 0.0 }
 0xc10   :  { %5071 = vadd.xlane.f32.xlu0 %v5070_v32 }
 0xc11   :  { %v4979_v52 = vpop.xlane.xlu0 %4978 }
 0xc12   :  { %v4991_v59 = vpop.xlane.xlu1 %4990  ;;  %v5003_v22 = vpop.xlane.xlu2 %5002 }
 0xc13   :  { %v5019_v15 = vsub.f32 %v9179_v11, %v4991_v59  ;;  %v5023_v18 = vsub.f32 %v9174_v48, %v5003_v22  ;;  %v5015_v11 = vsub.f32 %v9177_v43, %v4979_v52  ;;  %v4425_v52 = vsel %vm406_vm4, %v6390_v55, %v4424_v3 }
 0xc14   :  { %v9245_v2 = vpop.eup %6502 }
 0xc15   :  { %v5044_v4 = vmul.f32 1.442695, %v5019_v15  ;;  %v9247_v33 = vpop.eup %6504  ;;  %v5052_v45 = vmul.f32 1.442695, %v5023_v18  ;;  %v5082_v16 = vsel %vm186_vm3, %v9245_v2, 0.0 }
 0xc16   :  { %5083 = vadd.xlane.f32.xlu1 %v5082_v16  ;;  %v5058_v63 = vsel %vm186_vm3, %v9247_v33, 0.0 }
 0xc17   :  { %6506 = vpow2.f32 %v5044_v4  ;;  %5059 = vadd.xlane.f32.xlu2 %v5058_v63 }
 0xc18   :  { %6508 = vpow2.f32 %v5052_v45  ;;  %v9946_v45 = vld [vmem:[#allocation17_spill] sm:$0xff] }
 0xc19   :  { %v6380_v16 = vunpack.i.l.bf16 %v9946_v45 }
 0xc1a   :  { %v5006_v39 = vpop.xlane.xlu1 %5005  ;;  %v4994_v7 = vpop.xlane.xlu0 %4993 }
 0xc1b   :  { %v5020_v29 = vsub.f32 %v9191_v19, %v4994_v7  ;;  %v4967_v21 = vpop.xlane.xlu2 %4966  ;;  %v5036_v19 = vmul.f32 1.442695, %v5015_v11  ;;  %v5024_v43 = vsub.f32 %v9187_v5, %v5006_v39  ;;  %v4312_v11 = vrot.slane %v6380_v16, 4 }
 0xc1c   :  { %v5011_v50 = vsub.f32 %v9189_v61, %v4967_v21  ;;  %v6375_v21 = vunpack.i.l.bf16 %v9233_v6 }
 0xc1d   :  { %v9255_v48 = vpop.eup %6506  ;;  %v5046_v60 = vmul.f32 1.442695, %v5020_v29  ;;  %v5054_v31 = vmul.f32 1.442695, %v5024_v43  ;;  %v4433_v29 = vperm.slane %v4425_v52, %v7027_v13 }
 0xc1e   :  { %v5028_v47 = vmul.f32 1.442695, %v5011_v50  ;;  %v5085_v56 = vsel %vm186_vm3, %v9255_v48, 0.0  ;;  %v9260_v26 = vpop.eup %6508  ;;  %v4368_v43 = vrot.slane %v6375_v21, 4 }
 0xc1f   :  { %5086 = vadd.xlane.f32.xlu0 %v5085_v56  ;;  %6510 = vpow2.f32 %v5046_v60  ;;  %v5097_v25 = vsel %vm186_vm3, %v9260_v26, 0.0  ;;  %v6381_v60 = vunpack.i.h.bf16 %v9946_v45 }
 0xc20   :  { %6512 = vpow2.f32 %v5028_v47  ;;  %5098 = vadd.xlane.f32.xlu1 %v5097_v25 }
 0xc21   :  { %6514 = vpow2.f32 %v5036_v19  ;;  %v4380_v3 = vrot.slane %v6381_v60, 4 }
 0xc22   :  { %v4970_v61 = vpop.xlane.xlu1 %4969  ;;  %v5009_v38 = vpop.xlane.xlu0 %5008 }
 0xc23   :  { %v5012_v53 = vsub.f32 %v9203_v0, %v4970_v61  ;;  %v4982_v46 = vpop.xlane.xlu2 %4981  ;;  %v5025_v36 = vsub.f32 %v9201_v49, %v5009_v38 }
 0xc24   :  { %v5016_v34 = vsub.f32 %v9199_v8, %v4982_v46  ;;  %v4460_v46 = vrot.slane %v4433_v29, 4 }
 0xc25   :  { %v5030_v9 = vmul.f32 1.442695, %v5012_v53  ;;  %v9266_v28 = vpop.eup %6510  ;;  %v5056_v44 = vmul.f32 1.442695, %v5025_v36 }
 0xc26   :  { %v9268_v51 = vpop.eup %6512  ;;  %v5088_v30 = vsel %vm186_vm3, %v9266_v28, 0.0  ;;  %v5038_v10 = vmul.f32 1.442695, %v5016_v34 }
 0xc27   :  { %6516 = vpow2.f32 %v5030_v9  ;;  %5089 = vadd.xlane.f32.xlu2 %v5088_v30  ;;  %v5061_v12 = vsel %vm186_vm3, %v9268_v51, 0.0  ;;  %v9274_v54 = vpop.eup %6514 }
 0xc28   :  { %5062 = vadd.xlane.f32.xlu1 %v5061_v12  ;;  %6518 = vpow2.f32 %v5054_v31  ;;  %v5073_v14 = vsel %vm186_vm3, %v9274_v54, 0.0 }
 0xc2a   :  { %v4985_v0 = vpop.xlane.xlu0 %4984 }
 0xc2b   :  { %v4997_v1 = vpop.xlane.xlu2 %4996  ;;  %v5017_v32 = vsub.f32 %v9211_v41, %v4985_v0 }
 0xc2c   :  { %v5021_v5 = vsub.f32 %v9213_v23, %v4997_v1  ;;  %v4422_v23 = vrot.slane %v6390_v55, 4 }
 0xc2d   :  { %v9277_v57 = vpop.eup %6516  ;;  %v5040_v63 = vmul.f32 1.442695, %v5017_v32 }
 0xc2e   :  { %v5048_v37 = vmul.f32 1.442695, %v5021_v5  ;;  %v5064_v17 = vsel %vm186_vm3, %v9277_v57, 0.0  ;;  %v9287_v49 = vpop.eup %6518  ;;  %v4423_v15 = vsel %vm406_vm4, %v4422_v23, %v6371_v27 }
 0xc2f   :  { %5065 = vadd.xlane.f32.xlu0 %v5064_v17  ;;  %5074 = vadd.xlane.f32.xlu2 %v5073_v14  ;;  %v5100_v41 = vsel %vm186_vm3, %v9287_v49, 0.0  ;;  %v4429_v7 = vperm.slane %v4423_v15, %v7027_v13 }
 0xc30   :  { %6520 = vpow2.f32 %v5048_v37 }
 0xc31   :  { %6522 = vpow2.f32 %v5056_v44  ;;  %v4448_v53 = vrot.slane %v4429_v7, 4 }
 0xc32   :  { %v4973_v40 = vpop.xlane.xlu0 %4972  ;;  %6524 = vpow2.f32 %v5038_v10 }
 0xc33   :  { %v5013_v8 = vsub.f32 %v9219_v35, %v4973_v40  ;;  %v9291_v59 = vpop.permute.xlu2 %6398  ;;  %v6376_v35 = vunpack.i.h.bf16 %v9233_v6 }
 0xc34   :  { %v6401_v18 = vunpack.i.h.bf16 %v9291_v59  ;;  %v6400_v36 = vunpack.i.l.bf16 %v9291_v59 }
 0xc35   :  { %v5032_v22 = vmul.f32 1.442695, %v5013_v8  ;;  %v4436_v25 = vrot.slane %v6376_v35, 4 }
 0xc36   :  { %v9296_v4 = vpop.eup %6520  ;;  %v4310_v50 = vrot.slane %v6401_v18, 4  ;;  %v4313_v9 = vsel %vm406_vm4, %v6401_v18, %v4312_v11  ;;  %v4324_v15 = vrot.slane %v6400_v36, 4 }
 0xc37   :  { %6526 = vpow2.f32 %v5032_v22  ;;  %5101 = vadd.xlane.f32.xlu0 %v5100_v41  ;;  %v5091_v39 = vsel %vm186_vm3, %v9296_v4, 0.0  ;;  %v9308_v56 = vpop.eup %6522  ;;  %v4321_v17 = vperm.slane %v4313_v9, %v7027_v13 }
 0xc38   :  { %5092 = vadd.xlane.f32.xlu1 %v5091_v39  ;;  %6528 = vpow2.f32 %v5040_v63  ;;  %v9310_v38 = vpop.eup %6524  ;;  %v4311_v30 = vsel %vm406_vm4, %v4310_v50, %v6380_v16  ;;  %v5103_v20 = vsel %vm186_vm3, %v9308_v56, 0.0 }
 0xc39   :  { %v5076_v34 = vsel %vm186_vm3, %v9310_v38, 0.0  ;;  %v9329_v37 = vperm.slane %v4311_v30, %v7027_v13 }
 0xc3a   :  { %v6394_v47 = vpop.permute.xlu1 %6393 }
 0xc3b   :  { %v6396_v19 = vunpack.i.h.bf16 %v6394_v47  ;;  %v6395_v61 = vunpack.i.l.bf16 %v6394_v47  ;;  %v4336_v41 = vrot.slane %v9329_v37, 4 }
 0xc3d   :  { %v9313_v6 = vpop.eup %6526  ;;  %v4434_v12 = vrot.slane %v6396_v19, 4  ;;  %v4366_v31 = vrot.slane %v6395_v61, 4  ;;  %v4437_v0 = vsel %vm406_vm4, %v6396_v19, %v4436_v25  ;;  %v4369_v1 = vsel %vm406_vm4, %v6395_v61, %v4368_v43 }
 0xc3e   :  { %v4445_v5 = vperm.slane %v4437_v0, %v7027_v13  ;;  %v5067_v55 = vsel %vm186_vm3, %v9313_v6, 0.0  ;;  %v9333_v44 = vpop.eup %6528  ;;  %v4377_v10 = vperm.slane %v4369_v1, %v7027_v13 }
 0xc3f   :  { %v4367_v62 = vsel %vm406_vm4, %v4366_v31, %v6375_v21  ;;  %v4435_v27 = vsel %vm406_vm4, %v4434_v12, %v6376_v35  ;;  %5104 = vadd.xlane.f32.xlu0 %v5103_v20  ;;  %5068 = vadd.xlane.f32.xlu2 %v5067_v55  ;;  %v4348_v35 = vrot.slane %v4321_v17, 4  ;;  %v5079_v39 = vsel %vm186_vm3, %v9333_v44, 0.0 }
 0xc40   :  { %v4441_v14 = vperm.slane %v4435_v27, %v7027_v13  ;;  %v4458_v23 = vrot.slane %v4445_v5, 4  ;;  %5077 = vadd.xlane.f32.xlu1 %v5076_v34  ;;  %v4461_v40 = vsel %vm406_vm4, %v4445_v5, %v4460_v46  ;;  %v4373_v32 = vperm.slane %v4367_v62, %v7027_v13 }
 0xc41   :  { %v4469_v16 = vperm.slane %v4461_v40, %v7036_v24  ;;  %v4404_v19 = vrot.slane %v4377_v10, 4 }
 0xc42   :  { %v4446_v8 = vrot.slane %v4441_v14, 4  ;;  %v4449_v59 = vsel %vm406_vm4, %v4441_v14, %v4448_v53  ;;  %v4459_v52 = vsel %vm406_vm4, %v4458_v23, %v4433_v29  ;;  %v4392_v25 = vrot.slane %v4373_v32, 4 }
 0xc43   :  { %v4457_v22 = vperm.slane %v4449_v59, %v7036_v24  ;;  %v9344_v18 = vperm.slane %v4459_v52, %v7036_v24  ;;  %v4476_v11 = vrot.slane %v4469_v16, 4 }
 0xc44   :  { %v4447_v63 = vsel %vm406_vm4, %v4446_v8, %v4429_v7 }
 0xc45   :  { %v4453_v21 = vperm.slane %v4447_v63, %v7036_v24  ;;  %v4472_v50 = vrot.slane %v4457_v22, 4  ;;  %v4474_v29 = vrot.slane %v9344_v18, 4  ;;  %v6404_v47 = vpop.permute.xlu0 %6403  ;;  %v4477_v43 = vsel %vm406_vm4, 0.0, %v4476_v11 }
 0xc46   :  { %v6406_v61 = vunpack.i.h.bf16 %v6404_v47  ;;  %v6405_v53 = vunpack.i.l.bf16 %v6404_v47  ;;  %v4658_v30 = vrot.slane %v4477_v43, 4 }
 0xc47   :  { %v4473_v46 = vsel %vm406_vm4, 0.0, %v4472_v50  ;;  %5080 = vadd.xlane.f32.xlu2 %v5079_v39  ;;  %v4470_v7 = vrot.slane %v4453_v21, 4  ;;  %v4475_v9 = vsel %vm406_vm4, 0.0, %v4474_v29  ;;  %v4642_v55 = vsel %vm406_vm4, %v4472_v50, %v4453_v21 }
 0xc48   :  { %v4322_v12 = vrot.slane %v6406_v61, 4  ;;  %v4325_v31 = vsel %vm406_vm4, %v6406_v61, %v4324_v15  ;;  %v4378_v0 = vrot.slane %v6405_v53, 4  ;;  %v4381_v5 = vsel %vm406_vm4, %v6405_v53, %v4380_v3 }
 0xc49   :  { %v4333_v1 = vperm.slane %v4325_v31, %v7027_v13  ;;  %v4471_v20 = vsel %vm406_vm4, 0.0, %v4470_v7  ;;  %v4389_v34 = vperm.slane %v4381_v5, %v7027_v13  ;;  %v4646_v14 = vperm.slane %v4642_v55, %v7027_v13 }
 0xc4a   :  { %v4323_v62 = vsel %vm406_vm4, %v4322_v12, %v6400_v36  ;;  %v4379_v27 = vsel %vm406_vm4, %v4378_v0, %v6381_v60  ;;  %v4647_v15 = vrot.slane %v4473_v46, 4  ;;  %v4653_v12 = vsel %vm406_vm4, %v4476_v11, %v9344_v18 }
 0xc4b   :  { %v4329_v23 = vperm.slane %v4323_v62, %v7027_v13  ;;  %v4346_v40 = vrot.slane %v4333_v1, 4  ;;  %v4349_v8 = vsel %vm406_vm4, %v4333_v1, %v4348_v35  ;;  %v4385_v3 = vperm.slane %v4379_v27, %v7027_v13 }
 0xc4c   :  { %v4357_v59 = vperm.slane %v4349_v8, %v7036_v24  ;;  %v4402_v52 = vrot.slane %v4389_v34, 4  ;;  %v4405_v36 = vsel %vm406_vm4, %v4389_v34, %v4404_v19  ;;  %v4648_v7 = vsel %vm406_vm4, %v4647_v15, %v4471_v20 }
 0xc4d   :  { %v4334_v45 = vrot.slane %v4329_v23, 4  ;;  %v4337_v60 = vsel %vm406_vm4, %v4329_v23, %v4336_v41  ;;  %v4347_v22 = vsel %vm406_vm4, %v4346_v40, %v4321_v17  ;;  %v4390_v16 = vrot.slane %v4385_v3, 4 }
 0xc4e   :  { %v4345_v63 = vperm.slane %v4337_v60, %v7036_v24  ;;  %v9376_v39 = vperm.slane %v4347_v22, %v7036_v24  ;;  %v9378_v35 = vrot.slane %v4357_v59, 4  ;;  %v4393_v21 = vsel %vm406_vm4, %v4385_v3, %v4392_v25 }
 0xc4f   :  { %v4335_v50 = vsel %vm406_vm4, %v4334_v45, %v9329_v37  ;;  %v4391_v29 = vsel %vm406_vm4, %v4390_v16, %v4373_v32  ;;  %v4401_v47 = vperm.slane %v4393_v21, %v7036_v24  ;;  %v4403_v41 = vsel %vm406_vm4, %v4402_v52, %v4377_v10 }
 0xc50   :  { %v9387_v17 = vperm.slane %v4335_v50, %v7036_v24  ;;  %v4360_v19 = vrot.slane %v4345_v63, 4  ;;  %v4362_v61 = vrot.slane %v9376_v39, 4  ;;  %v9392_v53 = vsel %vm406_vm4, 0.0, %v9378_v35 }
 0xc51   :  { %v4550_v25 = vrot.slane %v9392_v53, 4  ;;  %v4397_v37 = vperm.slane %v4391_v29, %v7036_v24  ;;  %v4409_v32 = vperm.slane %v4403_v41, %v7036_v24  ;;  %v4413_v46 = vperm.slane %v4405_v36, %v7036_v24 }
 0xc52   :  { %v9399_v10 = vsel %vm406_vm4, 0.0, %v4360_v19  ;;  %v4416_v43 = vrot.slane %v4401_v47, 4  ;;  %v4652_v1 = vperm.slane %v4648_v7, %v7027_v13  ;;  %v4657_v5 = vperm.slane %v4653_v12, %v7027_v13 }
 0xc53   :  { %v4418_v31 = vrot.slane %v4409_v32, 4  ;;  %v4420_v0 = vrot.slane %v4413_v46, 4  ;;  %v4659_v62 = vsel %vm406_vm4, %v4658_v30, %v4475_v9  ;;  %v4666_v27 = vrot.slane %v4646_v14, 4 }
 0xc54   :  { %v4417_v55 = vsel %vm406_vm4, 0.0, %v4416_v43  ;;  %v4414_v34 = vrot.slane %v4397_v37, 4  ;;  %v4663_v40 = vperm.slane %v4659_v62, %v7027_v13  ;;  %v4678_v20 = vrot.slane %v4657_v5, 4 }
 0xc55   :  { %v4421_v23 = vsel %vm406_vm4, 0.0, %v4420_v0  ;;  %v4664_v8 = vrot.slane %v4652_v1, 4  ;;  %v4667_v18 = vsel %vm406_vm4, %v4652_v1, %v4666_v27  ;;  %v4419_v59 = vsel %vm406_vm4, 0.0, %v4418_v31 }
 0xc56   :  { %v4604_v3 = vrot.slane %v4421_v23, 4  ;;  %v4415_v11 = vsel %vm406_vm4, 0.0, %v4414_v34  ;;  %v4675_v52 = vperm.slane %v4667_v18, %v7036_v24  ;;  %v4679_v36 = vsel %vm406_vm4, %v4663_v40, %v4678_v20 }
 0xc57   :  { %v4665_v9 = vsel %vm406_vm4, %v4664_v8, %v4646_v14  ;;  %v4676_v30 = vrot.slane %v4663_v40, 4  ;;  %v4687_v15 = vperm.slane %v4679_v36, %v7036_v24  ;;  %v4588_v60 = vsel %vm406_vm4, %v4416_v43, %v4397_v37 }
 0xc58   :  { %v4671_v45 = vperm.slane %v4665_v9, %v7036_v24  ;;  %v4593_v22 = vrot.slane %v4417_v55, 4  ;;  %v4694_v63 = vrot.slane %v4675_v52, 4  ;;  %v4592_v21 = vperm.slane %v4588_v60, %v7027_v13 }
 0xc59   :  { %v4677_v16 = vsel %vm406_vm4, %v4676_v30, %v4657_v5  ;;  %v4599_v50 = vsel %vm406_vm4, %v4420_v0, %v4409_v32  ;;  %v4692_v29 = vrot.slane %v4687_v15, 4  ;;  %v4605_v43 = vsel %vm406_vm4, %v4604_v3, %v4419_v59 }
 0xc5a   :  { %v4683_v47 = vperm.slane %v4677_v16, %v7036_v24  ;;  %v4690_v41 = vrot.slane %v4671_v45, 4  ;;  %v4594_v14 = vsel %vm406_vm4, %v4593_v22, %v4415_v11  ;;  %v4695_v46 = vsel %vm406_vm4, %v4687_v15, %v4694_v63 }
 0xc5b   :  { %v4598_v7 = vperm.slane %v4594_v14, %v7027_v13  ;;  %v4603_v37 = vperm.slane %v4599_v50, %v7027_v13  ;;  %v4693_v12 = vsel %vm406_vm4, %v4692_v29, %v4675_v52  ;;  %5286 = vmatpush.msra.mxu0 %v4695_v46  ;;  %v4609_v0 = vperm.slane %v4605_v43, %v7027_v13 }
 0xc5c   :  { %v4688_v31 = vrot.slane %v4683_v47, 4  ;;  %v4691_v32 = vsel %vm406_vm4, %v4683_v47, %v4690_v41  ;;  %5245 = vmatpush.msrb.mxu3 %v4693_v12  ;;  %v4612_v1 = vrot.slane %v4592_v21, 4  ;;  %v4358_v62 = vrot.slane %v9387_v17, 4 }
 0xc5d   :  { %5204 = vmatpush.msrb.mxu1 %v4691_v32  ;;  %v4624_v5 = vrot.slane %v4603_v37, 4  ;;  %v4610_v55 = vrot.slane %v4598_v7, 4  ;;  %v4622_v34 = vrot.slane %v4609_v0, 4  ;;  %v4363_v23 = vsel %vm406_vm4, 0.0, %v4362_v61 }
 0xc5e   :  { %v4689_v27 = vsel %vm406_vm4, %v4688_v31, %v4671_v45  ;;  %v4534_v40 = vsel %vm406_vm4, %v4360_v19, %v9387_v17  ;;  %v4613_v20 = vsel %vm406_vm4, %v4598_v7, %v4612_v1  ;;  %v4359_v18 = vsel %vm406_vm4, 0.0, %v4358_v62 }
 0xc5f   :  { %5163 = vmatpush.msra.mxu2 %v4689_v27  ;;  %v4625_v8 = vsel %vm406_vm4, %v4609_v0, %v4624_v5  ;;  %v4611_v3 = vsel %vm406_vm4, %v4610_v55, %v4592_v21  ;;  %v4621_v11 = vperm.slane %v4613_v20, %v7036_v24  ;;  %v4623_v61 = vsel %vm406_vm4, %v4622_v34, %v4603_v37 }
 0xc60   :  { %v4633_v59 = vperm.slane %v4625_v8, %v7036_v24  ;;  %v4617_v52 = vperm.slane %v4611_v3, %v7036_v24  ;;  %v4629_v36 = vperm.slane %v4623_v61, %v7036_v24  ;;  %v4538_v17 = vperm.slane %v4534_v40, %v7027_v13 }
 0xc61   :  { %v4539_v19 = vrot.slane %v9399_v10, 4  ;;  %v4545_v9 = vsel %vm406_vm4, %v9378_v35, %v9376_v39  ;;  %v4551_v45 = vsel %vm406_vm4, %v4550_v25, %v4363_v23  ;;  %v4640_v60 = vrot.slane %v4621_v11, 4 }
 0xc62   :  { %v4638_v30 = vrot.slane %v4633_v59, 4  ;;  %v4549_v15 = vperm.slane %v4545_v9, %v7027_v13  ;;  %v4634_v22 = vrot.slane %v4629_v36, 4  ;;  %v4555_v63 = vperm.slane %v4551_v45, %v7027_v13 }
 0xc63   :  { %v4540_v16 = vsel %vm406_vm4, %v4539_v19, %v4359_v18  ;;  %v4558_v21 = vrot.slane %v4538_v17, 4  ;;  %v4641_v39 = vsel %vm406_vm4, %v4633_v59, %v4640_v60  ;;  %v4636_v25 = vrot.slane %v4617_v52, 4 }
 0xc64   :  { %v4639_v10 = vsel %vm406_vm4, %v4638_v30, %v4621_v11  ;;  %v4544_v50 = vperm.slane %v4540_v16, %v7027_v13  ;;  %v4570_v29 = vrot.slane %v4549_v15, 4  ;;  %v4635_v35 = vsel %vm406_vm4, %v4634_v22, %v4617_v52  ;;  %5287 = vmatpush.msra.mxu0 %v4641_v39 }
 0xc65   :  { %5246 = vmatpush.msrb.mxu3 %v4639_v10  ;;  %v4568_v53 = vrot.slane %v4555_v63, 4  ;;  %5164 = vmatpush.msra.mxu2 %v4635_v35  ;;  %v4637_v43 = vsel %vm406_vm4, %v4629_v36, %v4636_v25 }
 0xc66   :  { %v4559_v47 = vsel %vm406_vm4, %v4544_v50, %v4558_v21  ;;  %v4571_v41 = vsel %vm406_vm4, %v4555_v63, %v4570_v29  ;;  %v4556_v14 = vrot.slane %v4544_v50, 4  ;;  %5205 = vmatpush.msrb.mxu1 %v4637_v43 }
 0xc67   :  { %v4567_v46 = vperm.slane %v4559_v47, %v7036_v24  ;;  %v4579_v7 = vperm.slane %v4571_v41, %v7036_v24  ;;  %v4569_v37 = vsel %vm406_vm4, %v4568_v53, %v4549_v15 }
 0xc68   :  { %v4557_v12 = vsel %vm406_vm4, %v4556_v14, %v4538_v17  ;;  %v4575_v31 = vperm.slane %v4569_v37, %v7036_v24 }
 0xc69   :  { %v4584_v32 = vrot.slane %v4579_v7, 4  ;;  %v4563_v0 = vperm.slane %v4557_v12, %v7036_v24  ;;  %v4586_v1 = vrot.slane %v4567_v46, 4 }
 0xc6a   :  { %v4580_v5 = vrot.slane %v4575_v31, 4 }
 0xc6b   :  { %v4585_v55 = vsel %vm406_vm4, %v4584_v32, %v4567_v46  ;;  %v4587_v62 = vsel %vm406_vm4, %v4579_v7, %v4586_v1  ;;  %v4582_v27 = vrot.slane %v4563_v0, 4 }
 0xc6c   :  { %5247 = vmatpush.msrb.mxu3 %v4585_v55  ;;  %v4581_v34 = vsel %vm406_vm4, %v4580_v5, %v4563_v0  ;;  %5288 = vmatpush.msra.mxu0 %v4587_v62 }
 0xc6d   :  { %5165 = vmatpush.msra.mxu2 %v4581_v34  ;;  %v4583_v23 = vsel %vm406_vm4, %v4575_v31, %v4582_v27 }
 0xc6e   :  { %5206 = vmatpush.msrb.mxu1 %v4583_v23 }
 0xc81   :  { %v5096_v40 = vpop.xlane.xlu2 %5095 }
 0xc82   :  { %6530 = vrcp.f32 %v5096_v40 }
 0xc83   :  { %v5072_v20 = vpop.xlane.xlu0 %5071 }
 0xc84   :  { %6532 = vrcp.f32 %v5072_v20 }
 0xc88   :  { %v6531_v8 = vpop.eup %6530 }
 0xc89   :  { %v5134_v3 = vmul.f32 %v6531_v8, %v9235_v42  ;;  %v5084_v18 = vpop.xlane.xlu1 %5083 }
 0xc8a   :  { %v6533_v11 = vpop.eup %6532  ;;  %6534 = vrcp.f32 %v5084_v18  ;;  %v5060_v59 = vpop.xlane.xlu2 %5059 }
 0xc8b   :  { %v5126_v52 = vmul.f32 %v6533_v11, %v9239_v58  ;;  %6536 = vrcp.f32 %v5060_v59  ;;  %6290 = vmatmul.msk.f32.vlgmr.msra.gmra.mxu0 %vm186_vm3, %v5134_v3 }
 0xc8d   :  { %6282 = vmatmul.msk.f32.vlgmr.msrb.gmra.mxu1 %vm186_vm3, %v5126_v52 }
 0xc90   :  { %v6535_v61 = vpop.eup %6534 }
 0xc91   :  { %v6537_v36 = vpop.eup %6536  ;;  %v5130_v17 = vmul.f32 %v6535_v61, %v9245_v2 }
 0xc92   :  { %v5087_v19 = vpop.xlane.xlu0 %5086  ;;  %v5122_v9 = vmul.f32 %v6537_v36, %v9247_v33 }
 0xc93   :  { %6538 = vrcp.f32 %v5087_v19  ;;  %v5099_v42 = vpop.xlane.xlu1 %5098  ;;  %6286 = vmatmul.msk.f32.vlgmr.msrb.gmra.mxu3 %vm186_vm3, %v5130_v17 }
 0xc94   :  { %6540 = vrcp.f32 %v5099_v42  ;;  %6278 = vmatmul.msk.f32.vlgmr.msra.gmra.mxu2 %vm186_vm3, %v5122_v9 }
 0xc99   :  { %v6539_v58 = vpop.eup %6538 }
 0xc9a   :  { %v5131_v30 = vmul.f32 %v6539_v58, %v9255_v48  ;;  %v6541_v15 = vpop.eup %6540  ;;  %v5090_v45 = vpop.xlane.xlu2 %5089 }
 0xc9b   :  { %6542 = vrcp.f32 %v5090_v45  ;;  %v5063_v60 = vpop.xlane.xlu1 %5062  ;;  %v5135_v2 = vmul.f32 %v6541_v15, %v9260_v26 }
 0xc9c   :  { %6287 = vmatmul.msk.f32.gmra.mxu3 %vm186_vm3, %v5131_v30  ;;  %6544 = vrcp.f32 %v5063_v60 }
 0xc9d   :  { %6291 = vmatmul.msk.f32.gmra.mxu0 %vm186_vm3, %v5135_v2 }
 0xca1   :  { %v6543_v33 = vpop.eup %6542 }
 0xca2   :  { %v5066_v22 = vpop.xlane.xlu0 %5065  ;;  %v6545_v16 = vpop.eup %6544  ;;  %v5132_v21 = vmul.f32 %v6543_v33, %v9266_v28 }
 0xca3   :  { %v5075_v63 = vpop.xlane.xlu2 %5074  ;;  %6546 = vrcp.f32 %v5066_v22  ;;  %v5123_v48 = vmul.f32 %v6545_v16, %v9268_v51 }
 0xca4   :  { %6548 = vrcp.f32 %v5075_v63  ;;  %6288 = vmatmul.msk.f32.gmra.mxu3 %vm186_vm3, %v5132_v21 }
 0xca5   :  { %6279 = vmatmul.msk.f32.gmra.mxu2 %vm186_vm3, %v5123_v48 }
 0xca9   :  { %v6547_v10 = vpop.eup %6546 }
 0xcaa   :  { %v6549_v50 = vpop.eup %6548  ;;  %v5102_v26 = vpop.xlane.xlu0 %5101  ;;  %v5124_v35 = vmul.f32 %v6547_v10, %v9277_v57 }
 0xcab   :  { %6550 = vrcp.f32 %v5102_v26  ;;  %v5093_v29 = vpop.xlane.xlu1 %5092  ;;  %v5127_v39 = vmul.f32 %v6549_v50, %v9274_v54 }
 0xcac   :  { %6552 = vrcp.f32 %v5093_v29 }
 0xcad   :  { %6283 = vmatmul.msk.f32.gmra.mxu1 %vm186_vm3, %v5127_v39  ;;  %6280 = vmatmul.msk.f32.gmra.mxu2 %vm186_vm3, %v5124_v35 }
 0xcb1   :  { %v6551_v28 = vpop.eup %6550 }
 0xcb2   :  { %v6553_v51 = vpop.eup %6552  ;;  %v5069_v53 = vpop.xlane.xlu2 %5068  ;;  %v5136_v47 = vmul.f32 %v6551_v28, %v9287_v49 }
 0xcb3   :  { %v5105_v25 = vpop.xlane.xlu0 %5104  ;;  %6554 = vrcp.f32 %v5069_v53  ;;  %v5078_v41 = vpop.xlane.xlu1 %5077  ;;  %v5133_v14 = vmul.f32 %v6553_v51, %v9296_v4 }
 0xcb4   :  { %6556 = vrcp.f32 %v5105_v25  ;;  %6292 = vmatmul.msk.f32.gmra.mxu0 %vm186_vm3, %v5136_v47 }
 0xcb5   :  { %6558 = vrcp.f32 %v5078_v41  ;;  %6289 = vmatmul.msk.f32.gmra.mxu3 %vm186_vm3, %v5133_v14 }
 0xcb9   :  { %v6555_v54 = vpop.eup %6554 }
 0xcba   :  { %v6557_v57 = vpop.eup %6556  ;;  %v5081_v46 = vpop.xlane.xlu2 %5080  ;;  %v5125_v7 = vmul.f32 %v6555_v54, %v9313_v6 }
 0xcbb   :  { %v6559_v37 = vpop.eup %6558  ;;  %6560 = vrcp.f32 %v5081_v46  ;;  %v5137_v43 = vmul.f32 %v6557_v57, %v9308_v56 }
 0xcbc   :  { %6281 = vmatmul.msk.f32.gmra.mxu2 %vm186_vm3, %v5125_v7  ;;  %v5128_v49 = vmul.f32 %v6559_v37, %v9310_v38 }
 0xcbd   :  { %6293 = vmatmul.msk.f32.gmra.mxu0 %vm186_vm3, %v5137_v43 }
 0xcbe   :  { %6284 = vmatmul.msk.f32.gmra.mxu1 %vm186_vm3, %v5128_v49 }
 0xcc1   :  { %v6561_v4 = vpop.eup %6560 }
 0xcc2   :  { %v5129_v12 = vmul.f32 %v6561_v4, %v9333_v44 }
 0xcc6   :  { %6285 = vmatmul.msk.f32.gmra.mxu1 %vm186_vm3, %v5129_v12 }
 0xd08   :  { %v5290_v31 = vpop.f32.mrf.mxu0 }
 0xd09   :  { %v5314_v6 = vrot.slane %v5290_v31, 4 }
 0xd0a   :  { %v5208_v32 = vpop.f32.mrf.mxu1 }
 0xd0b   :  { %v5316_v0 = vrot.slane %v5208_v32, 4  ;;  %v5315_v1 = vsel %vm406_vm4, %v5314_v6, %v5208_v32 }
 0xd0c   :  { %v5321_v5 = vperm.slane %v5315_v1, %v7027_v13 }
 0xd0d   :  { %v5317_v56 = vsel %vm406_vm4, %v5290_v31, %v5316_v0 }
 0xd0e   :  { %v5325_v55 = vperm.slane %v5317_v56, %v7027_v13  ;;  %v5326_v23 = vrot.slane %v5321_v5, 4 }
 0xd10   :  { %v5338_v8 = vrot.slane %v5325_v55, 4 }
 0xd16   :  { %v5249_v38 = vpop.f32.mrf.mxu3 }
 0xd17   :  { %v5302_v62 = vrot.slane %v5249_v38, 4  ;;  %v5167_v27 = vpop.f32.mrf.mxu2 }
 0xd18   :  { %v5304_v34 = vrot.slane %v5167_v27, 4 }
 0xd19   :  { %v5303_v44 = vsel %vm406_vm4, %v5302_v62, %v5167_v27 }
 0xd1a   :  { %v5305_v40 = vsel %vm406_vm4, %v5249_v38, %v5304_v34  ;;  %v5309_v20 = vperm.slane %v5303_v44, %v7027_v13  ;;  %v5293_v50 = vpop.f32.mrf.mxu0 }
 0xd1b   :  { %v5313_v3 = vperm.slane %v5305_v40, %v7027_v13  ;;  %v5370_v47 = vrot.slane %v5293_v50, 4 }
 0xd1c   :  { %v5327_v18 = vsel %vm406_vm4, %v5326_v23, %v5309_v20  ;;  %v5328_v11 = vrot.slane %v5309_v20, 4 }
 0xd1d   :  { %v5333_v59 = vperm.slane %v5327_v18, %v7036_v24  ;;  %v5339_v52 = vsel %vm406_vm4, %v5338_v8, %v5313_v3  ;;  %v5340_v61 = vrot.slane %v5313_v3, 4 }
 0xd1e   :  { %v5329_v36 = vsel %vm406_vm4, %v5321_v5, %v5328_v11  ;;  %v5345_v17 = vperm.slane %v5339_v52, %v7036_v24 }
 0xd1f   :  { %v5252_v19 = vpop.f32.mrf.mxu3  ;;  %v5337_v9 = vperm.slane %v5329_v36, %v7036_v24  ;;  %v5341_v42 = vsel %vm406_vm4, %v5325_v55, %v5340_v61  ;;  %v5350_v30 = vrot.slane %v5333_v59, 4 }
 0xd20   :  { %v5349_v58 = vperm.slane %v5341_v42, %v7036_v24  ;;  %v5354_v45 = vrot.slane %v5345_v17, 4  ;;  %v5358_v28 = vrot.slane %v5252_v19, 4 }
 0xd21   :  { %v5352_v15 = vrot.slane %v5337_v9, 4  ;;  %v5351_v48 = vsel %vm406_vm4, 0.0, %v5350_v30 }
 0xd22   :  { %v5356_v60 = vrot.slane %v5349_v58, 4  ;;  %v5355_v39 = vsel %vm406_vm4, 0.0, %v5354_v45 }
 0xd23   :  { %v5353_v2 = vsel %vm406_vm4, 0.0, %v5352_v15  ;;  %v5526_v33 = vsel %vm406_vm4, %v5352_v15, %v5333_v59 }
 0xd24   :  { %v5357_v22 = vsel %vm406_vm4, 0.0, %v5356_v60  ;;  %v5530_v16 = vperm.slane %v5526_v33, %v7027_v13  ;;  %v5531_v63 = vrot.slane %v5353_v2, 4  ;;  %v5537_v21 = vsel %vm406_vm4, %v5356_v60, %v5345_v17 }
 0xd25   :  { %v5542_v10 = vrot.slane %v5357_v22, 4  ;;  %v5541_v26 = vperm.slane %v5537_v21, %v7027_v13 }
 0xd26   :  { %v5532_v29 = vsel %vm406_vm4, %v5531_v63, %v5351_v48  ;;  %v5550_v35 = vrot.slane %v5530_v16, 4 }
 0xd27   :  { %v5536_v51 = vperm.slane %v5532_v29, %v7027_v13  ;;  %v5543_v53 = vsel %vm406_vm4, %v5542_v10, %v5355_v39  ;;  %v5562_v25 = vrot.slane %v5541_v26, 4  ;;  %v5255_v41 = vpop.f32.mrf.mxu3 }
 0xd28   :  { %v5170_v14 = vpop.f32.mrf.mxu2  ;;  %v5547_v54 = vperm.slane %v5543_v53, %v7027_v13  ;;  %v5414_v32 = vrot.slane %v5255_v41, 4 }
 0xd29   :  { %v5359_v57 = vsel %vm406_vm4, %v5358_v28, %v5170_v14  ;;  %v5360_v46 = vrot.slane %v5170_v14, 4  ;;  %v5551_v37 = vsel %vm406_vm4, %v5536_v51, %v5550_v35  ;;  %v5548_v43 = vrot.slane %v5536_v51, 4 }
 0xd2a   :  { %v5211_v7 = vpop.f32.mrf.mxu1  ;;  %v5365_v49 = vperm.slane %v5359_v57, %v7027_v13  ;;  %v5559_v31 = vperm.slane %v5551_v37, %v7036_v24  ;;  %v5563_v1 = vsel %vm406_vm4, %v5547_v54, %v5562_v25  ;;  %v5560_v8 = vrot.slane %v5547_v54, 4 }
 0xd2b   :  { %v5371_v4 = vsel %vm406_vm4, %v5370_v47, %v5211_v7  ;;  %v5372_v12 = vrot.slane %v5211_v7, 4  ;;  %v5361_v6 = vsel %vm406_vm4, %v5252_v19, %v5360_v46  ;;  %v5571_v55 = vperm.slane %v5563_v1, %v7036_v24 }
 0xd2c   :  { %v5377_v0 = vperm.slane %v5371_v4, %v7027_v13  ;;  %v5369_v56 = vperm.slane %v5361_v6, %v7027_v13  ;;  %v5384_v5 = vrot.slane %v5365_v49, 4  ;;  %v5578_v34 = vrot.slane %v5559_v31, 4 }
 0xd2d   :  { %v5373_v38 = vsel %vm406_vm4, %v5293_v50, %v5372_v12  ;;  %v5549_v44 = vsel %vm406_vm4, %v5548_v43, %v5530_v16  ;;  %v5576_v20 = vrot.slane %v5571_v55, 4  ;;  %v5561_v33 = vsel %vm406_vm4, %v5560_v8, %v5541_v26 }
 0xd2e   :  { %v5381_v62 = vperm.slane %v5373_v38, %v7027_v13  ;;  %v5382_v27 = vrot.slane %v5377_v0, 4  ;;  %v5396_v23 = vrot.slane %v5369_v56, 4  ;;  %v5385_v40 = vsel %vm406_vm4, %v5377_v0, %v5384_v5 }
 0xd2f   :  { %v5393_v18 = vperm.slane %v5385_v40, %v7036_v24  ;;  %v5579_v59 = vsel %vm406_vm4, %v5571_v55, %v5578_v34  ;;  %v5577_v19 = vsel %vm406_vm4, %v5576_v20, %v5559_v31  ;;  %v5555_v9 = vperm.slane %v5549_v44, %v7036_v24 }
 0xd30   :  { %v5383_v3 = vsel %vm406_vm4, %v5382_v27, %v5365_v49  ;;  %v5394_v11 = vrot.slane %v5381_v62, 4  ;;  %v5397_v61 = vsel %vm406_vm4, %v5381_v62, %v5396_v23  ;;  %5778 = vrot.lane.b32.xlu2 %v5579_v59, %s6740_s2  ;;  %v5173_v36 = vpop.f32.mrf.mxu2  ;;  %5762 = vrot.lane.b32.xlu0 %v5577_v19, %s6741_s8  ;;  %v5567_v28 = vperm.slane %v5561_v33, %v7036_v24 }
 0xd31   :  { %v5389_v52 = vperm.slane %v5383_v3, %v7036_v24  ;;  %v5296_v17 = vpop.f32.mrf.mxu0  ;;  %v5405_v58 = vperm.slane %v5397_v61, %v7036_v24  ;;  %v5408_v30 = vrot.slane %v5393_v18, 4  ;;  %v5415_v15 = vsel %vm406_vm4, %v5414_v32, %v5173_v36 }
 0xd32   :  { %v5395_v42 = vsel %vm406_vm4, %v5394_v11, %v5369_v56  ;;  %v5416_v2 = vrot.slane %v5173_v36, 4  ;;  %v5421_v50 = vperm.slane %v5415_v15, %v7027_v13  ;;  %v5574_v25 = vrot.slane %v5555_v9, 4 }
 0xd33   :  { %v5401_v45 = vperm.slane %v5395_v42, %v7036_v24  ;;  %v5406_v60 = vrot.slane %v5389_v52, 4  ;;  %v5409_v22 = vsel %vm406_vm4, 0.0, %v5408_v30  ;;  %v5412_v16 = vrot.slane %v5405_v58, 4 }
 0xd34   :  { %v5580_v63 = vsel %vm406_vm4, %v5408_v30, %v5389_v52  ;;  %v5585_v10 = vrot.slane %v5409_v22, 4  ;;  %v5417_v35 = vsel %vm406_vm4, %v5255_v41, %v5416_v2  ;;  %v5426_v47 = vrot.slane %v5296_v17, 4 }
 0xd35   :  { %v5407_v21 = vsel %vm406_vm4, 0.0, %v5406_v60  ;;  %v5410_v48 = vrot.slane %v5401_v45, 4  ;;  %v5413_v29 = vsel %vm406_vm4, 0.0, %v5412_v16  ;;  %v5584_v39 = vperm.slane %v5580_v63, %v7027_v13 }
 0xd36   :  { %v5586_v26 = vsel %vm406_vm4, %v5585_v10, %v5407_v21  ;;  %v5596_v51 = vrot.slane %v5413_v29, 4  ;;  %v5425_v53 = vperm.slane %v5417_v35, %v7027_v13  ;;  %v5572_v14 = vrot.slane %v5567_v28, 4 }
 0xd37   :  { %v5590_v57 = vperm.slane %v5586_v26, %v7027_v13  ;;  %v5591_v46 = vsel %vm406_vm4, %v5412_v16, %v5401_v45  ;;  %v5440_v7 = vrot.slane %v5421_v50, 4  ;;  %v5575_v37 = vsel %vm406_vm4, %v5567_v28, %v5574_v25 }
 0xd38   :  { %v5258_v54 = vpop.f32.mrf.mxu3  ;;  %v5411_v41 = vsel %vm406_vm4, 0.0, %v5410_v48  ;;  %v9576_v43 = vperm.slane %v5591_v46, %v7027_v13  ;;  %5746 = vrot.lane.b32.xlu1 %v5575_v37, %s6730_s9  ;;  %v5604_v12 = vrot.slane %v5584_v39, 4  ;;  %v9583_v32 = vsel %vm406_vm4, %v5572_v14, %v5555_v9 }
 0xd39   :  { %v5597_v4 = vsel %vm406_vm4, %v5596_v51, %v5411_v41  ;;  %v5602_v31 = vrot.slane %v5590_v57, 4  ;;  %v5452_v6 = vrot.slane %v5425_v53, 4  ;;  %v5470_v0 = vrot.slane %v5258_v54, 4 }
 0xd3a   :  { %v9579_v49 = vpop.f32.mrf.mxu0  ;;  %v5601_v56 = vperm.slane %v5597_v4, %v7027_v13  ;;  %v5616_v5 = vrot.slane %v9576_v43, 4  ;;  %v5605_v62 = vsel %vm406_vm4, %v5590_v57, %v5604_v12 }
 0xd3b   :  { %v5214_v1 = vpop.f32.mrf.mxu1  ;;  %v5603_v27 = vsel %vm406_vm4, %v5602_v31, %v5584_v39  ;;  %v5482_v34 = vrot.slane %v9579_v49, 4  ;;  %v5613_v23 = vperm.slane %v5605_v62, %v7036_v24 }
 0xd3c   :  { %v5427_v38 = vsel %vm406_vm4, %v5426_v47, %v5214_v1  ;;  %v5428_v55 = vrot.slane %v5214_v1, 4  ;;  %v5617_v40 = vsel %vm406_vm4, %v5601_v56, %v5616_v5  ;;  %v9597_v3 = vperm.slane %v5603_v27, %v7036_v24 }
 0xd3d   :  { %v5433_v44 = vperm.slane %v5427_v38, %v7027_v13  ;;  %v5625_v8 = vperm.slane %v5617_v40, %v7036_v24  ;;  %v5614_v18 = vrot.slane %v5601_v56, 4  ;;  %v5632_v36 = vrot.slane %v5613_v23, 4 }
 0xd3e   :  { %v5429_v20 = vsel %vm406_vm4, %v5296_v17, %v5428_v55  ;;  %v5628_v37 = vrot.slane %v9597_v3, 4 }
 0xd3f   :  { %v5437_v11 = vperm.slane %v5429_v20, %v7027_v13  ;;  %v5438_v59 = vrot.slane %v5433_v44, 4  ;;  %v5441_v52 = vsel %vm406_vm4, %v5433_v44, %v5440_v7  ;;  %v5176_v61 = vpop.f32.mrf.mxu2  ;;  %v5630_v58 = vrot.slane %v5625_v8, 4 }
 0xd40   :  { %v5449_v19 = vperm.slane %v5441_v52, %v7036_v24  ;;  %v5471_v9 = vsel %vm406_vm4, %v5470_v0, %v5176_v61  ;;  %v5472_v42 = vrot.slane %v5176_v61, 4  ;;  %v5633_v48 = vsel %vm406_vm4, %v5625_v8, %v5632_v36 }
 0xd41   :  { %v5439_v17 = vsel %vm406_vm4, %v5438_v59, %v5421_v50  ;;  %v5450_v30 = vrot.slane %v5437_v11, 4  ;;  %v5453_v15 = vsel %vm406_vm4, %v5437_v11, %v5452_v6  ;;  %v5477_v45 = vperm.slane %v5471_v9, %v7027_v13  ;;  %5780 = vrot.lane.b32.xlu2 %v5633_v48, %s6740_s2 }
 0xd42   :  { %v5445_v60 = vperm.slane %v5439_v17, %v7036_v24  ;;  %v5461_v2 = vperm.slane %v5453_v15, %v7036_v24  ;;  %v5464_v33 = vrot.slane %v5449_v19, 4  ;;  %v5473_v22 = vsel %vm406_vm4, %v5258_v54, %v5472_v42 }
 0xd43   :  { %v5451_v16 = vsel %vm406_vm4, %v5450_v30, %v5425_v53  ;;  %v5481_v63 = vperm.slane %v5473_v22, %v7027_v13  ;;  %v5496_v21 = vrot.slane %v5477_v45, 4  ;;  %v5631_v51 = vsel %vm406_vm4, %v5630_v58, %v5613_v23  ;;  %v5217_v53 = vpop.f32.mrf.mxu1 }
 0xd44   :  { %v5457_v10 = vperm.slane %v5451_v16, %v7036_v24  ;;  %v5462_v50 = vrot.slane %v5445_v60, 4  ;;  %v5465_v29 = vsel %vm406_vm4, 0.0, %v5464_v33  ;;  %v5468_v39 = vrot.slane %v5461_v2, 4  ;;  %5764 = vrot.lane.b32.xlu1 %v5631_v51, %s6741_s8 }
 0xd45   :  { %v5634_v35 = vsel %vm406_vm4, %v5464_v33, %v5445_v60  ;;  %v5639_v28 = vrot.slane %v5465_v29, 4  ;;  %v5508_v26 = vrot.slane %v5481_v63, 4  ;;  %v5615_v7 = vsel %vm406_vm4, %v5614_v18, %v9576_v43 }
 0xd46   :  { %v5463_v25 = vsel %vm406_vm4, 0.0, %v5462_v50  ;;  %v5466_v47 = vrot.slane %v5457_v10, 4  ;;  %v5469_v14 = vsel %vm406_vm4, 0.0, %v5468_v39  ;;  %v5638_v54 = vperm.slane %v5634_v35, %v7027_v13 }
 0xd47   :  { %v5640_v57 = vsel %vm406_vm4, %v5639_v28, %v5463_v25  ;;  %v5650_v46 = vrot.slane %v5469_v14, 4  ;;  %v9626_v41 = vperm.slane %v5615_v7, %v7036_v24  ;;  %v5483_v4 = vsel %vm406_vm4, %v5482_v34, %v5217_v53 }
 0xd48   :  { %v5484_v12 = vrot.slane %v5217_v53, 4  ;;  %v5467_v31 = vsel %vm406_vm4, 0.0, %v5466_v47  ;;  %v5489_v6 = vperm.slane %v5483_v4, %v7027_v13  ;;  %v5644_v0 = vperm.slane %v5640_v57, %v7027_v13 }
 0xd49   :  { %v5645_v1 = vsel %vm406_vm4, %v5468_v39, %v5457_v10  ;;  %v5651_v56 = vsel %vm406_vm4, %v5650_v46, %v5467_v31  ;;  %v5626_v43 = vrot.slane %v9626_v41, 4  ;;  %v5629_v5 = vsel %vm406_vm4, %v9626_v41, %v5628_v37 }
 0xd4a   :  { %v5485_v38 = vsel %vm406_vm4, %v9579_v49, %v5484_v12  ;;  %v5649_v55 = vperm.slane %v5645_v1, %v7027_v13  ;;  %5748 = vrot.lane.b32.xlu0 %v5629_v5, %s6730_s9  ;;  %v5494_v27 = vrot.slane %v5489_v6, 4  ;;  %v5497_v34 = vsel %vm406_vm4, %v5489_v6, %v5496_v21 }
 0xd4b   :  { %v5493_v62 = vperm.slane %v5485_v38, %v7027_v13  ;;  %v5655_v44 = vperm.slane %v5651_v56, %v7027_v13  ;;  %v5505_v23 = vperm.slane %v5497_v34, %v7036_v24  ;;  %v5658_v40 = vrot.slane %v5638_v54, 4 }
 0xd4c   :  { %v5670_v20 = vrot.slane %v5649_v55, 4  ;;  %v5656_v8 = vrot.slane %v5644_v0, 4  ;;  %v5495_v18 = vsel %vm406_vm4, %v5494_v27, %v5477_v45  ;;  %v5627_v12 = vsel %vm406_vm4, %v5626_v43, %v9597_v3 }
 0xd4d   :  { %v5506_v11 = vrot.slane %v5493_v62, 4  ;;  %v5509_v49 = vsel %vm406_vm4, %v5493_v62, %v5508_v26  ;;  %v5668_v59 = vrot.slane %v5655_v44, 4  ;;  %v5501_v52 = vperm.slane %v5495_v18, %v7036_v24 }
 0xd4e   :  { %v5517_v61 = vperm.slane %v5509_v49, %v7036_v24  ;;  %v5520_v36 = vrot.slane %v5505_v23, 4  ;;  %v5659_v19 = vsel %vm406_vm4, %v5644_v0, %v5658_v40  ;;  %v5671_v58 = vsel %vm406_vm4, %v5655_v44, %v5670_v20  ;;  %v6225_v49 = vld [vmem:[%s9854_s12 + $0x28] sm:$0xff] }
 0xd4f   :  { %v5507_v9 = vsel %vm406_vm4, %v5506_v11, %v5481_v63  ;;  %v5667_v42 = vperm.slane %v5659_v19, %v7036_v24  ;;  %v5657_v17 = vsel %vm406_vm4, %v5656_v8, %v5638_v54  ;;  %v5518_v15 = vrot.slane %v5501_v52, 4  ;;  %v6226_v11 = vld [vmem:[%s9854_s12 + $0x30] sm:$0xff] }
 0xd50   :  { %v5513_v30 = vperm.slane %v5507_v9, %v7036_v24  ;;  %v5521_v45 = vsel %vm406_vm4, 0.0, %v5520_v36  ;;  %v5524_v60 = vrot.slane %v5517_v61, 4  ;;  %v5688_v2 = vsel %vm406_vm4, %v5520_v36, %v5501_v52 }
 0xd51   :  { %v5693_v33 = vrot.slane %v5521_v45, 4  ;;  %v5679_v22 = vperm.slane %v5671_v58, %v7036_v24  ;;  %v5686_v16 = vrot.slane %v5667_v42, 4  ;;  %v5519_v63 = vsel %vm406_vm4, 0.0, %v5518_v15 }
 0xd52   :  { %v5522_v21 = vrot.slane %v5513_v30, 4  ;;  %v5525_v48 = vsel %vm406_vm4, 0.0, %v5524_v60  ;;  %v5692_v10 = vperm.slane %v5688_v2, %v7027_v13  ;;  %v5663_v28 = vperm.slane %v5657_v17, %v7036_v24 }
 0xd53   :  { %v5694_v50 = vsel %vm406_vm4, %v5693_v33, %v5519_v63  ;;  %v5704_v29 = vrot.slane %v5525_v48, 4  ;;  %v5687_v39 = vsel %vm406_vm4, %v5679_v22, %v5686_v16  ;;  %v5684_v35 = vrot.slane %v5679_v22, 4 }
 0xd54   :  { %5782 = vrot.lane.b32.xlu2 %v5687_v39, %s6740_s2  ;;  %v5669_v26 = vsel %vm406_vm4, %v5668_v59, %v5649_v55  ;;  %v5523_v51 = vsel %vm406_vm4, 0.0, %v5522_v21  ;;  %v5698_v53 = vperm.slane %v5694_v50, %v7027_v13  ;;  %v5699_v14 = vsel %vm406_vm4, %v5524_v60, %v5513_v30  ;;  %v6224_v59 = vld [vmem:[%s9854_s12 + $0x20] sm:$0xff] }
 0xd55   :  { %v5685_v25 = vsel %vm406_vm4, %v5684_v35, %v5667_v42  ;;  %v5675_v47 = vperm.slane %v5669_v26, %v7036_v24  ;;  %v5705_v54 = vsel %vm406_vm4, %v5704_v29, %v5523_v51  ;;  %v5682_v57 = vrot.slane %v5663_v28, 4  ;;  %v9727_v35 = vld [vmem:[%s9858_s16 + $0x8] sm:$0x3f] }
 0xd56   :  { %5766 = vrot.lane.b32.xlu1 %v5685_v25, %s6741_s8  ;;  %v5703_v46 = vperm.slane %v5699_v14, %v7027_v13  ;;  %v5709_v7 = vperm.slane %v5705_v54, %v7027_v13  ;;  %v5712_v37 = vrot.slane %v5692_v10, 4  ;;  %v5710_v4 = vrot.slane %v5698_v53, 4 }
 0xd57   :  { %v5680_v41 = vrot.slane %v5675_v47, 4  ;;  %v5683_v31 = vsel %vm406_vm4, %v5675_v47, %v5682_v57  ;;  %v9948_v57 = vld [vmem:[#allocation20_spill] sm:$0xff] }
 0xd58   :  { %v5713_v6 = vsel %vm406_vm4, %v5698_v53, %v5712_v37  ;;  %v5724_v0 = vrot.slane %v5703_v46, 4  ;;  %v5722_v1 = vrot.slane %v5709_v7, 4  ;;  %5750 = vrot.lane.b32.xlu0 %v5683_v31, %s6730_s9  ;;  %v5711_v5 = vsel %vm406_vm4, %v5710_v4, %v5692_v10  ;;  %v9947_v53 = vld [vmem:[#allocation22_spill] sm:$0xff]  ;;  %v9949_v4 = vld [vmem:[#allocation21_spill] sm:$0xff] }
 0xd59   :  { %v5721_v56 = vperm.slane %v5713_v6, %v7036_v24  ;;  %v5681_v13 = vsel %vm406_vm4, %v5680_v41, %v5663_v28  ;;  %v5717_v55 = vperm.slane %v5711_v5, %v7036_v24  ;;  %v5802_v28 = vperm.slane %v9727_v35, 0 }
 0xd5a   :  { %v5725_v38 = vsel %vm406_vm4, %v5709_v7, %v5724_v0  ;;  %v5723_v3 = vsel %vm406_vm4, %v5722_v1, %v5703_v46  ;;  %v9950_v1 = vld [vmem:[#allocation24_spill] sm:$0xff] }
 0xd5b   :  { %v5733_v43 = vperm.slane %v5725_v38, %v7036_v24  ;;  %v5740_v62 = vrot.slane %v5721_v56, 4  ;;  %v5729_v27 = vperm.slane %v5723_v3, %v7036_v24  ;;  %v5736_v34 = vrot.slane %v5717_v55, 4  ;;  %v6227_v24 = vld [vmem:[%s9854_s12 + $0x38] sm:$0xff] }
 0xd5c   :  { %5827 = vmatpush.msrb.mxu2 %v6227_v24  ;;  %v9951_v38 = vld [vmem:[#allocation23_spill] sm:$0xff] }
 0xd5d   :  { %v5741_v44 = vsel %vm406_vm4, %v5733_v43, %v5740_v62  ;;  %v5738_v23 = vrot.slane %v5733_v43, 4  ;;  %v5734_v40 = vrot.slane %v5729_v27, 4  ;;  %v5737_v20 = vsel %vm406_vm4, %v5729_v27, %v5736_v34 }
 0xd5e   :  { %5784 = vrot.lane.b32.xlu2 %v5741_v44, %s6740_s2  ;;  %5828 = vmatpush.msrb.mxu2 %v6226_v11 }
 0xd5f   :  { %v5739_v8 = vsel %vm406_vm4, %v5738_v23, %v5721_v56  ;;  %v5735_v18 = vsel %vm406_vm4, %v5734_v40, %v5717_v55 }
 0xd60   :  { %5768 = vrot.lane.b32.xlu1 %v5739_v8, %s6741_s8  ;;  %5752 = vrot.lane.b32.xlu0 %v5737_v20, %s6730_s9 }
 0xd61   :  { %5829 = vmatpush.msrb.mxu2 %v6225_v49 }
 0xd63   :  { %5830 = vmatpush.msrb.mxu2 %v6224_v59 }
 0xd8a   :  { %v5779_v19 = vpop.permute.xlu2 %5778 }
 0xd9b   :  { %v5781_v15 = vpop.permute.xlu2 %5780 }
 0xda2   :  { %v5763_v52 = vpop.permute.xlu0 %5762 }
 0xdaa   :  { %v5747_v61 = vpop.permute.xlu1 %5746 }
 0xdab   :  { %v5790_v36 = vsel %vm146_vm0, %v9583_v32, %v5747_v61 }
 0xdac   :  { %v5794_v9 = vsel %vm2866_vm5, %v5790_v36, %v5763_v52 }
 0xdad   :  { %v5798_v42 = vsel %vm2871_vm6, %v5794_v9, %v5779_v19 }
 0xdae   :  { %6294 = vmatmul.msk.f32.vlgmr.msrb.gmra.mxu2 %vm186_vm3, %v5798_v42  ;;  %v5783_v32 = vpop.permute.xlu2 %5782  ;;  %v6231_v42 = vld [vmem:[%s9855_s13 + $0x38] sm:$0xff] }
 0xdaf   :  { %5973 = vmatpush.msra.mxu1 %v6231_v42 }
 0xdb6   :  { %v5765_v58 = vpop.permute.xlu1 %5764 }
 0xdb8   :  { %v5785_v50 = vpop.permute.xlu2 %5784 }
 0xdbc   :  { %v5749_v17 = vpop.permute.xlu0 %5748 }
 0xdbd   :  { %v5791_v30 = vsel %vm146_vm0, %v5627_v12, %v5749_v17  ;;  %v6230_v17 = vld [vmem:[%s9855_s13 + $0x30] sm:$0xff] }
 0xdbe   :  { %v5795_v45 = vsel %vm2866_vm5, %v5791_v30, %v5765_v58  ;;  %5974 = vmatpush.msra.mxu1 %v6230_v17  ;;  %v6229_v30 = vld [vmem:[%s9855_s13 + $0x28] sm:$0xff]  ;;  %v6233_v17 = vld [vmem:[%s9857_s15 + $0x40] sm:$0xff] }
 0xdbf   :  { %v5799_v60 = vsel %vm2871_vm6, %v5795_v45, %v5781_v15  ;;  %v6228_v15 = vld [vmem:[%s9855_s13 + $0x20] sm:$0xff] }
 0xdc0   :  { %6295 = vmatmul.msk.f32.gmra.mxu2 %vm186_vm3, %v5799_v60  ;;  %5975 = vmatpush.msra.mxu1 %v6229_v30 }
 0xdc2   :  { %5976 = vmatpush.msra.mxu1 %v6228_v15 }
 0xdc8   :  { %v5767_v2 = vpop.permute.xlu1 %5766 }
 0xdca   :  { %v5751_v33 = vpop.permute.xlu0 %5750 }
 0xdcb   :  { %v5792_v22 = vsel %vm146_vm0, %v5681_v13, %v5751_v33 }
 0xdcc   :  { %v5796_v16 = vsel %vm2866_vm5, %v5792_v22, %v5767_v2 }
 0xdcd   :  { %v5800_v63 = vsel %vm2871_vm6, %v5796_v16, %v5783_v32 }
 0xdce   :  { %6296 = vmatmul.msk.f32.gmra.mxu2 %vm186_vm3, %v5800_v63 }
 0xdd2   :  { %v5769_v21 = vpop.permute.xlu1 %5768  ;;  %v5753_v48 = vpop.permute.xlu0 %5752 }
 0xdd3   :  { %v5793_v10 = vsel %vm146_vm0, %v5735_v18, %v5753_v48  ;;  %v9773_v48 = vperm.slane %v9727_v35, 2 }
 0xdd4   :  { %v5797_v29 = vsel %vm2866_vm5, %v5793_v10, %v5769_v21 }
 0xdd5   :  { %v5801_v39 = vsel %vm2871_vm6, %v5797_v29, %v5785_v50  ;;  %v5941_v29 = vperm.slane %v9727_v35, 3 }
 0xdd6   :  { %6297 = vmatmul.msk.f32.gmra.mxu2 %vm186_vm3, %v5801_v39 }
 0xe31   :  { %v5832_v26 = vpop.f32.mrf.mxu2 }
 0xe32   :  { %v5833_v51 = vadd.f32 %v5832_v26, %v5802_v28 }
 0xe34   :  { %v5844_v25 = vadd.f32 %v5833_v51, %v9947_v53 }
 0xe36   :  { %v5848_v47 = vsel %vm186_vm3, %v5844_v25, 0.0 }
 0xe37   :  { %5849 = vadd.xlane.f32.xlu0 %v5848_v47 }
 0xe43   :  { %v5835_v14 = vpop.f32.mrf.mxu2 }
 0xe44   :  { %v5836_v54 = vadd.f32 %v5835_v14, %v5802_v28 }
 0xe46   :  { %v5845_v46 = vadd.f32 %v5836_v54, %v9948_v57 }
 0xe48   :  { %v5851_v7 = vsel %vm186_vm3, %v5845_v46, 0.0 }
 0xe49   :  { %5852 = vadd.xlane.f32.xlu1 %v5851_v7  ;;  %v6239_v7 = vld [vmem:[%s9857_s15 + $0x70] sm:$0xff] }
 0xe51   :  { %v5838_v37 = vpop.f32.mrf.mxu2 }
 0xe52   :  { %v5839_v41 = vadd.f32 %v5838_v37, %v5802_v28 }
 0xe54   :  { %v5846_v12 = vadd.f32 %v5839_v41, %v9949_v4  ;;  %v6238_v41 = vld [vmem:[%s9857_s15 + $0x68] sm:$0xff] }
 0xe56   :  { %v5854_v31 = vsel %vm186_vm3, %v5846_v12, 0.0 }
 0xe57   :  { %5855 = vadd.xlane.f32.xlu2 %v5854_v31 }
 0xe59   :  { %v5841_v6 = vpop.f32.mrf.mxu2 }
 0xe5a   :  { %v5842_v0 = vadd.f32 %v5841_v6, %v5802_v28 }
 0xe5c   :  { %v5847_v56 = vadd.f32 %v5842_v0, %v9950_v1  ;;  %v6237_v0 = vld [vmem:[%s9857_s15 + $0x60] sm:$0xff] }
 0xe5e   :  { %v5857_v5 = vsel %vm186_vm3, %v5847_v56, 0.0 }
 0xe5f   :  { %5858 = vadd.xlane.f32.xlu0 %v5857_v5 }
 0xeaa   :  { %v5850_v13 = vpop.xlane.xlu0 %5849 }
 0xeab   :  { %v5860_v55 = vmul.f32 %v5850_v13, %v9951_v38  ;;  %v6236_v13 = vld [vmem:[%s9857_s15 + $0x58] sm:$0xff] }
 0xead   :  { %v5864_v3 = vsub.f32 %v5844_v25, %v5860_v55 }
 0xeaf   :  { %v5868_v43 = vmul.f32 %v5864_v3, %v5864_v3 }
 0xeb1   :  { %v5872_v62 = vsel %vm186_vm3, %v5868_v43, 0.0 }
 0xeb2   :  { %5873 = vadd.xlane.f32.xlu1 %v5872_v62 }
 0xebc   :  { %v5853_v27 = vpop.xlane.xlu1 %5852 }
 0xebd   :  { %v5861_v34 = vmul.f32 %v5853_v27, %v9951_v38 }
 0xebf   :  { %v9741_v44 = vsub.f32 %v5845_v46, %v5861_v34  ;;  %v6240_v46 = vld [vmem:[%s9857_s15 + $0x78] sm:$0xff] }
 0xec0   :  { %6015 = vmatpush.msra.mxu3 %v6240_v46 }
 0xec1   :  { %v5869_v23 = vmul.f32 %v9741_v44, %v9741_v44 }
 0xec2   :  { %6016 = vmatpush.msra.mxu3 %v6239_v7 }
 0xec3   :  { %v5875_v40 = vsel %vm186_vm3, %v5869_v23, 0.0 }
 0xec4   :  { %5876 = vadd.xlane.f32.xlu2 %v5875_v40  ;;  %6017 = vmatpush.msra.mxu3 %v6238_v41 }
 0xec6   :  { %6018 = vmatpush.msra.mxu3 %v6237_v0  ;;  %v6089_v0 = vld [vmem:[#allocation10 + $0x18] sm:$0xff] }
 0xec7   :  { %6112 = vmatpush.msrb.mxu0 %v6089_v0 }
 0xec8   :  { %6019 = vmatpush.msra.mxu3 %v6236_v13  ;;  %v6087_v13 = vld [vmem:[#allocation10 + $0x8] sm:$0xff] }
 0xeca   :  { %v5856_v20 = vpop.xlane.xlu2 %5855 }
 0xecb   :  { %v5862_v8 = vmul.f32 %v5856_v20, %v9951_v38 }
 0xecd   :  { %v9747_v18 = vsub.f32 %v5846_v12, %v5862_v8 }
 0xecf   :  { %v5870_v24 = vmul.f32 %v9747_v18, %v9747_v18 }
 0xed1   :  { %v5878_v11 = vsel %vm186_vm3, %v5870_v24, 0.0 }
 0xed2   :  { %5879 = vadd.xlane.f32.xlu0 %v5878_v11  ;;  %v5859_v49 = vpop.xlane.xlu0 %5858 }
 0xed3   :  { %v5863_v59 = vmul.f32 %v5859_v49, %v9951_v38 }
 0xed5   :  { %v9753_v52 = vsub.f32 %v5847_v56, %v5863_v59 }
 0xed7   :  { %v5871_v61 = vmul.f32 %v9753_v52, %v9753_v52 }
 0xed9   :  { %v5881_v36 = vsel %vm186_vm3, %v5871_v61, 0.0 }
 0xeda   :  { %5882 = vadd.xlane.f32.xlu1 %v5881_v36 }
 0xf25   :  { %v5874_v19 = vpop.xlane.xlu1 %5873 }
 0xf26   :  { %v5884_v9 = vmul.f32 %v5874_v19, %v9951_v38 }
 0xf28   :  { %v5888_v58 = vadd.f32 1e-05, %v5884_v9 }
 0xf2a   :  { %6562 = vrsqrt.f32 %v5888_v58  ;;  %vm5898_vm4 = vweird.f32 %v5888_v58 }
 0xf30   :  { %v6563_v45 = vpop.eup %6562 }
 0xf31   :  { %v5893_v60 = vmul.f32 %v6563_v45, %v5888_v58  ;;  %vm5899_vm0 = vweird.f32 %v6563_v45  ;;  %v6234_v58 = vld [vmem:[%s9857_s15 + $0x48] sm:$0xff] }
 0xf32   :  { %vm5900_vm5 = vmor %vm5898_vm4, %vm5899_vm0 }
 0xf33   :  { %v5894_v2 = vmul.f32 %v6563_v45, %v5893_v60 }
 0xf35   :  { %v5895_v32 = vmul.f32 0.5, %v5894_v2 }
 0xf37   :  { %v5877_v33 = vpop.xlane.xlu2 %5876  ;;  %v5896_v22 = vsub.f32 1.5, %v5895_v32 }
 0xf38   :  { %v5885_v16 = vmul.f32 %v5877_v33, %v9951_v38 }
 0xf39   :  { %v5897_v63 = vmul.f32 %v6563_v45, %v5896_v22 }
 0xf3a   :  { %v5889_v21 = vadd.f32 1e-05, %v5885_v16 }
 0xf3b   :  { %v5901_v10 = vsel %vm5900_vm5, %v6563_v45, %v5897_v63 }
 0xf3c   :  { %6564 = vrsqrt.f32 %v5889_v21  ;;  %v5932_v50 = vmul.f32 %v5901_v10, %v5864_v3  ;;  %vm5908_vm12 = vweird.f32 %v5889_v21 }
 0xf3e   :  { %v5937_v39 = vmul.f32 %v9773_v48, %v5932_v50 }
 0xf40   :  { %v5942_v28 = vadd.f32 %v5941_v29, %v5937_v39 }
 0xf42   :  { %v6565_v26 = vpop.eup %6564  ;;  %6298 = vmatmul.msk.f32.vlgmr.msra.gmra.mxu1 %vm186_vm3, %v5942_v28 }
 0xf43   :  { %v5903_v51 = vmul.f32 %v6565_v26, %v5889_v21  ;;  %vm5909_vm6 = vweird.f32 %v6565_v26 }
 0xf44   :  { %vm5910_vm13 = vmor %vm5908_vm12, %vm5909_vm6 }
 0xf45   :  { %v5904_v53 = vmul.f32 %v6565_v26, %v5903_v51  ;;  %v5880_v25 = vpop.xlane.xlu0 %5879 }
 0xf46   :  { %v5886_v47 = vmul.f32 %v5880_v25, %v9951_v38 }
 0xf47   :  { %v5905_v14 = vmul.f32 0.5, %v5904_v53 }
 0xf48   :  { %v5890_v54 = vadd.f32 1e-05, %v5886_v47 }
 0xf49   :  { %v5906_v57 = vsub.f32 1.5, %v5905_v14 }
 0xf4a   :  { %6566 = vrsqrt.f32 %v5890_v54  ;;  %vm5918_vm15 = vweird.f32 %v5890_v54 }
 0xf4b   :  { %v5907_v37 = vmul.f32 %v6565_v26, %v5906_v57 }
 0xf4d   :  { %v5911_v4 = vsel %vm5910_vm13, %v6565_v26, %v5907_v37  ;;  %v5883_v12 = vpop.xlane.xlu1 %5882 }
 0xf4e   :  { %v5887_v31 = vmul.f32 %v5883_v12, %v9951_v38  ;;  %v5933_v6 = vmul.f32 %v5911_v4, %v9741_v44 }
 0xf50   :  { %v6567_v1 = vpop.eup %6566  ;;  %v5891_v56 = vadd.f32 1e-05, %v5887_v31  ;;  %v5938_v5 = vmul.f32 %v9773_v48, %v5933_v6 }
 0xf51   :  { %v5913_v55 = vmul.f32 %v6567_v1, %v5890_v54  ;;  %vm5919_vm14 = vweird.f32 %v6567_v1 }
 0xf52   :  { %6568 = vrsqrt.f32 %v5891_v56  ;;  %v5943_v3 = vadd.f32 %v5941_v29, %v5938_v5  ;;  %vm5920_vm1 = vmor %vm5918_vm15, %vm5919_vm14  ;;  %vm5928_vm7 = vweird.f32 %v5891_v56 }
 0xf53   :  { %v5914_v43 = vmul.f32 %v6567_v1, %v5913_v55 }
 0xf54   :  { %6299 = vmatmul.msk.f32.gmra.mxu1 %vm186_vm3, %v5943_v3  ;;  %v6086_v3 = vld [vmem:[#allocation10] sm:$0xff] }
 0xf55   :  { %v5915_v62 = vmul.f32 0.5, %v5914_v43 }
 0xf57   :  { %v5916_v27 = vsub.f32 1.5, %v5915_v62 }
 0xf58   :  { %v6569_v34 = vpop.eup %6568 }
 0xf59   :  { %v5917_v44 = vmul.f32 %v6567_v1, %v5916_v27  ;;  %v5923_v23 = vmul.f32 %v6569_v34, %v5891_v56  ;;  %vm5929_vm2 = vweird.f32 %v6569_v34 }
 0xf5a   :  { %vm5930_vm8 = vmor %vm5928_vm7, %vm5929_vm2 }
 0xf5b   :  { %v5921_v40 = vsel %vm5920_vm1, %v6567_v1, %v5917_v44  ;;  %v5924_v20 = vmul.f32 %v6569_v34, %v5923_v23  ;;  %v6088_v1 = vld [vmem:[#allocation10 + $0x10] sm:$0xff] }
 0xf5c   :  { %v5934_v8 = vmul.f32 %v5921_v40, %v9747_v18  ;;  %v6235_v18 = vld [vmem:[%s9857_s15 + $0x50] sm:$0xff]  ;;  %6113 = vmatpush.msrb.mxu0 %v6088_v1 }
 0xf5d   :  { %v5925_v24 = vmul.f32 0.5, %v5924_v20  ;;  %6020 = vmatpush.msra.mxu3 %v6235_v18 }
 0xf5e   :  { %v5939_v11 = vmul.f32 %v9773_v48, %v5934_v8  ;;  %6114 = vmatpush.msrb.mxu0 %v6087_v13 }
 0xf5f   :  { %v5926_v49 = vsub.f32 1.5, %v5925_v24  ;;  %6021 = vmatpush.msra.mxu3 %v6234_v58 }
 0xf60   :  { %v5944_v59 = vadd.f32 %v5941_v29, %v5939_v11  ;;  %6115 = vmatpush.msrb.mxu0 %v6086_v3 }
 0xf61   :  { %v5927_v61 = vmul.f32 %v6569_v34, %v5926_v49  ;;  %6022 = vmatpush.msra.mxu3 %v6233_v17  ;;  %v6080_v49 = vperm.slane %v9727_v35, 4 }
 0xf62   :  { %6300 = vmatmul.msk.f32.gmra.mxu1 %vm186_vm3, %v5944_v59 }
 0xf63   :  { %v5931_v36 = vsel %vm5930_vm8, %v6569_v34, %v5927_v61 }
 0xf64   :  { %v5935_v19 = vmul.f32 %v5931_v36, %v9753_v52  ;;  %v6414_v52 = vld [vmem:[%s9856_s14 + $0x1] ss:$0 sm:$0xff]  ;;  %v6083_v36 = vperm.slane %v9727_v35, 5 }
 0xf66   :  { %v5940_v9 = vmul.f32 %v9773_v48, %v5935_v19 }
 0xf68   :  { %v5945_v42 = vadd.f32 %v5941_v29, %v5940_v9  ;;  %v5994_v29 = vperm.slane %v9727_v35, 1  ;;  %v6415_v35 = vld [vmem:[%s9860_s18] ss:$0 sm:$0xff] }
 0xf6a   :  { %6301 = vmatmul.msk.f32.gmra.mxu1 %vm186_vm3, %v5945_v42 }
 0xfbf   :  { %v5978_v30 = vpop.f32.mrf.mxu1 }
 0xfc0   :  { %v5979_v15 = vadd.f32 %v6414_v52, %v5978_v30 }
 0xfc2   :  { %v5990_v45 = vmax.f32 %v5979_v15, 0.0 }
 0xfc4   :  { %6302 = vmatmul.msk.f32.vlgmr.msra.gmra.mxu3 %vm3076_vm9, %v5990_v45 }
 0xfd1   :  { %v5981_v60 = vpop.f32.mrf.mxu1 }
 0xfd2   :  { %v5982_v2 = vadd.f32 %v6414_v52, %v5981_v60 }
 0xfd4   :  { %v5991_v32 = vmax.f32 %v5982_v2, 0.0 }
 0xfd6   :  { %6303 = vmatmul.msk.f32.gmra.mxu3 %vm3076_vm9, %v5991_v32 }
 0xfdf   :  { %v5984_v33 = vpop.f32.mrf.mxu1 }
 0xfe0   :  { %v5985_v22 = vadd.f32 %v6414_v52, %v5984_v33 }
 0xfe2   :  { %v5992_v16 = vmax.f32 %v5985_v22, 0.0 }
 0xfe4   :  { %6304 = vmatmul.msk.f32.gmra.mxu3 %vm3076_vm9, %v5992_v16 }
 0xfe7   :  { %v5987_v63 = vpop.f32.mrf.mxu1 }
 0xfe8   :  { %v5988_v21 = vadd.f32 %v6414_v52, %v5987_v63 }
 0xfea   :  { %v5993_v48 = vmax.f32 %v5988_v21, 0.0 }
 0xfec   :  { %6305 = vmatmul.msk.f32.gmra.mxu3 %vm3076_vm9, %v5993_v48 }
0x1047   :  { %v6024_v10 = vpop.f32.mrf.mxu3 }
0x1059   :  { %v6026_v50 = vpop.f32.mrf.mxu3 }
0x1067   :  { %v6028_v39 = vpop.f32.mrf.mxu3 }
0x1068   :  { %v6029_v28 = vadd.f32 %v6028_v39, %v5994_v29 }
0x106a   :  { %v6034_v26 = vadd.f32 %v6029_v28, %v5944_v59 }
0x106c   :  { %v6036_v51 = vsel %vm186_vm3, %v6034_v26, 0.0 }
0x106d   :  { %6037 = vadd.xlane.f32.xlu2 %v6036_v51 }
0x106f   :  { %v6031_v53 = vpop.f32.mrf.mxu3 }
0x1070   :  { %v6032_v25 = vadd.f32 %v6031_v53, %v5994_v29 }
0x1072   :  { %v6035_v47 = vadd.f32 %v6032_v25, %v5945_v42 }
0x1074   :  { %v6039_v14 = vsel %vm186_vm3, %v6035_v47, 0.0 }
0x1075   :  { %6040 = vadd.xlane.f32.xlu0 %v6039_v14 }
0x10e0   :  { %v6038_v54 = vpop.xlane.xlu2 %6037 }
0x10e1   :  { %v6042_v57 = vmul.f32 %v6038_v54, %v9951_v38 }
0x10e3   :  { %v6044_v46 = vsub.f32 %v6034_v26, %v6042_v57 }
0x10e5   :  { %v6046_v7 = vmul.f32 %v6044_v46, %v6044_v46 }
0x10e7   :  { %v6048_v37 = vsel %vm186_vm3, %v6046_v7, 0.0 }
0x10e8   :  { %v6041_v41 = vpop.xlane.xlu0 %6040  ;;  %6049 = vadd.xlane.f32.xlu1 %v6048_v37 }
0x10e9   :  { %v6043_v4 = vmul.f32 %v6041_v41, %v9951_v38 }
0x10eb   :  { %v6045_v12 = vsub.f32 %v6035_v47, %v6043_v4 }
0x10ed   :  { %v6047_v31 = vmul.f32 %v6045_v12, %v6045_v12 }
0x10ef   :  { %v6051_v6 = vsel %vm186_vm3, %v6047_v31, 0.0 }
0x10f0   :  { %6052 = vadd.xlane.f32.xlu2 %v6051_v6 }
0x115b   :  { %v6050_v56 = vpop.xlane.xlu1 %6049 }
0x115c   :  { %v6054_v5 = vmul.f32 %v6050_v56, %v9951_v38 }
0x115e   :  { %v6056_v55 = vadd.f32 1e-05, %v6054_v5 }
0x1160   :  { %6570 = vrsqrt.f32 %v6056_v55  ;;  %vm6064_vm10 = vweird.f32 %v6056_v55 }
0x1163   :  { %v6053_v43 = vpop.xlane.xlu2 %6052 }
0x1164   :  { %v6055_v62 = vmul.f32 %v6053_v43, %v9951_v38 }
0x1166   :  { %v6571_v27 = vpop.eup %6570  ;;  %v6057_v34 = vadd.f32 1e-05, %v6055_v62 }
0x1167   :  { %v6059_v44 = vmul.f32 %v6571_v27, %v6056_v55  ;;  %vm6065_vm9 = vweird.f32 %v6571_v27 }
0x1168   :  { %6572 = vrsqrt.f32 %v6057_v34  ;;  %vm6066_vm11 = vmor %vm6064_vm10, %vm6065_vm9  ;;  %vm6074_vm4 = vweird.f32 %v6057_v34 }
0x1169   :  { %v6060_v23 = vmul.f32 %v6571_v27, %v6059_v44 }
0x116b   :  { %v6061_v40 = vmul.f32 0.5, %v6060_v23 }
0x116d   :  { %v6062_v20 = vsub.f32 1.5, %v6061_v40 }
0x116e   :  { %v6573_v8 = vpop.eup %6572 }
0x116f   :  { %v6063_v24 = vmul.f32 %v6571_v27, %v6062_v20  ;;  %v6069_v11 = vmul.f32 %v6573_v8, %v6057_v34  ;;  %vm6075_vm0 = vweird.f32 %v6573_v8 }
0x1170   :  { %vm6076_vm5 = vmor %vm6074_vm4, %vm6075_vm0 }
0x1171   :  { %v6067_v59 = vsel %vm6066_vm11, %v6571_v27, %v6063_v24  ;;  %v6070_v61 = vmul.f32 %v6573_v8, %v6069_v11 }
0x1172   :  { %v6078_v38 = vmul.f32 %v6067_v59, %v6044_v46 }
0x1173   :  { %v6071_v19 = vmul.f32 0.5, %v6070_v61 }
0x1174   :  { %v6081_v9 = vmul.f32 %v6080_v49, %v6078_v38 }
0x1175   :  { %v6072_v42 = vsub.f32 1.5, %v6071_v19 }
0x1176   :  { %v6084_v18 = vadd.f32 %v6083_v36, %v6081_v9 }
0x1177   :  { %v6073_v58 = vmul.f32 %v6573_v8, %v6072_v42 }
0x1178   :  { %6306 = vmatmul.msk.f32.vlgmr.msrb.gmra.mxu0 %vm186_vm3, %v6084_v18 }
0x1179   :  { %v6077_v17 = vsel %vm6076_vm5, %v6573_v8, %v6073_v58 }
0x117a   :  { %v6079_v52 = vmul.f32 %v6077_v17, %v6045_v12 }
0x117c   :  { %v6082_v30 = vmul.f32 %v6080_v49, %v6079_v52 }
0x117e   :  { %v6085_v15 = vadd.f32 %v6083_v36, %v6082_v30 }
0x1180   :  { %6307 = vmatmul.msk.f32.gmra.mxu0 %vm186_vm3, %v6085_v15 }
0x11f5   :  { %v6117_v45 = vpop.f32.mrf.mxu0 }
0x11f6   :  { %v6118_v60 = vadd.f32 %v6415_v35, %v6117_v45 }
0x11f8   :  { %6123 = vst [vmem:[#allocation11] sm:$0xff] %v6118_v60 }
0x11fd   :  { %v6120_v2 = vpop.f32.mrf.mxu0 }
0x11fe   :  { %v6121_v32 = vadd.f32 %v6415_v35, %v6120_v2 }
0x1200   :  { %6124 = vst [vmem:[#allocation11 + $0x8] sm:$0xff] %v6121_v32 }
0x1201   :  { %6137 = dma.vmem_to_hbm [thread:$0]  %s6130_s6, 256, %s6132_s5, [#allocation4], %s6729_s21, %s6729_s21, %s6730_s9  }
0x1202   :  { %6724 = dma.done.wait [#allocation4], 256  }
0x1203   :  { %6725 = vsyncadd [#allocation4], 4294967040 }
0x1204   :  { %6142 = vsyncpa [#allocation3], 1 }
0x1205   :  { %6143 = vsyncpa [#allocation6], 1 }
0x1206   :  { %6144 = vsyncpa [#allocation9], 1 }
0x1207   :  { %6145 = vsyncpa [#allocation4], 1 }

</bundles_post_ra>
